<compile_context>
chip_gen: v5e
topology: v5e:2x2
jax: 0.10.0
libtpu: 0.0.40
codegen_flags: <defaults>
</compile_context>

<pallas_src>
import jax
import jax.numpy as jnp
from jax import lax
from jax.experimental import pallas as pl
from jax.experimental.pallas import tpu as pltpu

# ----------------------------- model config ---------------------------------
B = 2          # batch
S = 8          # sequence length
H = 32         # hidden size
NH = 4         # attention heads
HD = H // NH   # head dim
F = 64         # FFN inner dim
L = 2          # number of transformer layers
VOCAB = 50
PAD_IDX = 1    # RoBERTa padding index
LN_EPS = 1e-5
SCALE = HD ** -0.5
VROW = 128     # lane width of the packed vector-parameter slab

# row indices inside the packed (L, 8, VROW) vector slab
_SEG_BQKV, _SEG_BO, _SEG_B1, _SEG_B2, _SEG_G1, _SEG_T1, _SEG_G2, _SEG_T2 = range(8)


def _full_spec(shape):
    """BlockSpec covering the whole (un-tiled) array; same block for every grid step."""
    nd = len(shape)
    return pl.BlockSpec(shape, lambda i, _nd=nd: (0,) * _nd)


def _ln(x, g, b):
    mu = jnp.mean(x, axis=-1, keepdims=True)
    var = jnp.mean((x - mu) ** 2, axis=-1, keepdims=True)
    return (x - mu) * lax.rsqrt(var + LN_EPS) * g + b


def _gelu_erf(x):
    # exact erf-based GELU (fairseq 'gelu')
    return 0.5 * x * (1.0 + lax.erf(x * (2.0 ** -0.5)))


# ---------------------- fully fused encoder kernel --------------------------
def _encoder_kernel(x_ref, keep_ref, bias_ref, embln_ref,
                    wqkv_ref, wo_ref, w1_ref, w2_ref, vecs_ref, o_ref):
    x = x_ref[...]                    # (B*S, H)  token + position embeddings
    keep = keep_ref[...]              # (B*S, 1)  1.0 for non-pad rows, 0.0 for pad
    key_bias = bias_ref[...]          # (B*NH, 1, S) additive key-padding bias

    # --- embedding LayerNorm, then zero padded-token rows (fairseq order) ---
    embln = embln_ref[...]            # (2, H): [gamma; beta]
    x = _ln(x, embln[0], embln[1])
    x = x * keep

    # L is tiny -> static unroll keeps lowering simple and gives the scheduler visibility.
    for l in range(L):
        wqkv = wqkv_ref[l]            # (H, 3H)
        wo = wo_ref[l]                # (H, H)
        w1 = w1_ref[l]                # (H, F)
        w2 = w2_ref[l]                # (F, H)
        vec = vecs_ref[l]             # (8, VROW) packed biases + LN params
        bqkv = vec[_SEG_BQKV, 0:3 * H]
        bo = vec[_SEG_BO, 0:H]
        b1 = vec[_SEG_B1, 0:F]
        b2 = vec[_SEG_B2, 0:H]
        g1 = vec[_SEG_G1, 0:H]
        t1 = vec[_SEG_T1, 0:H]
        g2 = vec[_SEG_G2, 0:H]
        t2 = vec[_SEG_T2, 0:H]

        # --- fused QKV projection over all B*S rows at once ---
        qkv = jnp.dot(x, wqkv, preferred_element_type=jnp.float32) + bqkv  # (B*S, 3H)
        q = qkv[:, 0:H] * SCALE        # fairseq scales q by head_dim**-0.5
        k = qkv[:, H:2 * H]
        v = qkv[:, 2 * H:3 * H]

        # one explicit transpose to (B*NH, S, HD), then batched dots
        q3 = q.reshape(B, S, NH, HD).transpose(0, 2, 1, 3).reshape(B * NH, S, HD)
        k3 = k.reshape(B, S, NH, HD).transpose(0, 2, 1, 3).reshape(B * NH, S, HD)
        v3 = v.reshape(B, S, NH, HD).transpose(0, 2, 1, 3).reshape(B * NH, S, HD)

        scores = jnp.einsum('bqd,bkd->bqk', q3, k3,
                            preferred_element_type=jnp.float32)          # (B*NH, S, S)
        scores = scores + key_bias                                        # key-padding mask
        m = jnp.max(scores, axis=-1, keepdims=True)
        p = jnp.exp(scores - m)
        attn = p * pl.reciprocal(jnp.sum(p, axis=-1, keepdims=True), approx=True)
        ctx = jnp.einsum('bqk,bkd->bqd', attn, v3,
                         preferred_element_type=jnp.float32)              # (B*NH, S, HD)
        ctx = ctx.reshape(B, NH, S, HD).transpose(0, 2, 1, 3).reshape(B * S, H)

        attn_out = jnp.dot(ctx, wo, preferred_element_type=jnp.float32) + bo

        # --- residual + post-LN ---
        h = _ln(x + attn_out, g1, t1)

        # --- FFN (erf GELU) + residual + post-LN ---
        u = _gelu_erf(jnp.dot(h, w1, preferred_element_type=jnp.float32) + b1)
        ffn = jnp.dot(u, w2, preferred_element_type=jnp.float32) + b2
        x = _ln(h + ffn, g2, t2)

    o_ref[...] = x


def fused_encoder(x2d, keep, key_bias, packed):
    inputs = (x2d, keep, key_bias, packed["emb_ln"], packed["wqkv"],
              packed["wo"], packed["w1"], packed["w2"], packed["vecs"])
    return pl.pallas_call(
        _encoder_kernel,
        out_shape=jax.ShapeDtypeStruct((B * S, H), jnp.float32),
        grid=(1,),
        in_specs=[_full_spec(a.shape) for a in inputs],
        out_specs=_full_spec((B * S, H)),
        compiler_params=pltpu.CompilerParams(dimension_semantics=("arbitrary",)),
    )(*inputs)


# ------------------------------ parameter init -------------------------------
def init_params(key):
    std = 0.02

    def nrm(k, shape):
        return jax.random.normal(k, shape, jnp.float32) * std

    keys = jax.random.split(key, 3 + 6 * L)
    params = {
        "tok_emb": nrm(keys[0], (VOCAB, H)),
        "pos_emb": nrm(keys[1], (S + PAD_IDX + 2, H)),
        "emb_ln_g": jnp.ones((H,), jnp.float32),
        "emb_ln_b": jnp.zeros((H,), jnp.float32),
        "layers": [],
    }
    for i in range(L):
        kq, kk, kv, ko, k1, k2 = jax.random.split(keys[3 + i], 6)
        params["layers"].append({
            "wq": nrm(kq, (H, H)), "bq": jnp.zeros((H,), jnp.float32),
            "wk": nrm(kk, (H, H)), "bk": jnp.zeros((H,), jnp.float32),
            "wv": nrm(kv, (H, H)), "bv": jnp.zeros((H,), jnp.float32),
            "wo": nrm(ko, (H, H)), "bo": jnp.zeros((H,), jnp.float32),
            "ln1_g": jnp.ones((H,), jnp.float32), "ln1_b": jnp.zeros((H,), jnp.float32),
            "w1": nrm(k1, (H, F)), "b1": jnp.zeros((F,), jnp.float32),
            "w2": nrm(k2, (F, H)), "b2": jnp.zeros((H,), jnp.float32),
            "ln2_g": jnp.ones((H,), jnp.float32), "ln2_b": jnp.zeros((H,), jnp.float32),
        })
    return params


def pack_params(params):
    """Stack per-layer weights into (L,...) arrays; pack biases/LN params into (L,8,128)."""
    layers = params["layers"]

    def seg(v):
        return jnp.pad(v, (0, VROW - v.shape[0]))

    wqkv = jnp.stack([jnp.concatenate([l["wq"], l["wk"], l["wv"]], axis=1) for l in layers])
    wo = jnp.stack([l["wo"] for l in layers])
    w1 = jnp.stack([l["w1"] for l in layers])
    w2 = jnp.stack([l["w2"] for l in layers])
    vecs = jnp.stack([
        jnp.stack([seg(jnp.concatenate([l["bq"], l["bk"], l["bv"]])),
                   seg(l["bo"]), seg(l["b1"]), seg(l["b2"]),
                   seg(l["ln1_g"]), seg(l["ln1_b"]),
                   seg(l["ln2_g"]), seg(l["ln2_b"])])
        for l in layers])                                          # (L, 8, VROW)
    emb_ln = jnp.stack([params["emb_ln_g"], params["emb_ln_b"]])   # (2, H)
    return {"wqkv": wqkv, "wo": wo, "w1": w1, "w2": w2, "vecs": vecs, "emb_ln": emb_ln}


# ------------------------------ forward (module) -----------------------------
def roberta_encoder_forward(params, packed, input_ids, token_type_ids, attention_mask):
    # token_type_ids / attention_mask intentionally unused (matches the PyTorch module).
    del token_type_ids, attention_mask

    non_pad = (input_ids != PAD_IDX)
    # fairseq utils.make_positions
    positions = jnp.cumsum(non_pad.astype(jnp.int32), axis=1) * non_pad + PAD_IDX
    emb = params["tok_emb"][input_ids] + params["pos_emb"][positions]      # (B, S, H)

    x2d = emb.reshape(B * S, H).astype(jnp.float32)
    keep = non_pad.astype(jnp.float32).reshape(B * S, 1)
    kb = jnp.where(non_pad, 0.0, -1e9).astype(jnp.float32)                 # (B, S)
    key_bias = jnp.broadcast_to(kb[:, None, :], (B, NH, S)).reshape(B * NH, 1, S)

    seq2d = fused_encoder(x2d, keep, key_bias, packed)

    seq_out = seq2d.reshape(B, S, H)   # [B, S, H]
    cls_out = seq_out[:, 0, :]         # [B, H]
    return seq_out, cls_out, None


# ------------------------------ pure-JAX reference ---------------------------
def _reference_forward(params, input_ids):
    non_pad = (input_ids != PAD_IDX)
    positions = jnp.cumsum(non_pad.astype(jnp.int32), axis=1) * non_pad + PAD_IDX
    x = (params["tok_emb"][input_ids] + params["pos_emb"][positions]).astype(jnp.float32)
    x = _ln(x, params["emb_ln_g"], params["emb_ln_b"])
    x = x * non_pad[..., None].astype(jnp.float32)
    bias = jnp.where(non_pad, 0.0, -1e9).astype(jnp.float32)[:, None, None, :]
    for lp in params["layers"]:
        q = (x @ lp["wq"] + lp["bq"]) * SCALE
        k = x @ lp["wk"] + lp["bk"]
        v = x @ lp["wv"] + lp["bv"]
        qh = q.reshape(B, S, NH, HD).transpose(0, 2, 1, 3)
        kh = k.reshape(B, S, NH, HD).transpose(0, 2, 1, 3)
        vh = v.reshape(B, S, NH, HD).transpose(0, 2, 1, 3)
        s = jnp.einsum('bhqd,bhkd->bhqk', qh, kh) + bias
        a = jax.nn.softmax(s, axis=-1)
        ctx = jnp.einsum('bhqk,bhkd->bhqd', a, vh).transpose(0, 2, 1, 3).reshape(B, S, H)
        attn_out = ctx @ lp["wo"] + lp["bo"]
        h = _ln(x + attn_out, lp["ln1_g"], lp["ln1_b"])
        u = _gelu_erf(h @ lp["w1"] + lp["b1"])
        x = _ln(h + (u @ lp["w2"] + lp["b2"]), lp["ln2_g"], lp["ln2_b"])
    return x, x[:, 0, :]


# ----------------------------------- main ------------------------------------
if __name__ == "__main__":
    key = jax.random.PRNGKey(0)
    pkey, ikey = jax.random.split(key)

    params = init_params(pkey)
    packed = pack_params(params)

    input_ids = jax.random.randint(ikey, (B, S), 3, VOCAB, dtype=jnp.int32)
    # pad the tail of the second sequence to exercise the key-padding mask
    input_ids = input_ids.at[1, -2:].set(PAD_IDX)
    token_type_ids = jnp.zeros((B, S), jnp.int32)
    attention_mask = (input_ids != PAD_IDX).astype(jnp.int32)

    fwd = jax.jit(roberta_encoder_forward)
    seq_out, cls_out, _ = fwd(params, packed, input_ids, token_type_ids, attention_mask)
    jax.block_until_ready((seq_out, cls_out))

    assert seq_out.shape == (B, S, H) and cls_out.shape == (B, H)
    assert bool(jnp.all(jnp.isfinite(seq_out)))

    ref_seq, ref_cls = _reference_forward(params, input_ids)
    assert bool(jnp.allclose(seq_out, ref_seq, atol=1e-2, rtol=1e-2))
    assert bool(jnp.allclose(cls_out, ref_cls, atol=1e-2, rtol=1e-2))

    print("KERNEL_OK")
</pallas_src>

<mosaic_0001>
module attributes {stable_mosaic.version = 11 : i64} {
  func.func @_encoder_kernel(%arg0: i32, %arg1: memref<16x32xf32, #tpu.memory_space<vmem>>, %arg2: memref<16x1xf32, #tpu.memory_space<vmem>>, %arg3: memref<8x1x8xf32, #tpu.memory_space<vmem>>, %arg4: memref<2x32xf32, #tpu.memory_space<vmem>>, %arg5: memref<2x32x96xf32, #tpu.memory_space<vmem>>, %arg6: memref<2x32x32xf32, #tpu.memory_space<vmem>>, %arg7: memref<2x32x64xf32, #tpu.memory_space<vmem>>, %arg8: memref<2x64x32xf32, #tpu.memory_space<vmem>>, %arg9: memref<2x8x128xf32, #tpu.memory_space<vmem>>, %arg10: memref<16x32xf32, #tpu.memory_space<vmem>>) attributes {dimension_semantics = [#tpu.dimension_semantics<arbitrary>], iteration_bounds = array<i64: 1>, scalar_prefetch = 0 : i64, scratch_operands = 0 : i64, tpu.core_type = #tpu.core_type<tc>, window_params = [{pipeline_mode = #tpu.pipeline_mode<synchronous>, transform_indices = @transform_0, window_bounds = array<i64: 16, 32>}, {pipeline_mode = #tpu.pipeline_mode<synchronous>, transform_indices = @transform_1, window_bounds = array<i64: 16, 1>}, {pipeline_mode = #tpu.pipeline_mode<synchronous>, transform_indices = @transform_2, window_bounds = array<i64: 8, 1, 8>}, {pipeline_mode = #tpu.pipeline_mode<synchronous>, transform_indices = @transform_3, window_bounds = array<i64: 2, 32>}, {pipeline_mode = #tpu.pipeline_mode<synchronous>, transform_indices = @transform_4, window_bounds = array<i64: 2, 32, 96>}, {pipeline_mode = #tpu.pipeline_mode<synchronous>, transform_indices = @transform_5, window_bounds = array<i64: 2, 32, 32>}, {pipeline_mode = #tpu.pipeline_mode<synchronous>, transform_indices = @transform_6, window_bounds = array<i64: 2, 32, 64>}, {pipeline_mode = #tpu.pipeline_mode<synchronous>, transform_indices = @transform_7, window_bounds = array<i64: 2, 64, 32>}, {pipeline_mode = #tpu.pipeline_mode<synchronous>, transform_indices = @transform_8, window_bounds = array<i64: 2, 8, 128>}, {pipeline_mode = #tpu.pipeline_mode<synchronous>, transform_indices = @transform_9, window_bounds = array<i64: 16, 32>}]} {
    %c0 = arith.constant 0 : index
    %c0_0 = arith.constant 0 : index
    %0 = vector.load %arg1[%c0, %c0_0] : memref<16x32xf32, #tpu.memory_space<vmem>>, vector<16x32xf32>
    %c0_1 = arith.constant 0 : index
    %c0_2 = arith.constant 0 : index
    %1 = vector.load %arg2[%c0_1, %c0_2] : memref<16x1xf32, #tpu.memory_space<vmem>>, vector<16x1xf32>
    %c0_3 = arith.constant 0 : index
    %c0_4 = arith.constant 0 : index
    %c0_5 = arith.constant 0 : index
    %2 = vector.load %arg3[%c0_3, %c0_4, %c0_5] : memref<8x1x8xf32, #tpu.memory_space<vmem>>, vector<8x1x8xf32>
    %c0_6 = arith.constant 0 : index
    %c0_7 = arith.constant 0 : index
    %3 = vector.load %arg4[%c0_6, %c0_7] : memref<2x32xf32, #tpu.memory_space<vmem>>, vector<2x32xf32>
    %4 = vector.extract_strided_slice %3 {offsets = [0, 0], sizes = [1, 32], strides = [1, 1]} : vector<2x32xf32> to vector<1x32xf32>
    %5 = vector.shape_cast %4 : vector<1x32xf32> to vector<32xf32>
    %6 = vector.extract_strided_slice %3 {offsets = [1, 0], sizes = [1, 32], strides = [1, 1]} : vector<2x32xf32> to vector<1x32xf32>
    %7 = vector.shape_cast %6 : vector<1x32xf32> to vector<32xf32>
    %cst = arith.constant dense<0.000000e+00> : vector<16xf32>
    %8 = vector.multi_reduction <add>, %0, %cst [1] : vector<16x32xf32> to vector<16xf32>
    %9 = vector.shape_cast %8 : vector<16xf32> to vector<16x1xf32>
    %cst_8 = arith.constant 3.200000e+01 : f32
    %10 = vector.broadcast %cst_8 : f32 to vector<16x1xf32>
    %11 = arith.divf %9, %10 : vector<16x1xf32>
    %12 = vector.broadcast %11 : vector<16x1xf32> to vector<16x32xf32>
    %13 = arith.subf %0, %12 : vector<16x32xf32>
    %14 = arith.mulf %13, %13 : vector<16x32xf32>
    %cst_9 = arith.constant dense<0.000000e+00> : vector<16xf32>
    %15 = vector.multi_reduction <add>, %14, %cst_9 [1] : vector<16x32xf32> to vector<16xf32>
    %16 = vector.shape_cast %15 : vector<16xf32> to vector<16x1xf32>
    %cst_10 = arith.constant 3.200000e+01 : f32
    %17 = vector.broadcast %cst_10 : f32 to vector<16x1xf32>
    %18 = arith.divf %16, %17 : vector<16x1xf32>
    %19 = vector.broadcast %11 : vector<16x1xf32> to vector<16x32xf32>
    %20 = arith.subf %0, %19 : vector<16x32xf32>
    %cst_11 = arith.constant 9.99999974E-6 : f32
    %21 = vector.broadcast %cst_11 : f32 to vector<16x1xf32>
    %22 = arith.addf %18, %21 : vector<16x1xf32>
    %23 = math.rsqrt %22 : vector<16x1xf32>
    %24 = vector.broadcast %23 : vector<16x1xf32> to vector<16x32xf32>
    %25 = arith.mulf %20, %24 : vector<16x32xf32>
    %26 = vector.shape_cast %5 : vector<32xf32> to vector<1x32xf32>
    %27 = vector.broadcast %26 : vector<1x32xf32> to vector<16x32xf32>
    %28 = arith.mulf %25, %27 : vector<16x32xf32>
    %29 = vector.shape_cast %7 : vector<32xf32> to vector<1x32xf32>
    %30 = vector.broadcast %29 : vector<1x32xf32> to vector<16x32xf32>
    %31 = arith.addf %28, %30 : vector<16x32xf32>
    %32 = vector.broadcast %1 : vector<16x1xf32> to vector<16x32xf32>
    %33 = arith.mulf %31, %32 : vector<16x32xf32>
    %c0_12 = arith.constant 0 : index
    %c0_13 = arith.constant 0 : index
    %c0_14 = arith.constant 0 : index
    %34 = vector.load %arg5[%c0_12, %c0_13, %c0_14] : memref<2x32x96xf32, #tpu.memory_space<vmem>>, vector<1x32x96xf32>
    %35 = vector.shape_cast %34 : vector<1x32x96xf32> to vector<32x96xf32>
    %c0_15 = arith.constant 0 : index
    %c0_16 = arith.constant 0 : index
    %c0_17 = arith.constant 0 : index
    %36 = vector.load %arg6[%c0_15, %c0_16, %c0_17] : memref<2x32x32xf32, #tpu.memory_space<vmem>>, vector<1x32x32xf32>
    %37 = vector.shape_cast %36 : vector<1x32x32xf32> to vector<32x32xf32>
    %c0_18 = arith.constant 0 : index
    %c0_19 = arith.constant 0 : index
    %c0_20 = arith.constant 0 : index
    %38 = vector.load %arg7[%c0_18, %c0_19, %c0_20] : memref<2x32x64xf32, #tpu.memory_space<vmem>>, vector<1x32x64xf32>
    %39 = vector.shape_cast %38 : vector<1x32x64xf32> to vector<32x64xf32>
    %c0_21 = arith.constant 0 : index
    %c0_22 = arith.constant 0 : index
    %c0_23 = arith.constant 0 : index
    %40 = vector.load %arg8[%c0_21, %c0_22, %c0_23] : memref<2x64x32xf32, #tpu.memory_space<vmem>>, vector<1x64x32xf32>
    %41 = vector.shape_cast %40 : vector<1x64x32xf32> to vector<64x32xf32>
    %c0_24 = arith.constant 0 : index
    %c0_25 = arith.constant 0 : index
    %c0_26 = arith.constant 0 : index
    %42 = vector.load %arg9[%c0_24, %c0_25, %c0_26] : memref<2x8x128xf32, #tpu.memory_space<vmem>>, vector<1x8x128xf32>
    %43 = vector.shape_cast %42 : vector<1x8x128xf32> to vector<8x128xf32>
    %44 = vector.extract_strided_slice %43 {offsets = [0, 0], sizes = [1, 96], strides = [1, 1]} : vector<8x128xf32> to vector<1x96xf32>
    %45 = vector.shape_cast %44 : vector<1x96xf32> to vector<96xf32>
    %46 = vector.extract_strided_slice %43 {offsets = [1, 0], sizes = [1, 32], strides = [1, 1]} : vector<8x128xf32> to vector<1x32xf32>
    %47 = vector.shape_cast %46 : vector<1x32xf32> to vector<32xf32>
    %48 = vector.extract_strided_slice %43 {offsets = [2, 0], sizes = [1, 64], strides = [1, 1]} : vector<8x128xf32> to vector<1x64xf32>
    %49 = vector.shape_cast %48 : vector<1x64xf32> to vector<64xf32>
    %50 = vector.extract_strided_slice %43 {offsets = [3, 0], sizes = [1, 32], strides = [1, 1]} : vector<8x128xf32> to vector<1x32xf32>
    %51 = vector.shape_cast %50 : vector<1x32xf32> to vector<32xf32>
    %52 = vector.extract_strided_slice %43 {offsets = [4, 0], sizes = [1, 32], strides = [1, 1]} : vector<8x128xf32> to vector<1x32xf32>
    %53 = vector.shape_cast %52 : vector<1x32xf32> to vector<32xf32>
    %54 = vector.extract_strided_slice %43 {offsets = [5, 0], sizes = [1, 32], strides = [1, 1]} : vector<8x128xf32> to vector<1x32xf32>
    %55 = vector.shape_cast %54 : vector<1x32xf32> to vector<32xf32>
    %56 = vector.extract_strided_slice %43 {offsets = [6, 0], sizes = [1, 32], strides = [1, 1]} : vector<8x128xf32> to vector<1x32xf32>
    %57 = vector.shape_cast %56 : vector<1x32xf32> to vector<32xf32>
    %58 = vector.extract_strided_slice %43 {offsets = [7, 0], sizes = [1, 32], strides = [1, 1]} : vector<8x128xf32> to vector<1x32xf32>
    %59 = vector.shape_cast %58 : vector<1x32xf32> to vector<32xf32>
    %cst_27 = arith.constant dense<0.000000e+00> : vector<16x96xf32>
    %60 = tpu.matmul %33, %35, %cst_27 {dimension_numbers = #tpu.dot_dimension_numbers<[1], [0], [0], [1], [0, 0, 1, 1], [], []>} : vector<16x32xf32>, vector<32x96xf32>, vector<16x96xf32> -> vector<16x96xf32>
    %61 = vector.shape_cast %45 : vector<96xf32> to vector<1x96xf32>
    %62 = vector.broadcast %61 : vector<1x96xf32> to vector<16x96xf32>
    %63 = arith.addf %60, %62 : vector<16x96xf32>
    %64 = vector.extract_strided_slice %63 {offsets = [0, 0], sizes = [16, 32], strides = [1, 1]} : vector<16x96xf32> to vector<16x32xf32>
    %cst_28 = arith.constant 0.353553385 : f32
    %65 = vector.broadcast %cst_28 : f32 to vector<16x32xf32>
    %66 = arith.mulf %64, %65 : vector<16x32xf32>
    %67 = vector.extract_strided_slice %63 {offsets = [0, 32], sizes = [16, 32], strides = [1, 1]} : vector<16x96xf32> to vector<16x32xf32>
    %68 = vector.extract_strided_slice %63 {offsets = [0, 64], sizes = [16, 32], strides = [1, 1]} : vector<16x96xf32> to vector<16x32xf32>
    %69 = vector.shape_cast %66 : vector<16x32xf32> to vector<2x8x4x8xf32>
    %70 = tpu.transpose %69, [0, 2, 1, 3] : vector<2x8x4x8xf32> -> vector<2x4x8x8xf32>
    %71 = vector.shape_cast %70 : vector<2x4x8x8xf32> to vector<8x8x8xf32>
    %72 = vector.shape_cast %67 : vector<16x32xf32> to vector<2x8x4x8xf32>
    %73 = tpu.transpose %72, [0, 2, 1, 3] : vector<2x8x4x8xf32> -> vector<2x4x8x8xf32>
    %74 = vector.shape_cast %73 : vector<2x4x8x8xf32> to vector<8x8x8xf32>
    %75 = vector.shape_cast %68 : vector<16x32xf32> to vector<2x8x4x8xf32>
    %76 = tpu.transpose %75, [0, 2, 1, 3] : vector<2x8x4x8xf32> -> vector<2x4x8x8xf32>
    %77 = vector.shape_cast %76 : vector<2x4x8x8xf32> to vector<8x8x8xf32>
    "tpu.trace_start"() <{level = 10 : i32, message = "bqd,bkd->bqk"}> : () -> ()
    %cst_29 = arith.constant dense<0.000000e+00> : vector<8x8x8xf32>
    %78 = tpu.matmul %71, %74, %cst_29 {dimension_numbers = #tpu.dot_dimension_numbers<[2], [2], [1], [1], [0, 0, 0, 1, 1, 1], [0], [0]>} : vector<8x8x8xf32>, vector<8x8x8xf32>, vector<8x8x8xf32> -> vector<8x8x8xf32>
    "tpu.trace_stop"() : () -> ()
    %79 = vector.broadcast %2 : vector<8x1x8xf32> to vector<8x8x8xf32>
    %80 = arith.addf %78, %79 : vector<8x8x8xf32>
    %cst_30 = arith.constant dense<0xFF800000> : vector<8x8xf32>
    %81 = vector.multi_reduction <maximumf>, %80, %cst_30 [2] : vector<8x8x8xf32> to vector<8x8xf32>
    %82 = vector.shape_cast %81 : vector<8x8xf32> to vector<8x8x1xf32>
    %83 = vector.broadcast %82 : vector<8x8x1xf32> to vector<8x8x8xf32>
    %84 = arith.subf %80, %83 : vector<8x8x8xf32>
    %85 = math.exp %84 : vector<8x8x8xf32>
    %cst_31 = arith.constant dense<0.000000e+00> : vector<8x8xf32>
    %86 = vector.multi_reduction <add>, %85, %cst_31 [2] : vector<8x8x8xf32> to vector<8x8xf32>
    %87 = vector.shape_cast %86 : vector<8x8xf32> to vector<8x8x1xf32>
    %88 = tpu.reciprocal %87 {approx = true} : vector<8x8x1xf32> -> vector<8x8x1xf32>
    %89 = vector.broadcast %88 : vector<8x8x1xf32> to vector<8x8x8xf32>
    %90 = arith.mulf %85, %89 : vector<8x8x8xf32>
    "tpu.trace_start"() <{level = 10 : i32, message = "bqk,bkd->bqd"}> : () -> ()
    %cst_32 = arith.constant dense<0.000000e+00> : vector<8x8x8xf32>
    %91 = tpu.matmul %90, %77, %cst_32 {dimension_numbers = #tpu.dot_dimension_numbers<[2], [1], [1], [2], [0, 0, 0, 1, 1, 2], [0], [0]>} : vector<8x8x8xf32>, vector<8x8x8xf32>, vector<8x8x8xf32> -> vector<8x8x8xf32>
    "tpu.trace_stop"() : () -> ()
    %92 = vector.shape_cast %91 : vector<8x8x8xf32> to vector<2x4x8x8xf32>
    %93 = tpu.transpose %92, [0, 2, 1, 3] : vector<2x4x8x8xf32> -> vector<2x8x4x8xf32>
    %94 = vector.shape_cast %93 : vector<2x8x4x8xf32> to vector<16x32xf32>
    %cst_33 = arith.constant dense<0.000000e+00> : vector<16x32xf32>
    %95 = tpu.matmul %94, %37, %cst_33 {dimension_numbers = #tpu.dot_dimension_numbers<[1], [0], [0], [1], [0, 0, 1, 1], [], []>} : vector<16x32xf32>, vector<32x32xf32>, vector<16x32xf32> -> vector<16x32xf32>
    %96 = vector.shape_cast %47 : vector<32xf32> to vector<1x32xf32>
    %97 = vector.broadcast %96 : vector<1x32xf32> to vector<16x32xf32>
    %98 = arith.addf %95, %97 : vector<16x32xf32>
    %99 = arith.addf %33, %98 : vector<16x32xf32>
    %cst_34 = arith.constant dense<0.000000e+00> : vector<16xf32>
    %100 = vector.multi_reduction <add>, %99, %cst_34 [1] : vector<16x32xf32> to vector<16xf32>
    %101 = vector.shape_cast %100 : vector<16xf32> to vector<16x1xf32>
    %cst_35 = arith.constant 3.200000e+01 : f32
    %102 = vector.broadcast %cst_35 : f32 to vector<16x1xf32>
    %103 = arith.divf %101, %102 : vector<16x1xf32>
    %104 = vector.broadcast %103 : vector<16x1xf32> to vector<16x32xf32>
    %105 = arith.subf %99, %104 : vector<16x32xf32>
    %106 = arith.mulf %105, %105 : vector<16x32xf32>
    %cst_36 = arith.constant dense<0.000000e+00> : vector<16xf32>
    %107 = vector.multi_reduction <add>, %106, %cst_36 [1] : vector<16x32xf32> to vector<16xf32>
    %108 = vector.shape_cast %107 : vector<16xf32> to vector<16x1xf32>
    %cst_37 = arith.constant 3.200000e+01 : f32
    %109 = vector.broadcast %cst_37 : f32 to vector<16x1xf32>
    %110 = arith.divf %108, %109 : vector<16x1xf32>
    %111 = vector.broadcast %103 : vector<16x1xf32> to vector<16x32xf32>
    %112 = arith.subf %99, %111 : vector<16x32xf32>
    %cst_38 = arith.constant 9.99999974E-6 : f32
    %113 = vector.broadcast %cst_38 : f32 to vector<16x1xf32>
    %114 = arith.addf %110, %113 : vector<16x1xf32>
    %115 = math.rsqrt %114 : vector<16x1xf32>
    %116 = vector.broadcast %115 : vector<16x1xf32> to vector<16x32xf32>
    %117 = arith.mulf %112, %116 : vector<16x32xf32>
    %118 = vector.shape_cast %53 : vector<32xf32> to vector<1x32xf32>
    %119 = vector.broadcast %118 : vector<1x32xf32> to vector<16x32xf32>
    %120 = arith.mulf %117, %119 : vector<16x32xf32>
    %121 = vector.shape_cast %55 : vector<32xf32> to vector<1x32xf32>
    %122 = vector.broadcast %121 : vector<1x32xf32> to vector<16x32xf32>
    %123 = arith.addf %120, %122 : vector<16x32xf32>
    %cst_39 = arith.constant dense<0.000000e+00> : vector<16x64xf32>
    %124 = tpu.matmul %123, %39, %cst_39 {dimension_numbers = #tpu.dot_dimension_numbers<[1], [0], [0], [1], [0, 0, 1, 1], [], []>} : vector<16x32xf32>, vector<32x64xf32>, vector<16x64xf32> -> vector<16x64xf32>
    %125 = vector.shape_cast %49 : vector<64xf32> to vector<1x64xf32>
    %126 = vector.broadcast %125 : vector<1x64xf32> to vector<16x64xf32>
    %127 = arith.addf %124, %126 : vector<16x64xf32>
    %cst_40 = arith.constant 5.000000e-01 : f32
    %128 = vector.broadcast %cst_40 : f32 to vector<16x64xf32>
    %129 = arith.mulf %128, %127 : vector<16x64xf32>
    %cst_41 = arith.constant 0.707106769 : f32
    %130 = vector.broadcast %cst_41 : f32 to vector<16x64xf32>
    %131 = arith.mulf %127, %130 : vector<16x64xf32>
    %132 = math.erf %131 : vector<16x64xf32>
    %cst_42 = arith.constant 1.000000e+00 : f32
    %133 = vector.broadcast %cst_42 : f32 to vector<16x64xf32>
    %134 = arith.addf %133, %132 : vector<16x64xf32>
    %135 = arith.mulf %129, %134 : vector<16x64xf32>
    %cst_43 = arith.constant dense<0.000000e+00> : vector<16x32xf32>
    %136 = tpu.matmul %135, %41, %cst_43 {dimension_numbers = #tpu.dot_dimension_numbers<[1], [0], [0], [1], [0, 0, 1, 1], [], []>} : vector<16x64xf32>, vector<64x32xf32>, vector<16x32xf32> -> vector<16x32xf32>
    %137 = vector.shape_cast %51 : vector<32xf32> to vector<1x32xf32>
    %138 = vector.broadcast %137 : vector<1x32xf32> to vector<16x32xf32>
    %139 = arith.addf %136, %138 : vector<16x32xf32>
    %140 = arith.addf %123, %139 : vector<16x32xf32>
    %cst_44 = arith.constant dense<0.000000e+00> : vector<16xf32>
    %141 = vector.multi_reduction <add>, %140, %cst_44 [1] : vector<16x32xf32> to vector<16xf32>
    %142 = vector.shape_cast %141 : vector<16xf32> to vector<16x1xf32>
    %cst_45 = arith.constant 3.200000e+01 : f32
    %143 = vector.broadcast %cst_45 : f32 to vector<16x1xf32>
    %144 = arith.divf %142, %143 : vector<16x1xf32>
    %145 = vector.broadcast %144 : vector<16x1xf32> to vector<16x32xf32>
    %146 = arith.subf %140, %145 : vector<16x32xf32>
    %147 = arith.mulf %146, %146 : vector<16x32xf32>
    %cst_46 = arith.constant dense<0.000000e+00> : vector<16xf32>
    %148 = vector.multi_reduction <add>, %147, %cst_46 [1] : vector<16x32xf32> to vector<16xf32>
    %149 = vector.shape_cast %148 : vector<16xf32> to vector<16x1xf32>
    %cst_47 = arith.constant 3.200000e+01 : f32
    %150 = vector.broadcast %cst_47 : f32 to vector<16x1xf32>
    %151 = arith.divf %149, %150 : vector<16x1xf32>
    %152 = vector.broadcast %144 : vector<16x1xf32> to vector<16x32xf32>
    %153 = arith.subf %140, %152 : vector<16x32xf32>
    %cst_48 = arith.constant 9.99999974E-6 : f32
    %154 = vector.broadcast %cst_48 : f32 to vector<16x1xf32>
    %155 = arith.addf %151, %154 : vector<16x1xf32>
    %156 = math.rsqrt %155 : vector<16x1xf32>
    %157 = vector.broadcast %156 : vector<16x1xf32> to vector<16x32xf32>
    %158 = arith.mulf %153, %157 : vector<16x32xf32>
    %159 = vector.shape_cast %57 : vector<32xf32> to vector<1x32xf32>
    %160 = vector.broadcast %159 : vector<1x32xf32> to vector<16x32xf32>
    %161 = arith.mulf %158, %160 : vector<16x32xf32>
    %162 = vector.shape_cast %59 : vector<32xf32> to vector<1x32xf32>
    %163 = vector.broadcast %162 : vector<1x32xf32> to vector<16x32xf32>
    %164 = arith.addf %161, %163 : vector<16x32xf32>
    %c1 = arith.constant 1 : index
    %c0_49 = arith.constant 0 : index
    %c0_50 = arith.constant 0 : index
    %165 = vector.load %arg5[%c1, %c0_49, %c0_50] : memref<2x32x96xf32, #tpu.memory_space<vmem>>, vector<1x32x96xf32>
    %166 = vector.shape_cast %165 : vector<1x32x96xf32> to vector<32x96xf32>
    %c1_51 = arith.constant 1 : index
    %c0_52 = arith.constant 0 : index
    %c0_53 = arith.constant 0 : index
    %167 = vector.load %arg6[%c1_51, %c0_52, %c0_53] : memref<2x32x32xf32, #tpu.memory_space<vmem>>, vector<1x32x32xf32>
    %168 = vector.shape_cast %167 : vector<1x32x32xf32> to vector<32x32xf32>
    %c1_54 = arith.constant 1 : index
    %c0_55 = arith.constant 0 : index
    %c0_56 = arith.constant 0 : index
    %169 = vector.load %arg7[%c1_54, %c0_55, %c0_56] : memref<2x32x64xf32, #tpu.memory_space<vmem>>, vector<1x32x64xf32>
    %170 = vector.shape_cast %169 : vector<1x32x64xf32> to vector<32x64xf32>
    %c1_57 = arith.constant 1 : index
    %c0_58 = arith.constant 0 : index
    %c0_59 = arith.constant 0 : index
    %171 = vector.load %arg8[%c1_57, %c0_58, %c0_59] : memref<2x64x32xf32, #tpu.memory_space<vmem>>, vector<1x64x32xf32>
    %172 = vector.shape_cast %171 : vector<1x64x32xf32> to vector<64x32xf32>
    %c1_60 = arith.constant 1 : index
    %c0_61 = arith.constant 0 : index
    %c0_62 = arith.constant 0 : index
    %173 = vector.load %arg9[%c1_60, %c0_61, %c0_62] : memref<2x8x128xf32, #tpu.memory_space<vmem>>, vector<1x8x128xf32>
    %174 = vector.shape_cast %173 : vector<1x8x128xf32> to vector<8x128xf32>
    %175 = vector.extract_strided_slice %174 {offsets = [0, 0], sizes = [1, 96], strides = [1, 1]} : vector<8x128xf32> to vector<1x96xf32>
    %176 = vector.shape_cast %175 : vector<1x96xf32> to vector<96xf32>
    %177 = vector.extract_strided_slice %174 {offsets = [1, 0], sizes = [1, 32], strides = [1, 1]} : vector<8x128xf32> to vector<1x32xf32>
    %178 = vector.shape_cast %177 : vector<1x32xf32> to vector<32xf32>
    %179 = vector.extract_strided_slice %174 {offsets = [2, 0], sizes = [1, 64], strides = [1, 1]} : vector<8x128xf32> to vector<1x64xf32>
    %180 = vector.shape_cast %179 : vector<1x64xf32> to vector<64xf32>
    %181 = vector.extract_strided_slice %174 {offsets = [3, 0], sizes = [1, 32], strides = [1, 1]} : vector<8x128xf32> to vector<1x32xf32>
    %182 = vector.shape_cast %181 : vector<1x32xf32> to vector<32xf32>
    %183 = vector.extract_strided_slice %174 {offsets = [4, 0], sizes = [1, 32], strides = [1, 1]} : vector<8x128xf32> to vector<1x32xf32>
    %184 = vector.shape_cast %183 : vector<1x32xf32> to vector<32xf32>
    %185 = vector.extract_strided_slice %174 {offsets = [5, 0], sizes = [1, 32], strides = [1, 1]} : vector<8x128xf32> to vector<1x32xf32>
    %186 = vector.shape_cast %185 : vector<1x32xf32> to vector<32xf32>
    %187 = vector.extract_strided_slice %174 {offsets = [6, 0], sizes = [1, 32], strides = [1, 1]} : vector<8x128xf32> to vector<1x32xf32>
    %188 = vector.shape_cast %187 : vector<1x32xf32> to vector<32xf32>
    %189 = vector.extract_strided_slice %174 {offsets = [7, 0], sizes = [1, 32], strides = [1, 1]} : vector<8x128xf32> to vector<1x32xf32>
    %190 = vector.shape_cast %189 : vector<1x32xf32> to vector<32xf32>
    %cst_63 = arith.constant dense<0.000000e+00> : vector<16x96xf32>
    %191 = tpu.matmul %164, %166, %cst_63 {dimension_numbers = #tpu.dot_dimension_numbers<[1], [0], [0], [1], [0, 0, 1, 1], [], []>} : vector<16x32xf32>, vector<32x96xf32>, vector<16x96xf32> -> vector<16x96xf32>
    %192 = vector.shape_cast %176 : vector<96xf32> to vector<1x96xf32>
    %193 = vector.broadcast %192 : vector<1x96xf32> to vector<16x96xf32>
    %194 = arith.addf %191, %193 : vector<16x96xf32>
    %195 = vector.extract_strided_slice %194 {offsets = [0, 0], sizes = [16, 32], strides = [1, 1]} : vector<16x96xf32> to vector<16x32xf32>
    %cst_64 = arith.constant 0.353553385 : f32
    %196 = vector.broadcast %cst_64 : f32 to vector<16x32xf32>
    %197 = arith.mulf %195, %196 : vector<16x32xf32>
    %198 = vector.extract_strided_slice %194 {offsets = [0, 32], sizes = [16, 32], strides = [1, 1]} : vector<16x96xf32> to vector<16x32xf32>
    %199 = vector.extract_strided_slice %194 {offsets = [0, 64], sizes = [16, 32], strides = [1, 1]} : vector<16x96xf32> to vector<16x32xf32>
    %200 = vector.shape_cast %197 : vector<16x32xf32> to vector<2x8x4x8xf32>
    %201 = tpu.transpose %200, [0, 2, 1, 3] : vector<2x8x4x8xf32> -> vector<2x4x8x8xf32>
    %202 = vector.shape_cast %201 : vector<2x4x8x8xf32> to vector<8x8x8xf32>
    %203 = vector.shape_cast %198 : vector<16x32xf32> to vector<2x8x4x8xf32>
    %204 = tpu.transpose %203, [0, 2, 1, 3] : vector<2x8x4x8xf32> -> vector<2x4x8x8xf32>
    %205 = vector.shape_cast %204 : vector<2x4x8x8xf32> to vector<8x8x8xf32>
    %206 = vector.shape_cast %199 : vector<16x32xf32> to vector<2x8x4x8xf32>
    %207 = tpu.transpose %206, [0, 2, 1, 3] : vector<2x8x4x8xf32> -> vector<2x4x8x8xf32>
    %208 = vector.shape_cast %207 : vector<2x4x8x8xf32> to vector<8x8x8xf32>
    "tpu.trace_start"() <{level = 10 : i32, message = "bqd,bkd->bqk"}> : () -> ()
    %cst_65 = arith.constant dense<0.000000e+00> : vector<8x8x8xf32>
    %209 = tpu.matmul %202, %205, %cst_65 {dimension_numbers = #tpu.dot_dimension_numbers<[2], [2], [1], [1], [0, 0, 0, 1, 1, 1], [0], [0]>} : vector<8x8x8xf32>, vector<8x8x8xf32>, vector<8x8x8xf32> -> vector<8x8x8xf32>
    "tpu.trace_stop"() : () -> ()
    %210 = vector.broadcast %2 : vector<8x1x8xf32> to vector<8x8x8xf32>
    %211 = arith.addf %209, %210 : vector<8x8x8xf32>
    %cst_66 = arith.constant dense<0xFF800000> : vector<8x8xf32>
    %212 = vector.multi_reduction <maximumf>, %211, %cst_66 [2] : vector<8x8x8xf32> to vector<8x8xf32>
    %213 = vector.shape_cast %212 : vector<8x8xf32> to vector<8x8x1xf32>
    %214 = vector.broadcast %213 : vector<8x8x1xf32> to vector<8x8x8xf32>
    %215 = arith.subf %211, %214 : vector<8x8x8xf32>
    %216 = math.exp %215 : vector<8x8x8xf32>
    %cst_67 = arith.constant dense<0.000000e+00> : vector<8x8xf32>
    %217 = vector.multi_reduction <add>, %216, %cst_67 [2] : vector<8x8x8xf32> to vector<8x8xf32>
    %218 = vector.shape_cast %217 : vector<8x8xf32> to vector<8x8x1xf32>
    %219 = tpu.reciprocal %218 {approx = true} : vector<8x8x1xf32> -> vector<8x8x1xf32>
    %220 = vector.broadcast %219 : vector<8x8x1xf32> to vector<8x8x8xf32>
    %221 = arith.mulf %216, %220 : vector<8x8x8xf32>
    "tpu.trace_start"() <{level = 10 : i32, message = "bqk,bkd->bqd"}> : () -> ()
    %cst_68 = arith.constant dense<0.000000e+00> : vector<8x8x8xf32>
    %222 = tpu.matmul %221, %208, %cst_68 {dimension_numbers = #tpu.dot_dimension_numbers<[2], [1], [1], [2], [0, 0, 0, 1, 1, 2], [0], [0]>} : vector<8x8x8xf32>, vector<8x8x8xf32>, vector<8x8x8xf32> -> vector<8x8x8xf32>
    "tpu.trace_stop"() : () -> ()
    %223 = vector.shape_cast %222 : vector<8x8x8xf32> to vector<2x4x8x8xf32>
    %224 = tpu.transpose %223, [0, 2, 1, 3] : vector<2x4x8x8xf32> -> vector<2x8x4x8xf32>
    %225 = vector.shape_cast %224 : vector<2x8x4x8xf32> to vector<16x32xf32>
    %cst_69 = arith.constant dense<0.000000e+00> : vector<16x32xf32>
    %226 = tpu.matmul %225, %168, %cst_69 {dimension_numbers = #tpu.dot_dimension_numbers<[1], [0], [0], [1], [0, 0, 1, 1], [], []>} : vector<16x32xf32>, vector<32x32xf32>, vector<16x32xf32> -> vector<16x32xf32>
    %227 = vector.shape_cast %178 : vector<32xf32> to vector<1x32xf32>
    %228 = vector.broadcast %227 : vector<1x32xf32> to vector<16x32xf32>
    %229 = arith.addf %226, %228 : vector<16x32xf32>
    %230 = arith.addf %164, %229 : vector<16x32xf32>
    %cst_70 = arith.constant dense<0.000000e+00> : vector<16xf32>
    %231 = vector.multi_reduction <add>, %230, %cst_70 [1] : vector<16x32xf32> to vector<16xf32>
    %232 = vector.shape_cast %231 : vector<16xf32> to vector<16x1xf32>
    %cst_71 = arith.constant 3.200000e+01 : f32
    %233 = vector.broadcast %cst_71 : f32 to vector<16x1xf32>
    %234 = arith.divf %232, %233 : vector<16x1xf32>
    %235 = vector.broadcast %234 : vector<16x1xf32> to vector<16x32xf32>
    %236 = arith.subf %230, %235 : vector<16x32xf32>
    %237 = arith.mulf %236, %236 : vector<16x32xf32>
    %cst_72 = arith.constant dense<0.000000e+00> : vector<16xf32>
    %238 = vector.multi_reduction <add>, %237, %cst_72 [1] : vector<16x32xf32> to vector<16xf32>
    %239 = vector.shape_cast %238 : vector<16xf32> to vector<16x1xf32>
    %cst_73 = arith.constant 3.200000e+01 : f32
    %240 = vector.broadcast %cst_73 : f32 to vector<16x1xf32>
    %241 = arith.divf %239, %240 : vector<16x1xf32>
    %242 = vector.broadcast %234 : vector<16x1xf32> to vector<16x32xf32>
    %243 = arith.subf %230, %242 : vector<16x32xf32>
    %cst_74 = arith.constant 9.99999974E-6 : f32
    %244 = vector.broadcast %cst_74 : f32 to vector<16x1xf32>
    %245 = arith.addf %241, %244 : vector<16x1xf32>
    %246 = math.rsqrt %245 : vector<16x1xf32>
    %247 = vector.broadcast %246 : vector<16x1xf32> to vector<16x32xf32>
    %248 = arith.mulf %243, %247 : vector<16x32xf32>
    %249 = vector.shape_cast %184 : vector<32xf32> to vector<1x32xf32>
    %250 = vector.broadcast %249 : vector<1x32xf32> to vector<16x32xf32>
    %251 = arith.mulf %248, %250 : vector<16x32xf32>
    %252 = vector.shape_cast %186 : vector<32xf32> to vector<1x32xf32>
    %253 = vector.broadcast %252 : vector<1x32xf32> to vector<16x32xf32>
    %254 = arith.addf %251, %253 : vector<16x32xf32>
    %cst_75 = arith.constant dense<0.000000e+00> : vector<16x64xf32>
    %255 = tpu.matmul %254, %170, %cst_75 {dimension_numbers = #tpu.dot_dimension_numbers<[1], [0], [0], [1], [0, 0, 1, 1], [], []>} : vector<16x32xf32>, vector<32x64xf32>, vector<16x64xf32> -> vector<16x64xf32>
    %256 = vector.shape_cast %180 : vector<64xf32> to vector<1x64xf32>
    %257 = vector.broadcast %256 : vector<1x64xf32> to vector<16x64xf32>
    %258 = arith.addf %255, %257 : vector<16x64xf32>
    %cst_76 = arith.constant 5.000000e-01 : f32
    %259 = vector.broadcast %cst_76 : f32 to vector<16x64xf32>
    %260 = arith.mulf %259, %258 : vector<16x64xf32>
    %cst_77 = arith.constant 0.707106769 : f32
    %261 = vector.broadcast %cst_77 : f32 to vector<16x64xf32>
    %262 = arith.mulf %258, %261 : vector<16x64xf32>
    %263 = math.erf %262 : vector<16x64xf32>
    %cst_78 = arith.constant 1.000000e+00 : f32
    %264 = vector.broadcast %cst_78 : f32 to vector<16x64xf32>
    %265 = arith.addf %264, %263 : vector<16x64xf32>
    %266 = arith.mulf %260, %265 : vector<16x64xf32>
    %cst_79 = arith.constant dense<0.000000e+00> : vector<16x32xf32>
    %267 = tpu.matmul %266, %172, %cst_79 {dimension_numbers = #tpu.dot_dimension_numbers<[1], [0], [0], [1], [0, 0, 1, 1], [], []>} : vector<16x64xf32>, vector<64x32xf32>, vector<16x32xf32> -> vector<16x32xf32>
    %268 = vector.shape_cast %182 : vector<32xf32> to vector<1x32xf32>
    %269 = vector.broadcast %268 : vector<1x32xf32> to vector<16x32xf32>
    %270 = arith.addf %267, %269 : vector<16x32xf32>
    %271 = arith.addf %254, %270 : vector<16x32xf32>
    %cst_80 = arith.constant dense<0.000000e+00> : vector<16xf32>
    %272 = vector.multi_reduction <add>, %271, %cst_80 [1] : vector<16x32xf32> to vector<16xf32>
    %273 = vector.shape_cast %272 : vector<16xf32> to vector<16x1xf32>
    %cst_81 = arith.constant 3.200000e+01 : f32
    %274 = vector.broadcast %cst_81 : f32 to vector<16x1xf32>
    %275 = arith.divf %273, %274 : vector<16x1xf32>
    %276 = vector.broadcast %275 : vector<16x1xf32> to vector<16x32xf32>
    %277 = arith.subf %271, %276 : vector<16x32xf32>
    %278 = arith.mulf %277, %277 : vector<16x32xf32>
    %cst_82 = arith.constant dense<0.000000e+00> : vector<16xf32>
    %279 = vector.multi_reduction <add>, %278, %cst_82 [1] : vector<16x32xf32> to vector<16xf32>
    %280 = vector.shape_cast %279 : vector<16xf32> to vector<16x1xf32>
    %cst_83 = arith.constant 3.200000e+01 : f32
    %281 = vector.broadcast %cst_83 : f32 to vector<16x1xf32>
    %282 = arith.divf %280, %281 : vector<16x1xf32>
    %283 = vector.broadcast %275 : vector<16x1xf32> to vector<16x32xf32>
    %284 = arith.subf %271, %283 : vector<16x32xf32>
    %cst_84 = arith.constant 9.99999974E-6 : f32
    %285 = vector.broadcast %cst_84 : f32 to vector<16x1xf32>
    %286 = arith.addf %282, %285 : vector<16x1xf32>
    %287 = math.rsqrt %286 : vector<16x1xf32>
    %288 = vector.broadcast %287 : vector<16x1xf32> to vector<16x32xf32>
    %289 = arith.mulf %284, %288 : vector<16x32xf32>
    %290 = vector.shape_cast %188 : vector<32xf32> to vector<1x32xf32>
    %291 = vector.broadcast %290 : vector<1x32xf32> to vector<16x32xf32>
    %292 = arith.mulf %289, %291 : vector<16x32xf32>
    %293 = vector.shape_cast %190 : vector<32xf32> to vector<1x32xf32>
    %294 = vector.broadcast %293 : vector<1x32xf32> to vector<16x32xf32>
    %295 = arith.addf %292, %294 : vector<16x32xf32>
    %c0_85 = arith.constant 0 : index
    %c0_86 = arith.constant 0 : index
    %296 = vector.load %arg10[%c0_85, %c0_86] : memref<16x32xf32, #tpu.memory_space<vmem>>, vector<16x32xf32>
    tpu.vector_store %arg10[%c0_85, %c0_86], %295 {strides = array<i32>} : memref<16x32xf32, #tpu.memory_space<vmem>>, vector<16x32xf32>,
    return
  }
  func.func @transform_0(%arg0: i32) -> (i32, i32) {
    %c0_i32 = arith.constant 0 : i32
    %c0_i32_0 = arith.constant 0 : i32
    %c0_i32_1 = arith.constant 0 : i32
    return %c0_i32, %c0_i32_0 : i32, i32
  }
  func.func @transform_1(%arg0: i32) -> (i32, i32) {
    %c0_i32 = arith.constant 0 : i32
    %c0_i32_0 = arith.constant 0 : i32
    %c0_i32_1 = arith.constant 0 : i32
    return %c0_i32, %c0_i32_0 : i32, i32
  }
  func.func @transform_2(%arg0: i32) -> (i32, i32, i32) {
    %c0_i32 = arith.constant 0 : i32
    %c0_i32_0 = arith.constant 0 : i32
    %c0_i32_1 = arith.constant 0 : i32
    %c0_i32_2 = arith.constant 0 : i32
    return %c0_i32, %c0_i32_0, %c0_i32_1 : i32, i32, i32
  }
  func.func @transform_3(%arg0: i32) -> (i32, i32) {
    %c0_i32 = arith.constant 0 : i32
    %c0_i32_0 = arith.constant 0 : i32
    %c0_i32_1 = arith.constant 0 : i32
    return %c0_i32, %c0_i32_0 : i32, i32
  }
  func.func @transform_4(%arg0: i32) -> (i32, i32, i32) {
    %c0_i32 = arith.constant 0 : i32
    %c0_i32_0 = arith.constant 0 : i32
    %c0_i32_1 = arith.constant 0 : i32
    %c0_i32_2 = arith.constant 0 : i32
    return %c0_i32, %c0_i32_0, %c0_i32_1 : i32, i32, i32
  }
  func.func @transform_5(%arg0: i32) -> (i32, i32, i32) {
    %c0_i32 = arith.constant 0 : i32
    %c0_i32_0 = arith.constant 0 : i32
    %c0_i32_1 = arith.constant 0 : i32
    %c0_i32_2 = arith.constant 0 : i32
    return %c0_i32, %c0_i32_0, %c0_i32_1 : i32, i32, i32
  }
  func.func @transform_6(%arg0: i32) -> (i32, i32, i32) {
    %c0_i32 = arith.constant 0 : i32
    %c0_i32_0 = arith.constant 0 : i32
    %c0_i32_1 = arith.constant 0 : i32
    %c0_i32_2 = arith.constant 0 : i32
    return %c0_i32, %c0_i32_0, %c0_i32_1 : i32, i32, i32
  }
  func.func @transform_7(%arg0: i32) -> (i32, i32, i32) {
    %c0_i32 = arith.constant 0 : i32
    %c0_i32_0 = arith.constant 0 : i32
    %c0_i32_1 = arith.constant 0 : i32
    %c0_i32_2 = arith.constant 0 : i32
    return %c0_i32, %c0_i32_0, %c0_i32_1 : i32, i32, i32
  }
  func.func @transform_8(%arg0: i32) -> (i32, i32, i32) {
    %c0_i32 = arith.constant 0 : i32
    %c0_i32_0 = arith.constant 0 : i32
    %c0_i32_1 = arith.constant 0 : i32
    %c0_i32_2 = arith.constant 0 : i32
    return %c0_i32, %c0_i32_0, %c0_i32_1 : i32, i32, i32
  }
  func.func @transform_9(%arg0: i32) -> (i32, i32) {
    %c0_i32 = arith.constant 0 : i32
    %c0_i32_0 = arith.constant 0 : i32
    %c0_i32_1 = arith.constant 0 : i32
    return %c0_i32, %c0_i32_0 : i32, i32
  }
}

</mosaic_0001>

<bundles_post_ra>
// kernel: roberta_encoder_forward.1
= control target key start
LH: loop header
LB: loop body
LE: loop exit
PB: predicated region body
PF: predicated region fallthrough
CT: control target
= control target key end

     0   :  { %vm45_vm0 = vcmask 261120   ;;  %v4024_v4 = vmov 32.0   ;;  %v4025_v8 = vmov 0   ;;  %s4026_s26 = smov 120   ;;  %s4027_s27 = smov 112   ;;  %vm189_vm8 = vcmask 1047556   ;;  %s5455_s0 = inlined_call_operand.vmem [shape: f32[16,32], index: 0, kind: input, shape index: {}]   ;;  %s5456_s1 = inlined_call_operand.vmem [shape: f32[16,1], index: 1, kind: input, shape index: {}]   ;;  %s5457_s4 = inlined_call_operand.vmem [shape: f32[2,32,96], index: 4, kind: input, shape index: {}]   ;;  %s5458_s3 = inlined_call_operand.vmem [shape: f32[2,32], index: 3, kind: input, shape index: {}]   ;;  %s5459_s8 = inlined_call_operand.vmem [shape: f32[2,8,128], index: 8, kind: input, shape index: {}]   ;;  %s5460_s2 = inlined_call_operand.vmem [shape: f32[8,1,8], index: 2, kind: input, shape index: {}]   ;;  %s5461_s5 = inlined_call_operand.vmem [shape: f32[2,32,32], index: 5, kind: input, shape index: {}]   ;;  %s5462_s6 = inlined_call_operand.vmem [shape: f32[2,32,64], index: 6, kind: input, shape index: {}]   ;;  %s5463_s7 = inlined_call_operand.vmem [shape: f32[2,64,32], index: 7, kind: input, shape index: {}]   ;;  %s5464_s9 = inlined_call_operand.vmem [shape: f32[16,32], index: 9, kind: output, shape index: {}]  }
   0x1   :  { %v32_v0 = vld [vmem:[%s5455_s0] sm:$0xff]  ;;  %v33_v2 = vld [vmem:[%s5455_s0 + $0x8] sm:$0xff]  ;;  %3920 = vrcp.f32 %v4024_v4  ;;  %3870 = vset.pattern.permute.xlu2 %v4025_v8  ;;  %3911 = vset.pattern.permute.xlu0 %v4025_v8  ;;  %v118_v24 = vld [vmem:[%s5457_s4 + $0x18] sm:$0xff]  ;;  %s4028_s28 = smov 104   ;;  %s4029_s29 = smov 96   ;;  %vm935_vm9 = vcmask 64512  }
   0x2   :  { %v46_v1 = vsel %vm45_vm0, %v32_v0, 0.0  ;;  %v49_v3 = vsel %vm45_vm0, %v33_v2, 0.0  ;;  %v34_v7 = vld [vmem:[%s5456_s1] sm:$0xff]  ;;  %v35_v11 = vld [vmem:[%s5456_s1 + $0x8] sm:$0xff]  ;;  %155 = vmatpush.msra.mxu0 %v118_v24  ;;  %v117_v25 = vld [vmem:[%s5457_s4 + $0x10] sm:$0xff]  ;;  %s4032_s21 = smov 64  }
   0x3   :  { %47 = vadd.xlane.f32.xlu0 %v46_v1  ;;  %105 = vperm.xlu2 %3870, %v34_v7   ;;  %v116_v26 = vld [vmem:[%s5457_s4 + $0x8] sm:$0xff]  ;;  %v115_v27 = vld [vmem:[%s5457_s4] sm:$0xff]  ;;  %s4033_s24 = smov 16   ;;  %s4035_s25 = smov 8   ;;  %vm1662_vm10 = vcmask 130048   ;;  %vm1665_vm11 = vcmask 195584  }
   0x4   :  { %156 = vmatpush.msra.mxu0 %v117_v25  ;;  %v44_v39 = vld [vmem:[%s5458_s3] sm:$0x3]  ;;  %v4031_v25 = vmov 1934713408   ;;  %s4034_s3 = smov 24  }
   0x5   :  { %v97_v43 = vperm.slane %v44_v39, 0  ;;  %v100_v46 = vperm.slane %v44_v39, 1  ;;  %v135_v61 = vld [vmem:[%s5459_s8] sm:$0xff] }
   0x6   :  { %157 = vmatpush.msra.mxu0 %v116_v26  ;;  %v136_v62 = vperm.slane %v135_v61, 0  ;;  %v218_v26 = vunpack.c.l.s4 %v4031_v25 }
   0x7   :  { %v3921_v5 = vpop.eup %3920 }
   0x8   :  { %v53_v6 = vmul.f32 32.0, %v3921_v5  ;;  %vm57_vm1 = vweird.f32 %v3921_v5  ;;  %158 = vmatpush.msra.mxu0 %v115_v27 }
   0xa   :  { %v54_v9 = vsub.f32 1.0, %v53_v6 }
   0xb   :  { %50 = vadd.xlane.f32.xlu0 %v49_v3  ;;  %110 = vperm.xlu2 %3870, %v35_v11  }
   0xc   :  { %v55_v10 = vmul.f32 %v3921_v5, %v54_v9 }
   0xe   :  { %v56_v12 = vadd.f32 %v3921_v5, %v55_v10 }
  0x10   :  { %v4100_v13 = vsel %vm57_vm1, %v3921_v5, %v56_v12 }
  0x5d   :  { %v106_v51 = vpop.permute.xlu2 %105 }
  0x65   :  { %v111_v59 = vpop.permute.xlu2 %110 }
  0x76   :  { %v48_v14 = vpop.xlane.xlu0 %47 }
  0x77   :  { %v59_v15 = vmul.f32 %v4100_v13, %v48_v14 }
  0x79   :  { %v61_v16 = vsub.f32 %v32_v0, %v59_v15  ;;  %v4030_v15 = vmov 1983009808  }
  0x7b   :  { %v63_v17 = vmul.f32 %v61_v16, %v61_v16 }
  0x7d   :  { %v65_v18 = vsel %vm45_vm0, %v63_v17, 0.0 }
  0x7e   :  { %66 = vadd.xlane.f32.xlu1 %v65_v18  ;;  %v51_v19 = vpop.xlane.xlu0 %50 }
  0x7f   :  { %v60_v20 = vmul.f32 %v4100_v13, %v51_v19 }
  0x81   :  { %v62_v21 = vsub.f32 %v33_v2, %v60_v20 }
  0x83   :  { %v64_v22 = vmul.f32 %v62_v21, %v62_v21 }
  0x85   :  { %v68_v23 = vsel %vm45_vm0, %v64_v22, 0.0 }
  0x86   :  { %69 = vadd.xlane.f32.xlu1 %v68_v23 }
  0xf1   :  { %v67_v28 = vpop.xlane.xlu1 %66 }
  0xf2   :  { %v71_v29 = vmul.f32 %v67_v28, %v4100_v13 }
  0xf4   :  { %v73_v30 = vadd.f32 1e-05, %v71_v29 }
  0xf6   :  { %3922 = vrsqrt.f32 %v73_v30  ;;  %vm81_vm3 = vweird.f32 %v73_v30 }
  0xf9   :  { %v70_v31 = vpop.xlane.xlu1 %69 }
  0xfa   :  { %v72_v32 = vmul.f32 %v70_v31, %v4100_v13  ;;  %v4201_v31 = vunpack.c.0.s8 %v218_v26 }
  0xfc   :  { %v3923_v33 = vpop.eup %3922  ;;  %v74_v34 = vadd.f32 1e-05, %v72_v32 }
  0xfd   :  { %v76_v35 = vmul.f32 %v3923_v33, %v73_v30  ;;  %vm82_vm2 = vweird.f32 %v3923_v33 }
  0xfe   :  { %3924 = vrsqrt.f32 %v74_v34  ;;  %vm83_vm4 = vmor %vm81_vm3, %vm82_vm2  ;;  %vm91_vm6 = vweird.f32 %v74_v34 }
  0xff   :  { %v77_v36 = vmul.f32 %v3923_v33, %v76_v35 }
 0x101   :  { %v78_v37 = vmul.f32 0.5, %v77_v36 }
 0x103   :  { %v79_v38 = vsub.f32 1.5, %v78_v37 }
 0x104   :  { %v3925_v40 = vpop.eup %3924 }
 0x105   :  { %v80_v41 = vmul.f32 %v3923_v33, %v79_v38  ;;  %v86_v42 = vmul.f32 %v3925_v40, %v74_v34  ;;  %vm92_vm5 = vweird.f32 %v3925_v40 }
 0x106   :  { %vm93_vm7 = vmor %vm91_vm6, %vm92_vm5 }
 0x107   :  { %v87_v44 = vmul.f32 %v3925_v40, %v86_v42  ;;  %v84_v45 = vsel %vm83_vm4, %v3923_v33, %v80_v41 }
 0x108   :  { %v95_v47 = vmul.f32 %v84_v45, %v61_v16  ;;  %v194_v16 = vunpack.c.l.s4 %v4030_v15 }
 0x109   :  { %v88_v48 = vmul.f32 0.5, %v87_v44 }
 0x10a   :  { %v98_v49 = vmul.f32 %v97_v43, %v95_v47 }
 0x10b   :  { %v89_v50 = vsub.f32 1.5, %v88_v48 }
 0x10c   :  { %v101_v52 = vadd.f32 %v100_v46, %v98_v49 }
 0x10d   :  { %v90_v53 = vmul.f32 %v3925_v40, %v89_v50 }
 0x10e   :  { %v4123_v54 = vmul.f32 %v106_v51, %v101_v52 }
 0x10f   :  { %v94_v55 = vsel %vm93_vm7, %v3925_v40, %v90_v53  ;;  %vm1869_vm7 = vcmask 523264  }
 0x110   :  { %v96_v56 = vmul.f32 %v94_v55, %v62_v21  ;;  %3769 = vmatmul.msk.f32.vlgmr.msra.gmra.mxu0 %vm45_vm0, %v4123_v54  ;;  %v4195_v21 = vunpack.c.0.s8 %v194_v16 }
 0x112   :  { %v99_v57 = vmul.f32 %v97_v43, %v96_v56 }
 0x114   :  { %v102_v58 = vadd.f32 %v100_v46, %v99_v57 }
 0x116   :  { %v4127_v60 = vmul.f32 %v111_v59, %v102_v58 }
 0x118   :  { %3770 = vmatmul.msk.f32.gmra.mxu0 %vm45_vm0, %v4127_v60 }
 0x18d   :  { %v160_v63 = vpop.f32.mrf.mxu0 }
 0x18e   :  { %v4134_v0 = vadd.f32 %v160_v63, %v136_v62 }
 0x190   :  { %411 = vrot.lane.b32.xlu2 %v4134_v0, %s4026_s26  ;;  %415 = vrot.lane.b32.xlu0 %v4134_v0, %s4027_s27  ;;  %v166_v3 = vmul.f32 0.35355338, %v4134_v0 }
 0x191   :  { %419 = vrot.lane.b32.xlu1 %v4134_v0, %s4028_s28 }
 0x192   :  { %v191_v20 = vrot.slane %v166_v3, 4 }
 0x195   :  { %v163_v1 = vpop.f32.mrf.mxu0 }
 0x196   :  { %v4142_v2 = vadd.f32 %v163_v1, %v136_v62 }
 0x198   :  { %421 = vrot.lane.b32.xlu0 %v4142_v2, %s4028_s28  ;;  %413 = vrot.lane.b32.xlu2 %v4142_v2, %s4026_s26  ;;  %v4185_v12 = vmul.f32 0.35355338, %v4142_v2 }
 0x199   :  { %423 = vrot.lane.b32.xlu1 %v4134_v0, %s4029_s29 }
 0x1a0   :  { %182 = vrot.lane.b32.xlu0 %v166_v3, %s4028_s28  ;;  %417 = vrot.lane.b32.xlu2 %v4142_v2, %s4027_s27 }
 0x1a1   :  { %425 = vrot.lane.b32.xlu1 %v4142_v2, %s4029_s29 }
 0x1a8   :  { %176 = vrot.lane.b32.xlu2 %v166_v3, %s4027_s27 }
 0x1ea   :  { %v4157_v4 = vpop.permute.xlu2 %411 }
 0x1eb   :  { %427 = vrot.lane.b32.xlu1 %v4157_v4, %s4029_s29 }
 0x1f2   :  { %v4161_v5 = vpop.permute.xlu2 %413 }
 0x1fa   :  { %v4173_v9 = vpop.permute.xlu2 %417 }
 0x202   :  { %v4163_v6 = vpop.permute.xlu0 %415  ;;  %v177_v14 = vpop.permute.xlu2 %176 }
 0x203   :  { %v4165_v7 = vpop.permute.xlu1 %419  ;;  %431 = vrot.lane.b32.xlu2 %v4163_v6, %s4029_s29  ;;  %v188_v17 = vrot.slane %v177_v14, 4  ;;  %v192_v23 = vsel %vm189_vm8, %v177_v14, %v191_v20 }
 0x204   :  { %v3876_v8 = vpack.i.bf16 %v4165_v7, %v4163_v6  ;;  %435 = vrot.lane.b32.xlu0 %v4165_v7, %s4029_s29  ;;  %v200_v28 = vperm.slane %v192_v23, %v4195_v21 }
 0x205   :  { %v190_v22 = vsel %vm189_vm8, %v188_v17, %v166_v3 }
 0x206   :  { %v196_v27 = vperm.slane %v190_v22, %v4195_v21  ;;  %v227_v36 = vrot.slane %v200_v28, 4 }
 0x208   :  { %v215_v34 = vrot.slane %v196_v27, 4 }
 0x20a   :  { %v4175_v10 = vpop.permute.xlu0 %421 }
 0x20b   :  { %v3886_v11 = vpack.i.bf16 %v4175_v10, %v4173_v9  ;;  %170 = vrot.lane.b32.xlu2 %v166_v3, %s4026_s26  ;;  %437 = vrot.lane.b32.xlu1 %v4175_v10, %s4029_s29  ;;  %v424_v19 = vpop.permute.xlu1 %423 }
 0x20c   :  { %429 = vrot.lane.b32.xlu0 %v4161_v5, %s4029_s29  ;;  %v449_v37 = vrot.slane %v424_v19, 4 }
 0x212   :  { %v183_v24 = vpop.permute.xlu0 %182 }
 0x213   :  { %433 = vrot.lane.b32.xlu2 %v4173_v9, %s4029_s29  ;;  %184 = vrot.lane.b32.xlu1 %v4185_v12, %s4028_s28  ;;  %v201_v29 = vrot.slane %v183_v24, 4  ;;  %v426_v38 = vpop.permute.xlu1 %425 }
 0x214   :  { %172 = vrot.lane.b32.xlu0 %v4185_v12, %s4026_s26  ;;  %v505_v52 = vrot.slane %v426_v38, 4 }
 0x21b   :  { %178 = vrot.lane.b32.xlu2 %v4185_v12, %s4027_s27 }
 0x25d   :  { %v432_v18 = vpop.permute.xlu2 %431  ;;  %v428_v15 = vpop.permute.xlu1 %427 }
 0x25e   :  { %v447_v40 = vrot.slane %v432_v18, 4  ;;  %v450_v44 = vsel %vm189_vm8, %v432_v18, %v449_v37 }
 0x25f   :  { %v4216_v55 = vperm.slane %v450_v44, %v4195_v21 }
 0x260   :  { %v448_v53 = vsel %vm189_vm8, %v447_v40, %v424_v19 }
 0x261   :  { %v454_v16 = vperm.slane %v448_v53, %v4195_v21 }
 0x263   :  { %v473_v37 = vrot.slane %v454_v16, 4 }
 0x265   :  { %v171_v30 = vpop.permute.xlu2 %170 }
 0x266   :  { %v202_v32 = vsel %vm189_vm8, %v201_v29, %v171_v30  ;;  %v203_v33 = vrot.slane %v171_v30, 4  ;;  %v247_v29 = vrot.slane %v4185_v12, 4 }
 0x267   :  { %v208_v35 = vperm.slane %v202_v32, %v4195_v21 }
 0x268   :  { %v204_v39 = vsel %vm189_vm8, %v183_v24, %v203_v33  ;;  %v485_v33 = vrot.slane %v4216_v55, 4 }
 0x269   :  { %v212_v41 = vperm.slane %v204_v39, %v4195_v21  ;;  %v213_v42 = vrot.slane %v208_v35, 4  ;;  %v216_v43 = vsel %vm189_vm8, %v208_v35, %v215_v34 }
 0x26a   :  { %v224_v45 = vperm.slane %v216_v43, %v4201_v31 }
 0x26b   :  { %v214_v46 = vsel %vm189_vm8, %v213_v42, %v196_v27  ;;  %v225_v47 = vrot.slane %v212_v41, 4  ;;  %v228_v48 = vsel %vm189_vm8, %v212_v41, %v227_v36 }
 0x26c   :  { %v220_v49 = vperm.slane %v214_v46, %v4201_v31  ;;  %v236_v50 = vperm.slane %v228_v48, %v4201_v31  ;;  %v239_v51 = vrot.slane %v224_v45, 4 }
 0x26d   :  { %v226_v56 = vsel %vm189_vm8, %v225_v47, %v200_v28  ;;  %v434_v57 = vpop.permute.xlu2 %433  ;;  %v461_v28 = vrot.slane %v428_v15, 4 }
 0x26e   :  { %v232_v58 = vperm.slane %v226_v56, %v4201_v31  ;;  %v237_v59 = vrot.slane %v220_v49, 4  ;;  %v240_v61 = vsel %vm189_vm8, 0.0, %v239_v51  ;;  %v243_v62 = vrot.slane %v236_v50, 4 }
 0x26f   :  { %v306_v63 = vrot.slane %v240_v61, 4  ;;  %v503_v1 = vrot.slane %v434_v57, 4  ;;  %v506_v3 = vsel %vm189_vm8, %v434_v57, %v505_v52  ;;  %v301_v14 = vsel %vm189_vm8, %v239_v51, %v220_v49 }
 0x270   :  { %v238_v17 = vsel %vm189_vm8, 0.0, %v237_v59  ;;  %v241_v18 = vrot.slane %v232_v58, 4  ;;  %v244_v19 = vsel %vm189_vm8, 0.0, %v243_v62  ;;  %v4227_v22 = vperm.slane %v506_v3, %v4195_v21 }
 0x271   :  { %v317_v20 = vrot.slane %v244_v19, 4  ;;  %v305_v23 = vperm.slane %v301_v14, %v4195_v21  ;;  %v307_v24 = vsel %vm189_vm8, %v306_v63, %v238_v17  ;;  %v504_v26 = vsel %vm189_vm8, %v503_v1, %v426_v38 }
 0x272   :  { %v242_v25 = vsel %vm189_vm8, 0.0, %v241_v18  ;;  %v311_v27 = vperm.slane %v307_v24, %v4195_v21  ;;  %v312_v30 = vsel %vm189_vm8, %v243_v62, %v232_v58  ;;  %v4240_v39 = vperm.slane %v504_v26, %v4195_v21 }
 0x273   :  { %v318_v32 = vsel %vm189_vm8, %v317_v20, %v242_v25  ;;  %v325_v36 = vrot.slane %v305_v23, 4  ;;  %v541_v38 = vrot.slane %v4227_v22, 4  ;;  %v316_v41 = vperm.slane %v312_v30, %v4195_v21 }
 0x274   :  { %v322_v34 = vperm.slane %v318_v32, %v4195_v21  ;;  %v323_v35 = vrot.slane %v311_v27, 4  ;;  %v529_v57 = vrot.slane %v4240_v39, 4 }
 0x275   :  { %v179_v40 = vpop.permute.xlu2 %178  ;;  %v326_v56 = vsel %vm189_vm8, %v311_v27, %v325_v36 }
 0x276   :  { %v245_v42 = vrot.slane %v179_v40, 4  ;;  %v248_v43 = vsel %vm189_vm8, %v179_v40, %v247_v29  ;;  %v436_v44 = vpop.permute.xlu0 %435  ;;  %v324_v45 = vsel %vm189_vm8, %v323_v35, %v305_v23  ;;  %v335_v46 = vrot.slane %v322_v34, 4 }
 0x277   :  { %v4247_v47 = vperm.slane %v248_v43, %v4195_v21  ;;  %v459_v48 = vrot.slane %v436_v44, 4  ;;  %v462_v49 = vsel %vm189_vm8, %v436_v44, %v461_v28  ;;  %v330_v50 = vperm.slane %v324_v45, %v4201_v31 }
 0x278   :  { %v246_v51 = vsel %vm189_vm8, %v245_v42, %v4185_v12  ;;  %v470_v52 = vperm.slane %v462_v49, %v4195_v21  ;;  %v336_v53 = vsel %vm189_vm8, %v335_v46, %v316_v41  ;;  %v4267_v18 = vperm.slane %v326_v56, %v4201_v31 }
 0x279   :  { %v4258_v58 = vperm.slane %v246_v51, %v4195_v21  ;;  %v460_v59 = vsel %vm189_vm8, %v459_v48, %v428_v15  ;;  %v342_v61 = vperm.slane %v336_v53, %v4201_v31  ;;  %v349_v1 = vrot.slane %v330_v50, 4 }
 0x27a   :  { %v466_v62 = vperm.slane %v460_v59, %v4195_v21  ;;  %v483_v63 = vrot.slane %v470_v52, 4  ;;  %v486_v12 = vsel %vm189_vm8, %v470_v52, %v485_v33  ;;  %v283_v3 = vrot.slane %v4247_v47, 4 }
 0x27b   :  { %v494_v14 = vperm.slane %v486_v12, %v4201_v31  ;;  %v347_v17 = vrot.slane %v342_v61, 4  ;;  %v337_v23 = vrot.slane %v316_v41, 4  ;;  %v271_v24 = vrot.slane %v4258_v58, 4 }
 0x27c   :  { %v471_v19 = vrot.slane %v466_v62, 4  ;;  %v474_v20 = vsel %vm189_vm8, %v466_v62, %v473_v37  ;;  %v484_v15 = vsel %vm189_vm8, %v483_v63, %v4216_v55  ;;  %v4280_v35 = vsel %vm189_vm8, %v342_v61, %v349_v1 }
 0x27d   :  { %v482_v25 = vperm.slane %v474_v20, %v4201_v31  ;;  %v490_v26 = vperm.slane %v484_v15, %v4201_v31  ;;  %v501_v27 = vrot.slane %v494_v14, 4  ;;  %v438_v28 = vpop.permute.xlu1 %437  ;;  %v4277_v33 = vsel %vm189_vm8, %v347_v17, %v330_v50 }
 0x27e   :  { %v472_v29 = vsel %vm189_vm8, %v471_v19, %v454_v16  ;;  %v515_v30 = vrot.slane %v438_v28, 4  ;;  %v430_v32 = vpop.permute.xlu0 %429  ;;  %v4287_v16 = vsel %vm189_vm8, %v322_v34, %v337_v23 }
 0x27f   :  { %v478_v55 = vperm.slane %v472_v29, %v4201_v31  ;;  %v497_v36 = vrot.slane %v482_v25, 4  ;;  %v499_v37 = vrot.slane %v490_v26, 4  ;;  %v502_v40 = vsel %vm189_vm8, 0.0, %v501_v27 }
 0x280   :  { %v570_v41 = vsel %vm189_vm8, %v501_v27, %v490_v26  ;;  %v516_v42 = vsel %vm189_vm8, %v515_v30, %v430_v32  ;;  %v517_v43 = vrot.slane %v430_v32, 4  ;;  %v575_v46 = vrot.slane %v502_v40, 4 }
 0x281   :  { %v495_v44 = vrot.slane %v478_v55, 4  ;;  %v498_v45 = vsel %vm189_vm8, 0.0, %v497_v36  ;;  %v522_v48 = vperm.slane %v516_v42, %v4195_v21  ;;  %v500_v49 = vsel %vm189_vm8, 0.0, %v499_v37 }
 0x282   :  { %v564_v50 = vrot.slane %v498_v45, 4  ;;  %v518_v51 = vsel %vm189_vm8, %v438_v28, %v517_v43  ;;  %v559_v52 = vsel %vm189_vm8, %v497_v36, %v478_v55  ;;  %v574_v12 = vperm.slane %v570_v41, %v4195_v21 }
 0x283   :  { %v526_v53 = vperm.slane %v518_v51, %v4195_v21  ;;  %v527_v56 = vrot.slane %v522_v48, 4  ;;  %v530_v59 = vsel %vm189_vm8, %v522_v48, %v529_v57  ;;  %v496_v34 = vsel %vm189_vm8, 0.0, %v495_v44 }
 0x284   :  { %v538_v61 = vperm.slane %v530_v59, %v4201_v31  ;;  %v563_v62 = vperm.slane %v559_v52, %v4195_v21  ;;  %v565_v63 = vsel %vm189_vm8, %v564_v50, %v496_v34 }
 0x285   :  { %v528_v1 = vsel %vm189_vm8, %v527_v56, %v4240_v39  ;;  %v539_v14 = vrot.slane %v526_v53, 4  ;;  %v542_v17 = vsel %vm189_vm8, %v526_v53, %v541_v38  ;;  %v185_v19 = vpop.permute.xlu1 %184  ;;  %v569_v57 = vperm.slane %v565_v63, %v4195_v21 }
 0x286   :  { %v534_v20 = vperm.slane %v528_v1, %v4201_v31  ;;  %v550_v15 = vperm.slane %v542_v17, %v4201_v31  ;;  %v553_v23 = vrot.slane %v538_v61, 4  ;;  %v257_v25 = vrot.slane %v185_v19, 4  ;;  %v173_v26 = vpop.permute.xlu0 %172 }
 0x287   :  { %v540_v27 = vsel %vm189_vm8, %v539_v14, %v4227_v22  ;;  %v259_v28 = vrot.slane %v173_v26, 4  ;;  %v576_v39 = vsel %vm189_vm8, %v575_v46, %v500_v49  ;;  %v581_v29 = vrot.slane %v569_v57, 4 }
 0x288   :  { %v546_v30 = vperm.slane %v540_v27, %v4201_v31  ;;  %v551_v38 = vrot.slane %v534_v20, 4  ;;  %v554_v32 = vsel %vm189_vm8, 0.0, %v553_v23  ;;  %v557_v55 = vrot.slane %v550_v15, 4 }
 0x289   :  { %v613_v36 = vsel %vm189_vm8, %v553_v23, %v534_v20  ;;  %v618_v37 = vrot.slane %v554_v32, 4  ;;  %v258_v40 = vsel %vm189_vm8, %v257_v25, %v173_v26  ;;  %v260_v41 = vsel %vm189_vm8, %v185_v19, %v259_v28 }
 0x28a   :  { %v552_v42 = vsel %vm189_vm8, 0.0, %v551_v38  ;;  %v555_v22 = vrot.slane %v546_v30, 4  ;;  %v558_v43 = vsel %vm189_vm8, 0.0, %v557_v55  ;;  %v580_v44 = vperm.slane %v576_v39, %v4195_v21 }
 0x28b   :  { %v4321_v45 = vperm.slane %v613_v36, %v4195_v21  ;;  %v619_v46 = vsel %vm189_vm8, %v618_v37, %v552_v42  ;;  %v624_v48 = vsel %vm189_vm8, %v557_v55, %v546_v30  ;;  %v264_v49 = vperm.slane %v258_v40, %v4195_v21 }
 0x28c   :  { %v556_v50 = vsel %vm189_vm8, 0.0, %v555_v22  ;;  %v629_v51 = vrot.slane %v558_v43, 4  ;;  %v268_v52 = vperm.slane %v260_v41, %v4195_v21  ;;  %v582_v53 = vsel %vm189_vm8, %v581_v29, %v563_v62 }
 0x28d   :  { %v269_v56 = vrot.slane %v264_v49, 4  ;;  %v272_v59 = vsel %vm189_vm8, %v264_v49, %v271_v24  ;;  %v583_v34 = vrot.slane %v563_v62, 4  ;;  %v588_v61 = vperm.slane %v582_v53, %v4201_v31 }
 0x28e   :  { %v280_v63 = vperm.slane %v272_v59, %v4201_v31  ;;  %v281_v1 = vrot.slane %v268_v52, 4  ;;  %v284_v14 = vsel %vm189_vm8, %v268_v52, %v283_v3  ;;  %v593_v17 = vrot.slane %v580_v44, 4 }
 0x28f   :  { %v270_v19 = vsel %vm189_vm8, %v269_v56, %v4258_v58  ;;  %v292_v20 = vperm.slane %v284_v14, %v4201_v31  ;;  %v584_v15 = vsel %vm189_vm8, %v569_v57, %v583_v34  ;;  %v595_v23 = vrot.slane %v574_v12, 4 }
 0x290   :  { %v276_v24 = vperm.slane %v270_v19, %v4201_v31  ;;  %v282_v62 = vsel %vm189_vm8, %v281_v1, %v4247_v47  ;;  %v295_v25 = vrot.slane %v280_v63, 4  ;;  %v594_v26 = vsel %vm189_vm8, %v593_v17, %v574_v12 }
 0x291   :  { %v288_v27 = vperm.slane %v282_v62, %v4201_v31  ;;  %v299_v3 = vrot.slane %v292_v20, 4  ;;  %v600_v28 = vperm.slane %v594_v26, %v4201_v31  ;;  %v592_v58 = vperm.slane %v584_v15, %v4201_v31 }
 0x292   :  { %v293_v39 = vrot.slane %v276_v24, 4  ;;  %v296_v29 = vsel %vm189_vm8, 0.0, %v295_v25  ;;  %v596_v57 = vsel %vm189_vm8, %v580_v44, %v595_v23  ;;  %v607_v30 = vrot.slane %v588_v61, 4 }
 0x293   :  { %v628_v38 = vperm.slane %v624_v48, %v4195_v21  ;;  %v297_v32 = vrot.slane %v288_v27, 4  ;;  %v300_v47 = vsel %vm189_vm8, 0.0, %v299_v3  ;;  %v605_v55 = vrot.slane %v600_v28, 4 }
 0x294   :  { %v294_v12 = vsel %vm189_vm8, 0.0, %v293_v39  ;;  %v360_v36 = vrot.slane %v296_v29, 4  ;;  %v604_v37 = vperm.slane %v596_v57, %v4201_v31  ;;  %v611_v40 = vrot.slane %v592_v58, 4 }
 0x295   :  { %v371_v41 = vrot.slane %v300_v47, 4  ;;  %v606_v42 = vsel %vm189_vm8, %v605_v55, %v588_v61  ;;  %v608_v22 = vsel %vm189_vm8, %v600_v28, %v607_v30  ;;  %v623_v43 = vperm.slane %v619_v46, %v4195_v21 }
 0x296   :  { %3771 = vmatpush.xpose.msk.msra.mxu1 %vm935_vm9, %v606_v42  ;;  %v612_v44 = vsel %vm189_vm8, %v604_v37, %v611_v40  ;;  %3773 = vmatpush.xpose.msk.msra.mxu3 %vm935_vm9, %v608_v22  ;;  %v609_v48 = vrot.slane %v604_v37, 4  ;;  %v630_v49 = vsel %vm189_vm8, %v629_v51, %v556_v50  ;;  %v637_v52 = vrot.slane %v4321_v45, 4 }
 0x297   :  { %v634_v53 = vperm.slane %v630_v49, %v4195_v21  ;;  %v649_v56 = vrot.slane %v628_v38, 4  ;;  %v635_v59 = vrot.slane %v623_v43, 4  ;;  %v346_v46 = vperm.slane %v4287_v16, %v4201_v31 }
 0x298   :  { %v610_v34 = vsel %vm189_vm8, %v609_v48, %v592_v58  ;;  %v638_v61 = vsel %vm189_vm8, %v623_v43, %v637_v52  ;;  %v355_v63 = vsel %vm189_vm8, %v295_v25, %v276_v24  ;;  %v361_v1 = vsel %vm189_vm8, %v360_v36, %v294_v12 }
 0x299   :  { %3772 = vmatmul.msk.f32.vlgmr.msra.gmra.mxu1 %vm935_vm9, %v4277_v33  ;;  %v646_v50 = vperm.slane %v638_v61, %v4201_v31  ;;  %v650_v51 = vsel %vm189_vm8, %v634_v53, %v649_v56  ;;  %v636_v16 = vsel %vm189_vm8, %v635_v59, %v4321_v45  ;;  %v647_v14 = vrot.slane %v634_v53, 4  ;;  %3774 = vmatmul.msk.f32.vlgmr.msra.gmra.mxu3 %vm935_vm9, %v4280_v35 }
 0x29a   :  { %3777 = vmatpush.xpose.msk.msrb.mxu1 %vm935_vm9, %v612_v44  ;;  %3775 = vmatpush.xpose.msk.msrb.mxu3 %vm935_vm9, %v610_v34  ;;  %v298_v17 = vsel %vm189_vm8, 0.0, %v297_v32  ;;  %v658_v19 = vperm.slane %v650_v51, %v4201_v31  ;;  %v642_v20 = vperm.slane %v636_v16, %v4201_v31  ;;  %v353_v15 = vrot.slane %v4267_v18, 4  ;;  %v3913_v16 = vld [vmem:[%s5460_s2 + $0x1] ss:$0 sm:$0xff] }
 0x29b   :  { %v648_v33 = vsel %vm189_vm8, %v647_v14, %v628_v38  ;;  %v359_v23 = vperm.slane %v355_v63, %v4195_v21  ;;  %v365_v24 = vperm.slane %v361_v1, %v4195_v21  ;;  %v351_v26 = vrot.slane %v346_v46, 4  ;;  %v3912_v63 = vld [vmem:[%s5460_s2] ss:$0 sm:$0xff]  ;;  %v3914_v14 = vld [vmem:[%s5460_s2 + $0x3] ss:$0 sm:$0xff] }
 0x29c   :  { %v663_v62 = vrot.slane %v658_v19, 4  ;;  %v654_v45 = vperm.slane %v648_v33, %v4201_v31  ;;  %v661_v25 = vrot.slane %v642_v20, 4  ;;  %v665_v28 = vrot.slane %v646_v50, 4 }
 0x29d   :  { %v366_v35 = vsel %vm189_vm8, %v299_v3, %v288_v27  ;;  %v372_v58 = vsel %vm189_vm8, %v371_v41, %v298_v17  ;;  %v377_v39 = vrot.slane %v365_v24, 4  ;;  %v379_v55 = vrot.slane %v359_v23, 4 }
 0x29e   :  { %v664_v29 = vsel %vm189_vm8, %v663_v62, %v646_v50  ;;  %v659_v57 = vrot.slane %v654_v45, 4  ;;  %v662_v30 = vsel %vm189_vm8, %v654_v45, %v661_v25  ;;  %v370_v38 = vperm.slane %v366_v35, %v4195_v21  ;;  %v3916_v62 = vld [vmem:[%s5460_s2 + $0x6] ss:$0 sm:$0xff] }
 0x29f   :  { %3783 = vmatpush.xpose.msk.msra.mxu1 %vm935_vm9, %v664_v29  ;;  %3781 = vmatpush.xpose.msk.msra.mxu3 %vm935_vm9, %v662_v30  ;;  %v376_v32 = vperm.slane %v372_v58, %v4195_v21  ;;  %v378_v47 = vsel %vm189_vm8, %v377_v39, %v359_v23  ;;  %v354_v3 = vsel %vm189_vm8, %v346_v46, %v353_v15  ;;  %v3917_v39 = vld [vmem:[%s5460_s2 + $0x4] ss:$0 sm:$0xff] }
 0x2a0   :  { %v660_v27 = vsel %vm189_vm8, %v659_v57, %v642_v20  ;;  %v391_v12 = vrot.slane %v370_v38, 4  ;;  %v666_v36 = vsel %vm189_vm8, %v658_v19, %v665_v28  ;;  %v352_v37 = vsel %vm189_vm8, %v351_v26, %v4267_v18 }
 0x2a1   :  { %3779 = vmatpush.xpose.msk.msra.mxu2 %vm935_vm9, %v660_v27  ;;  %3778 = vmatmul.msk.f32.vlgmr.msrb.gmra.mxu1 %vm935_vm9, %v354_v3  ;;  %v384_v40 = vperm.slane %v378_v47, %v4201_v31  ;;  %v389_v41 = vrot.slane %v376_v32, 4  ;;  %v380_v43 = vsel %vm189_vm8, %v365_v24, %v379_v55  ;;  %v3915_v24 = vld [vmem:[%s5460_s2 + $0x2] ss:$0 sm:$0xff]  ;;  %v3881_v27 = vpack.i.bf16 %v4161_v5, %v4142_v2 }
 0x2a2   :  { %3776 = vmatmul.msk.f32.vlgmr.msrb.gmra.mxu3 %vm935_vm9, %v352_v37  ;;  %v392_v42 = vsel %vm189_vm8, %v376_v32, %v391_v12  ;;  %v388_v53 = vperm.slane %v380_v43, %v4201_v31  ;;  %v3871_v3 = vpack.i.bf16 %v4157_v4, %v4134_v0  ;;  %v3918_v12 = vld [vmem:[%s5460_s2 + $0x5] ss:$0 sm:$0xff] }
 0x2a3   :  { %v390_v22 = vsel %vm189_vm8, %v389_v41, %v370_v38  ;;  %v400_v44 = vperm.slane %v392_v42, %v4201_v31  ;;  %v403_v49 = vrot.slane %v384_v40, 4  ;;  %v3919_v38 = vld [vmem:[%s5460_s2 + $0x7] ss:$0 sm:$0xff] }
 0x2a4   :  { %v396_v48 = vperm.slane %v390_v22, %v4201_v31  ;;  %v407_v34 = vrot.slane %v388_v53, 4 }
 0x2a5   :  { %3785 = vmatpush.xpose.msk.msrb.mxu2 %vm935_vm9, %v666_v36  ;;  %v405_v52 = vrot.slane %v400_v44, 4 }
 0x2a6   :  { %v401_v18 = vrot.slane %v396_v48, 4  ;;  %v404_v46 = vsel %vm189_vm8, %v396_v48, %v403_v49  ;;  %v408_v61 = vsel %vm189_vm8, %v400_v44, %v407_v34 }
 0x2a7   :  { %v406_v59 = vsel %vm189_vm8, %v405_v52, %v388_v53 }
 0x2a8   :  { %v402_v56 = vsel %vm189_vm8, %v401_v18, %v384_v40 }
 0x2a9   :  { %3780 = vmatmul.msk.f32.vlgmr.msra.gmra.mxu2 %vm935_vm9, %v402_v56  ;;  %3784 = vmatmul.msk.f32.vlgmr.msra.gmra.mxu1 %vm935_vm9, %v406_v59 }
 0x2aa   :  { %3782 = vmatmul.msk.f32.vlgmr.msra.gmra.mxu3 %vm935_vm9, %v404_v46 }
 0x2b1   :  { %3786 = vmatmul.msk.f32.vlgmr.msrb.gmra.mxu2 %vm935_vm9, %v408_v61 }
 0x316   :  { %v959_v1 = vpop.f32.mrf.mxu1 }
 0x317   :  { %v960_v50 = vadd.f32 %v3912_v63, %v959_v1 }
 0x319   :  { %v1144_v51 = vsel %vm935_vm9, %v960_v50, -inf }
 0x31a   :  { %1145 = vmax.xlane.f32.xlu0 %v1144_v51 }
 0x31c   :  { %v985_v17 = vpop.f32.mrf.mxu3 }
 0x31d   :  { %v986_v19 = vadd.f32 %v3913_v16, %v985_v17 }
 0x31e   :  { %v1037_v20 = vpop.f32.mrf.mxu1 }
 0x31f   :  { %v1038_v33 = vadd.f32 %v3914_v14, %v1037_v20  ;;  %v1147_v15 = vsel %vm935_vm9, %v986_v19, -inf }
 0x321   :  { %v1153_v23 = vsel %vm935_vm9, %v1038_v33, -inf }
 0x322   :  { %1154 = vmax.xlane.f32.xlu2 %v1153_v23  ;;  %1148 = vmax.xlane.f32.xlu0 %v1147_v15 }
 0x325   :  { %v1011_v45 = vpop.f32.mrf.mxu3 }
 0x326   :  { %v1012_v25 = vadd.f32 %v3915_v24, %v1011_v45  ;;  %v1115_v26 = vpop.f32.mrf.mxu1 }
 0x327   :  { %v1116_v28 = vadd.f32 %v3916_v62, %v1115_v26 }
 0x328   :  { %v1150_v35 = vsel %vm935_vm9, %v1012_v25, -inf }
 0x329   :  { %1151 = vmax.xlane.f32.xlu1 %v1150_v35  ;;  %v1162_v58 = vsel %vm935_vm9, %v1116_v28, -inf }
 0x32a   :  { %1163 = vmax.xlane.f32.xlu0 %v1162_v58 }
 0x32c   :  { %v1063_v29 = vpop.f32.mrf.mxu2 }
 0x32d   :  { %v1064_v57 = vadd.f32 %v3917_v39, %v1063_v29  ;;  %v1089_v36 = vpop.f32.mrf.mxu3 }
 0x32e   :  { %v4461_v37 = vadd.f32 %v3918_v12, %v1089_v36 }
 0x32f   :  { %v1156_v30 = vsel %vm935_vm9, %v1064_v57, -inf }
 0x330   :  { %1157 = vmax.xlane.f32.xlu2 %v1156_v30  ;;  %v1159_v6 = vsel %vm935_vm9, %v4461_v37, -inf }
 0x334   :  { %v1141_v32 = vpop.f32.mrf.mxu2 }
 0x335   :  { %v1142_v47 = vadd.f32 %v3919_v38, %v1141_v32 }
 0x337   :  { %v1165_v55 = vsel %vm935_vm9, %v1142_v47, -inf }
 0x338   :  { %1166 = vmax.xlane.f32.xlu1 %v1165_v55 }
 0x33e   :  { %3877 = vrot.lane.b32.xlu0 %v3876_v8, %s4032_s21 }
 0x348   :  { %3882 = vrot.lane.b32.xlu2 %v3881_v27, %s4032_s21 }
 0x351   :  { %3872 = vrot.lane.b32.xlu1 %v3871_v3, %s4032_s21 }
 0x371   :  { %1160 = vmax.xlane.f32.xlu2 %v1159_v6 }
 0x389   :  { %3887 = vrot.lane.b32.xlu2 %v3886_v11, %s4032_s21 }
 0x38d   :  { %v1146_v2 = vpop.xlane.xlu0 %1145 }
 0x38e   :  { %v1168_v0 = vsub.f32 %v960_v50, %v1146_v2 }
 0x390   :  { %v1176_v4 = vmul.f32 1.442695, %v1168_v0 }
 0x392   :  { %3926 = vpow2.f32 %v1176_v4 }
 0x395   :  { %v1155_v5 = vpop.xlane.xlu2 %1154  ;;  %v1149_v7 = vpop.xlane.xlu0 %1148 }
 0x396   :  { %v1171_v8 = vsub.f32 %v1038_v33, %v1155_v5  ;;  %v1169_v40 = vsub.f32 %v986_v19, %v1149_v7 }
 0x398   :  { %v4469_v41 = vpop.eup %3926  ;;  %v1182_v42 = vmul.f32 1.442695, %v1171_v8  ;;  %v1178_v22 = vmul.f32 1.442695, %v1169_v40 }
 0x399   :  { %v1192_v43 = vsel %vm935_vm9, %v4469_v41, 0.0 }
 0x39a   :  { %3928 = vpow2.f32 %v1182_v42  ;;  %1193 = vadd.xlane.f32.xlu0 %v1192_v43 }
 0x39b   :  { %3930 = vpow2.f32 %v1178_v22 }
 0x39c   :  { %v1152_v9 = vpop.xlane.xlu1 %1151 }
 0x39d   :  { %v1170_v10 = vsub.f32 %v1012_v25, %v1152_v9  ;;  %v1164_v18 = vpop.xlane.xlu0 %1163 }
 0x39e   :  { %v1174_v59 = vsub.f32 %v1116_v28, %v1164_v18 }
 0x39f   :  { %v1180_v52 = vmul.f32 1.442695, %v1170_v10 }
 0x3a0   :  { %v4473_v11 = vpop.eup %3928  ;;  %v1188_v34 = vmul.f32 1.442695, %v1174_v59 }
 0x3a1   :  { %v4475_v44 = vpop.eup %3930  ;;  %v1201_v48 = vsel %vm935_vm9, %v4473_v11, 0.0  ;;  %3932 = vpow2.f32 %v1180_v52 }
 0x3a2   :  { %1202 = vadd.xlane.f32.xlu1 %v1201_v48  ;;  %v1195_v49 = vsel %vm935_vm9, %v4475_v44, 0.0 }
 0x3a3   :  { %v1158_v53 = vpop.xlane.xlu2 %1157  ;;  %1196 = vadd.xlane.f32.xlu0 %v1195_v49 }
 0x3a4   :  { %v1172_v56 = vsub.f32 %v1064_v57, %v1158_v53 }
 0x3a6   :  { %v1184_v46 = vmul.f32 1.442695, %v1172_v56 }
 0x3a7   :  { %v4481_v1 = vpop.eup %3932 }
 0x3a8   :  { %3934 = vpow2.f32 %v1184_v46  ;;  %v1198_v14 = vsel %vm935_vm9, %v4481_v1, 0.0 }
 0x3a9   :  { %3936 = vpow2.f32 %v1188_v34 }
 0x3ab   :  { %v1167_v61 = vpop.xlane.xlu1 %1166 }
 0x3ac   :  { %v1175_v63 = vsub.f32 %v1142_v47, %v1167_v61 }
 0x3ae   :  { %v4483_v50 = vpop.eup %3934  ;;  %v1190_v51 = vmul.f32 1.442695, %v1175_v63 }
 0x3af   :  { %v1204_v16 = vsel %vm935_vm9, %v4483_v50, 0.0  ;;  %v4489_v17 = vpop.eup %3936 }
 0x3b0   :  { %3938 = vpow2.f32 %v1190_v51  ;;  %1205 = vadd.xlane.f32.xlu1 %v1204_v16  ;;  %v1210_v33 = vsel %vm935_vm9, %v4489_v17, 0.0  ;;  %v3878_v15 = vpop.permute.xlu0 %3877 }
 0x3b1   :  { %v3880_v23 = vunpack.i.h.bf16 %v3878_v15  ;;  %v3879_v24 = vunpack.i.l.bf16 %v3878_v15 }
 0x3b2   :  { %1199 = vadd.xlane.f32.xlu2 %v1198_v14 }
 0x3b3   :  { %v703_v45 = vrot.slane %v3880_v23, 4  ;;  %v691_v25 = vrot.slane %v3879_v24, 4 }
 0x3b6   :  { %v4491_v19 = vpop.eup %3938 }
 0x3b7   :  { %v1213_v20 = vsel %vm935_vm9, %v4491_v19, 0.0 }
 0x3b8   :  { %1214 = vadd.xlane.f32.xlu0 %v1213_v20  ;;  %1211 = vadd.xlane.f32.xlu1 %v1210_v33 }
 0x3c3   :  { %v3873_v62 = vpop.permute.xlu1 %3872 }
 0x3c4   :  { %v3875_v26 = vunpack.i.h.bf16 %v3873_v62  ;;  %v3874_v28 = vunpack.i.l.bf16 %v3873_v62 }
 0x3c6   :  { %v705_v35 = vrot.slane %v3875_v26, 4  ;;  %v692_v58 = vsel %vm189_vm8, %v691_v25, %v3874_v28  ;;  %v693_v39 = vrot.slane %v3874_v28, 4  ;;  %v704_v29 = vsel %vm189_vm8, %v703_v45, %v3875_v26 }
 0x3c7   :  { %v698_v57 = vperm.slane %v692_v58, %v4195_v21  ;;  %v710_v30 = vperm.slane %v704_v29, %v4195_v21 }
 0x3c8   :  { %v694_v38 = vsel %vm189_vm8, %v3879_v24, %v693_v39  ;;  %v706_v32 = vsel %vm189_vm8, %v3880_v23, %v705_v35 }
 0x3c9   :  { %v702_v47 = vperm.slane %v694_v38, %v4195_v21  ;;  %v714_v55 = vperm.slane %v706_v32, %v4195_v21  ;;  %v715_v27 = vrot.slane %v710_v30, 4  ;;  %v717_v3 = vrot.slane %v698_v57, 4 }
 0x3cb   :  { %v716_v12 = vsel %vm189_vm8, %v715_v27, %v698_v57  ;;  %v718_v36 = vsel %vm189_vm8, %v710_v30, %v717_v3  ;;  %v727_v6 = vrot.slane %v714_v55, 4  ;;  %v729_v2 = vrot.slane %v702_v47, 4  ;;  %v3883_v30 = vpop.permute.xlu2 %3882 }
 0x3cc   :  { %v722_v0 = vperm.slane %v716_v12, %v4201_v31  ;;  %v726_v4 = vperm.slane %v718_v36, %v4201_v31  ;;  %v3885_v36 = vunpack.i.h.bf16 %v3883_v30 }
 0x3cd   :  { %v728_v5 = vsel %vm189_vm8, %v727_v6, %v702_v47  ;;  %v730_v7 = vsel %vm189_vm8, %v714_v55, %v729_v2  ;;  %v3884_v6 = vunpack.i.l.bf16 %v3883_v30 }
 0x3ce   :  { %v734_v8 = vperm.slane %v728_v5, %v4201_v31  ;;  %v738_v40 = vperm.slane %v730_v7, %v4201_v31  ;;  %v739_v42 = vrot.slane %v722_v0, 4  ;;  %v741_v22 = vrot.slane %v726_v4, 4 }
 0x3cf   :  { %v749_v4 = vrot.slane %v3884_v6, 4 }
 0x3d0   :  { %v742_v43 = vsel %vm189_vm8, 0.0, %v741_v22  ;;  %v743_v9 = vrot.slane %v734_v8, 4  ;;  %v745_v10 = vrot.slane %v738_v40, 4  ;;  %v803_v48 = vsel %vm189_vm8, %v741_v22, %v722_v0 }
 0x3d1   :  { %v808_v49 = vrot.slane %v742_v43, 4  ;;  %v740_v52 = vsel %vm189_vm8, 0.0, %v739_v42  ;;  %v807_v53 = vperm.slane %v803_v48, %v4195_v21  ;;  %v761_v0 = vrot.slane %v3885_v36, 4 }
 0x3d2   :  { %v746_v18 = vsel %vm189_vm8, 0.0, %v745_v10  ;;  %v814_v56 = vsel %vm189_vm8, %v745_v10, %v734_v8  ;;  %v744_v61 = vsel %vm189_vm8, 0.0, %v743_v9 }
 0x3d3   :  { %v819_v59 = vrot.slane %v746_v18, 4  ;;  %v809_v46 = vsel %vm189_vm8, %v808_v49, %v740_v52  ;;  %v818_v34 = vperm.slane %v814_v56, %v4195_v21  ;;  %v827_v51 = vrot.slane %v807_v53, 4 }
 0x3d4   :  { %v813_v63 = vperm.slane %v809_v46, %v4195_v21 }
 0x3d5   :  { %v820_v16 = vsel %vm189_vm8, %v819_v59, %v744_v61  ;;  %v839_v14 = vrot.slane %v818_v34, 4 }
 0x3d6   :  { %v824_v20 = vperm.slane %v820_v16, %v4195_v21  ;;  %v828_v33 = vsel %vm189_vm8, %v813_v63, %v827_v51  ;;  %v825_v15 = vrot.slane %v813_v63, 4 }
 0x3d7   :  { %v836_v23 = vperm.slane %v828_v33, %v4201_v31 }
 0x3d8   :  { %v840_v24 = vsel %vm189_vm8, %v824_v20, %v839_v14  ;;  %v826_v62 = vsel %vm189_vm8, %v825_v15, %v807_v53  ;;  %v837_v45 = vrot.slane %v824_v20, 4 }
 0x3d9   :  { %v848_v25 = vperm.slane %v840_v24, %v4201_v31  ;;  %v855_v26 = vrot.slane %v836_v23, 4  ;;  %v832_v28 = vperm.slane %v826_v62, %v4201_v31 }
 0x3da   :  { %v838_v35 = vsel %vm189_vm8, %v837_v45, %v818_v34 }
 0x3db   :  { %v856_v58 = vsel %vm189_vm8, %v848_v25, %v855_v26  ;;  %v844_v39 = vperm.slane %v838_v35, %v4201_v31  ;;  %v851_v29 = vrot.slane %v832_v28, 4  ;;  %v853_v57 = vrot.slane %v848_v25, 4 }
 0x3dc   :  { %1319 = vmatpush.msra.mxu2 %v856_v58 }
 0x3dd   :  { %v849_v38 = vrot.slane %v844_v39, 4  ;;  %v852_v32 = vsel %vm189_vm8, %v844_v39, %v851_v29  ;;  %v854_v47 = vsel %vm189_vm8, %v853_v57, %v836_v23 }
 0x3de   :  { %1273 = vmatpush.msrb.mxu0 %v852_v32  ;;  %1296 = vmatpush.msrb.mxu1 %v854_v47 }
 0x3df   :  { %v850_v55 = vsel %vm189_vm8, %v849_v38, %v832_v28 }
 0x3e0   :  { %1250 = vmatpush.msrb.mxu3 %v850_v55 }
 0x3e4   :  { %v1161_v27 = vpop.xlane.xlu2 %1160 }
 0x3e5   :  { %v1173_v3 = vsub.f32 %v4461_v37, %v1161_v27 }
 0x3e7   :  { %v1186_v12 = vmul.f32 1.442695, %v1173_v3 }
 0x3e9   :  { %3940 = vpow2.f32 %v1186_v12 }
 0x3ec   :  { %v3888_v2 = vpop.permute.xlu2 %3887 }
 0x3ed   :  { %v3890_v5 = vunpack.i.h.bf16 %v3888_v2  ;;  %v3889_v7 = vunpack.i.l.bf16 %v3888_v2 }
 0x3ef   :  { %v4538_v8 = vpop.eup %3940  ;;  %v759_v40 = vrot.slane %v3890_v5, 4  ;;  %v747_v42 = vrot.slane %v3889_v7, 4  ;;  %v750_v22 = vsel %vm189_vm8, %v3889_v7, %v749_v4  ;;  %v762_v43 = vsel %vm189_vm8, %v3890_v5, %v761_v0 }
 0x3f0   :  { %v758_v9 = vperm.slane %v750_v22, %v4195_v21  ;;  %v770_v37 = vperm.slane %v762_v43, %v4195_v21  ;;  %v1207_v10 = vsel %vm935_vm9, %v4538_v8, 0.0 }
 0x3f1   :  { %v748_v48 = vsel %vm189_vm8, %v747_v42, %v3884_v6  ;;  %v760_v49 = vsel %vm189_vm8, %v759_v40, %v3885_v36  ;;  %1208 = vadd.xlane.f32.xlu2 %v1207_v10 }
 0x3f2   :  { %v754_v52 = vperm.slane %v748_v48, %v4195_v21  ;;  %v766_v18 = vperm.slane %v760_v49, %v4195_v21  ;;  %v783_v53 = vrot.slane %v770_v37, 4  ;;  %v785_v56 = vrot.slane %v758_v9, 4 }
 0x3f4   :  { %v771_v59 = vrot.slane %v766_v18, 4  ;;  %v773_v46 = vrot.slane %v754_v52, 4  ;;  %v784_v34 = vsel %vm189_vm8, %v783_v53, %v758_v9  ;;  %v786_v61 = vsel %vm189_vm8, %v770_v37, %v785_v56 }
 0x3f5   :  { %v790_v63 = vperm.slane %v784_v34, %v4201_v31  ;;  %v794_v51 = vperm.slane %v786_v61, %v4201_v31 }
 0x3f6   :  { %v772_v16 = vsel %vm189_vm8, %v771_v59, %v754_v52  ;;  %v774_v14 = vsel %vm189_vm8, %v766_v18, %v773_v46 }
 0x3f7   :  { %v778_v20 = vperm.slane %v772_v16, %v4201_v31  ;;  %v782_v33 = vperm.slane %v774_v14, %v4201_v31  ;;  %v799_v15 = vrot.slane %v790_v63, 4  ;;  %v801_v23 = vrot.slane %v794_v51, 4 }
 0x3f9   :  { %v795_v24 = vrot.slane %v778_v20, 4  ;;  %v797_v62 = vrot.slane %v782_v33, 4  ;;  %v802_v45 = vsel %vm189_vm8, 0.0, %v801_v23  ;;  %v868_v25 = vsel %vm189_vm8, %v801_v23, %v790_v63 }
 0x3fa   :  { %v873_v26 = vrot.slane %v802_v45, 4  ;;  %v800_v35 = vsel %vm189_vm8, 0.0, %v799_v15  ;;  %v872_v39 = vperm.slane %v868_v25, %v4195_v21 }
 0x3fb   :  { %v798_v28 = vsel %vm189_vm8, 0.0, %v797_v62  ;;  %v857_v58 = vsel %vm189_vm8, %v797_v62, %v778_v20  ;;  %v796_v38 = vsel %vm189_vm8, 0.0, %v795_v24 }
 0x3fc   :  { %v862_v29 = vrot.slane %v798_v28, 4  ;;  %v861_v57 = vperm.slane %v857_v58, %v4195_v21  ;;  %v874_v30 = vsel %vm189_vm8, %v873_v26, %v800_v35  ;;  %v893_v47 = vrot.slane %v872_v39, 4 }
 0x3fd   :  { %v878_v32 = vperm.slane %v874_v30, %v4195_v21 }
 0x3fe   :  { %v863_v55 = vsel %vm189_vm8, %v862_v29, %v796_v38  ;;  %v881_v27 = vrot.slane %v861_v57, 4 }
 0x3ff   :  { %v867_v3 = vperm.slane %v863_v55, %v4195_v21  ;;  %v894_v12 = vsel %vm189_vm8, %v878_v32, %v893_v47  ;;  %v891_v36 = vrot.slane %v878_v32, 4 }
 0x400   :  { %v902_v6 = vperm.slane %v894_v12, %v4201_v31 }
 0x401   :  { %v882_v2 = vsel %vm189_vm8, %v867_v3, %v881_v27  ;;  %v879_v0 = vrot.slane %v867_v3, 4  ;;  %v892_v4 = vsel %vm189_vm8, %v891_v36, %v872_v39 }
 0x402   :  { %v890_v5 = vperm.slane %v882_v2, %v4201_v31  ;;  %v907_v7 = vrot.slane %v902_v6, 4  ;;  %v898_v40 = vperm.slane %v892_v4, %v4201_v31 }
 0x403   :  { %v880_v42 = vsel %vm189_vm8, %v879_v0, %v861_v57 }
 0x404   :  { %v908_v22 = vsel %vm189_vm8, %v907_v7, %v890_v5  ;;  %v886_v43 = vperm.slane %v880_v42, %v4201_v31  ;;  %v903_v9 = vrot.slane %v898_v40, 4  ;;  %v909_v37 = vrot.slane %v890_v5, 4 }
 0x405   :  { %1388 = vmatpush.msra.mxu1 %v908_v22 }
 0x406   :  { %v904_v10 = vsel %vm189_vm8, %v903_v9, %v886_v43  ;;  %v910_v48 = vsel %vm189_vm8, %v902_v6, %v909_v37  ;;  %v905_v49 = vrot.slane %v886_v43, 4 }
 0x407   :  { %1342 = vmatpush.msra.mxu3 %v904_v10  ;;  %1411 = vmatpush.msrb.mxu2 %v910_v48 }
 0x408   :  { %v906_v52 = vsel %vm189_vm8, %v898_v40, %v905_v49 }
 0x409   :  { %1365 = vmatpush.msra.mxu0 %v906_v52 }
 0x40d   :  { %v1194_v18 = vpop.xlane.xlu0 %1193 }
 0x40e   :  { %3942 = vrcp.f32 %v1194_v18 }
 0x414   :  { %v3943_v53 = vpop.eup %3942 }
 0x415   :  { %v1224_v56 = vmul.f32 %v3943_v53, %v4469_v41  ;;  %v1203_v59 = vpop.xlane.xlu1 %1202 }
 0x416   :  { %3944 = vrcp.f32 %v1203_v59  ;;  %v1197_v46 = vpop.xlane.xlu0 %1196 }
 0x417   :  { %3946 = vrcp.f32 %v1197_v46  ;;  %3787 = vmatmul.msk.f32.vlgmr.msrb.gmra.mxu3 %vm935_vm9, %v1224_v56 }
 0x41c   :  { %v3945_v34 = vpop.eup %3944 }
 0x41d   :  { %v3947_v61 = vpop.eup %3946  ;;  %v1227_v63 = vmul.f32 %v3945_v34, %v4473_v11 }
 0x41e   :  { %v1225_v51 = vmul.f32 %v3947_v61, %v4475_v44 }
 0x41f   :  { %3790 = vmatmul.msk.f32.vlgmr.msra.gmra.mxu2 %vm935_vm9, %v1227_v63 }
 0x420   :  { %3788 = vmatmul.msk.f32.vlgmr.msrb.gmra.mxu0 %vm935_vm9, %v1225_v51 }
 0x423   :  { %v1206_v16 = vpop.xlane.xlu1 %1205 }
 0x424   :  { %3948 = vrcp.f32 %v1206_v16 }
 0x425   :  { %v1200_v14 = vpop.xlane.xlu2 %1199 }
 0x426   :  { %3950 = vrcp.f32 %v1200_v14 }
 0x42a   :  { %v3949_v41 = vpop.eup %3948 }
 0x42b   :  { %v1228_v20 = vmul.f32 %v3949_v41, %v4483_v50  ;;  %v1212_v33 = vpop.xlane.xlu1 %1211  ;;  %v1215_v15 = vpop.xlane.xlu0 %1214 }
 0x42c   :  { %v3951_v23 = vpop.eup %3950  ;;  %3952 = vrcp.f32 %v1212_v33 }
 0x42d   :  { %v1226_v24 = vmul.f32 %v3951_v23, %v4481_v1  ;;  %3954 = vrcp.f32 %v1215_v15  ;;  %3791 = vmatmul.msk.f32.vlgmr.msra.gmra.mxu3 %vm935_vm9, %v1228_v20 }
 0x42f   :  { %3789 = vmatmul.msk.f32.vlgmr.msrb.gmra.mxu1 %vm935_vm9, %v1226_v24 }
 0x432   :  { %v3953_v11 = vpop.eup %3952 }
 0x433   :  { %v3955_v44 = vpop.eup %3954  ;;  %v1230_v45 = vmul.f32 %v3953_v11, %v4489_v17 }
 0x434   :  { %v1231_v62 = vmul.f32 %v3955_v44, %v4491_v19 }
 0x436   :  { %3794 = vmatmul.msk.f32.vlgmr.msrb.gmra.mxu2 %vm935_vm9, %v1231_v62 }
 0x437   :  { %3793 = vmatmul.msk.f32.vlgmr.msra.gmra.mxu1 %vm935_vm9, %v1230_v45 }
 0x464   :  { %v1209_v50 = vpop.xlane.xlu2 %1208 }
 0x465   :  { %3956 = vrcp.f32 %v1209_v50 }
 0x46b   :  { %v3957_v25 = vpop.eup %3956 }
 0x46c   :  { %v1229_v1 = vmul.f32 %v3957_v25, %v4538_v8 }
 0x46e   :  { %3792 = vmatmul.msk.f32.vlgmr.msra.gmra.mxu0 %vm935_vm9, %v1229_v1 }
 0x49a   :  { %v1252_v19 = vpop.f32.mrf.mxu3 }
 0x49b   :  { %v1418_v57 = vrot.slane %v1252_v19, 4 }
 0x49d   :  { %v1275_v26 = vpop.f32.mrf.mxu0 }
 0x49e   :  { %v1430_v35 = vrot.slane %v1275_v26, 4 }
 0x4a2   :  { %v1321_v28 = vpop.f32.mrf.mxu2 }
 0x4a3   :  { %v1428_v58 = vrot.slane %v1321_v28, 4  ;;  %v1431_v39 = vsel %vm189_vm8, %v1321_v28, %v1430_v35 }
 0x4a4   :  { %v1439_v29 = vperm.slane %v1431_v39, %v4195_v21 }
 0x4a5   :  { %v1429_v17 = vsel %vm189_vm8, %v1428_v58, %v1275_v26 }
 0x4a6   :  { %v1435_v30 = vperm.slane %v1429_v17, %v4195_v21  ;;  %v1452_v47 = vrot.slane %v1439_v29, 4 }
 0x4a8   :  { %v1440_v3 = vrot.slane %v1435_v30, 4 }
 0x4ac   :  { %v1298_v38 = vpop.f32.mrf.mxu1 }
 0x4ad   :  { %v1416_v32 = vrot.slane %v1298_v38, 4  ;;  %v1419_v8 = vsel %vm189_vm8, %v1298_v38, %v1418_v57 }
 0x4ae   :  { %v1427_v55 = vperm.slane %v1419_v8, %v4195_v21 }
 0x4af   :  { %v1417_v27 = vsel %vm189_vm8, %v1416_v32, %v1252_v19 }
 0x4b0   :  { %v1423_v12 = vperm.slane %v1417_v27, %v4195_v21  ;;  %v1453_v36 = vsel %vm189_vm8, %v1452_v47, %v1427_v55  ;;  %v1454_v6 = vrot.slane %v1427_v55, 4 }
 0x4b1   :  { %v1459_v2 = vperm.slane %v1453_v36, %v4201_v31 }
 0x4b2   :  { %v1441_v0 = vsel %vm189_vm8, %v1440_v3, %v1423_v12  ;;  %v1442_v4 = vrot.slane %v1423_v12, 4  ;;  %v1455_v5 = vsel %vm189_vm8, %v1439_v29, %v1454_v6 }
 0x4b3   :  { %v1447_v7 = vperm.slane %v1441_v0, %v4201_v31  ;;  %v1463_v40 = vperm.slane %v1455_v5, %v4201_v31  ;;  %v1468_v43 = vrot.slane %v1459_v2, 4 }
 0x4b4   :  { %v1443_v42 = vsel %vm189_vm8, %v1435_v30, %v1442_v4  ;;  %v1390_v29 = vpop.f32.mrf.mxu1  ;;  %v1344_v30 = vpop.f32.mrf.mxu3 }
 0x4b5   :  { %v1451_v22 = vperm.slane %v1443_v42, %v4201_v31  ;;  %v1470_v9 = vrot.slane %v1463_v40, 4  ;;  %v1464_v37 = vrot.slane %v1447_v7, 4  ;;  %v1469_v56 = vsel %vm189_vm8, 0.0, %v1468_v43 }
 0x4b6   :  { %v1472_v57 = vrot.slane %v1390_v29, 4  ;;  %v1474_v38 = vrot.slane %v1344_v30, 4 }
 0x4b7   :  { %v1466_v10 = vrot.slane %v1451_v22, 4  ;;  %v1471_v48 = vsel %vm189_vm8, 0.0, %v1470_v9  ;;  %v1539_v49 = vsel %vm189_vm8, %v1470_v9, %v1459_v2  ;;  %v1465_v63 = vsel %vm189_vm8, 0.0, %v1464_v37 }
 0x4b8   :  { %v1543_v52 = vperm.slane %v1539_v49, %v4195_v21  ;;  %v1544_v18 = vrot.slane %v1471_v48, 4  ;;  %v1473_v32 = vsel %vm189_vm8, %v1472_v57, %v1344_v30  ;;  %v1475_v47 = vsel %vm189_vm8, %v1390_v29, %v1474_v38 }
 0x4b9   :  { %v1467_v53 = vsel %vm189_vm8, 0.0, %v1466_v10  ;;  %v1528_v59 = vsel %vm189_vm8, %v1466_v10, %v1447_v7  ;;  %v1413_v8 = vpop.f32.mrf.mxu2  ;;  %v1479_v55 = vperm.slane %v1473_v32, %v4195_v21  ;;  %v1483_v3 = vperm.slane %v1475_v47, %v4195_v21 }
 0x4ba   :  { %v1545_v46 = vsel %vm189_vm8, %v1544_v18, %v1469_v56  ;;  %v1532_v34 = vperm.slane %v1528_v59, %v4195_v21  ;;  %v1533_v61 = vrot.slane %v1467_v53, 4  ;;  %v1564_v16 = vrot.slane %v1543_v52, 4 }
 0x4bb   :  { %v1549_v51 = vperm.slane %v1545_v46, %v4195_v21  ;;  %v1484_v27 = vrot.slane %v1413_v8, 4  ;;  %v1498_v2 = vrot.slane %v1479_v55, 4  ;;  %v1510_v5 = vrot.slane %v1483_v3, 4 }
 0x4bc   :  { %v1534_v14 = vsel %vm189_vm8, %v1533_v61, %v1465_v63  ;;  %v1552_v41 = vrot.slane %v1532_v34, 4 }
 0x4bd   :  { %v1538_v20 = vperm.slane %v1534_v14, %v4195_v21  ;;  %v1565_v33 = vsel %vm189_vm8, %v1549_v51, %v1564_v16  ;;  %v1562_v15 = vrot.slane %v1549_v51, 4 }
 0x4be   :  { %v1573_v23 = vperm.slane %v1565_v33, %v4201_v31 }
 0x4bf   :  { %v1553_v24 = vsel %vm189_vm8, %v1538_v20, %v1552_v41  ;;  %v1550_v11 = vrot.slane %v1538_v20, 4  ;;  %v1563_v44 = vsel %vm189_vm8, %v1562_v15, %v1543_v52 }
 0x4c0   :  { %v1561_v62 = vperm.slane %v1553_v24, %v4201_v31  ;;  %v1578_v45 = vrot.slane %v1573_v23, 4  ;;  %v1569_v50 = vperm.slane %v1563_v44, %v4201_v31 }
 0x4c1   :  { %v1551_v25 = vsel %vm189_vm8, %v1550_v11, %v1532_v34 }
 0x4c2   :  { %v1579_v1 = vsel %vm189_vm8, %v1578_v45, %v1561_v62  ;;  %v1580_v26 = vrot.slane %v1561_v62, 4  ;;  %v1557_v28 = vperm.slane %v1551_v25, %v4201_v31  ;;  %v1574_v35 = vrot.slane %v1569_v50, 4 }
 0x4c3   :  { %1646 = vrot.lane.b32.xlu1 %v1579_v1, %s4033_s24 }
 0x4c4   :  { %v1581_v58 = vsel %vm189_vm8, %v1573_v23, %v1580_v26  ;;  %v1576_v39 = vrot.slane %v1557_v28, 4  ;;  %v4638_v19 = vsel %vm189_vm8, %v1574_v35, %v1557_v28 }
 0x4c5   :  { %1654 = vrot.lane.b32.xlu2 %v1581_v58, %s4034_s3 }
 0x4c6   :  { %v1577_v17 = vsel %vm189_vm8, %v1569_v50, %v1576_v39 }
 0x4c7   :  { %1638 = vrot.lane.b32.xlu0 %v1577_v17, %s4035_s25 }
 0x4eb   :  { %v1367_v12 = vpop.f32.mrf.mxu0 }
 0x4ec   :  { %v1485_v36 = vsel %vm189_vm8, %v1484_v27, %v1367_v12  ;;  %v1486_v6 = vrot.slane %v1367_v12, 4  ;;  %v122_v27 = vld [vmem:[%s5461_s5 + $0x18] sm:$0xff]  ;;  %v120_v12 = vld [vmem:[%s5461_s5 + $0x8] sm:$0xff] }
 0x4ed   :  { %v1491_v0 = vperm.slane %v1485_v36, %v4195_v21  ;;  %1687 = vmatpush.msrb.mxu3 %v122_v27  ;;  %v119_v36 = vld [vmem:[%s5461_s5] sm:$0xff] }
 0x4ee   :  { %v1487_v4 = vsel %vm189_vm8, %v1413_v8, %v1486_v6 }
 0x4ef   :  { %v1495_v7 = vperm.slane %v1487_v4, %v4195_v21  ;;  %v1496_v40 = vrot.slane %v1491_v0, 4  ;;  %v1499_v42 = vsel %vm189_vm8, %v1491_v0, %v1498_v2 }
 0x4f0   :  { %v1507_v22 = vperm.slane %v1499_v42, %v4201_v31 }
 0x4f1   :  { %v1497_v43 = vsel %vm189_vm8, %v1496_v40, %v1479_v55  ;;  %v1508_v9 = vrot.slane %v1495_v7, 4  ;;  %v1511_v37 = vsel %vm189_vm8, %v1495_v7, %v1510_v5 }
 0x4f2   :  { %v1503_v10 = vperm.slane %v1497_v43, %v4201_v31  ;;  %v1519_v48 = vperm.slane %v1511_v37, %v4201_v31  ;;  %v1522_v49 = vrot.slane %v1507_v22, 4 }
 0x4f3   :  { %v1509_v52 = vsel %vm189_vm8, %v1508_v9, %v1483_v3  ;;  %v121_v3 = vld [vmem:[%s5461_s5 + $0x10] sm:$0xff] }
 0x4f4   :  { %v1515_v18 = vperm.slane %v1509_v52, %v4201_v31  ;;  %v1520_v53 = vrot.slane %v1503_v10, 4  ;;  %v1523_v56 = vsel %vm189_vm8, 0.0, %v1522_v49  ;;  %v1526_v59 = vrot.slane %v1519_v48, 4  ;;  %1688 = vmatpush.msrb.mxu3 %v121_v3 }
 0x4f5   :  { %v1582_v46 = vsel %vm189_vm8, %v1522_v49, %v1503_v10  ;;  %v1587_v34 = vrot.slane %v1523_v56, 4 }
 0x4f6   :  { %v1521_v61 = vsel %vm189_vm8, 0.0, %v1520_v53  ;;  %v1524_v63 = vrot.slane %v1515_v18, 4  ;;  %v1527_v51 = vsel %vm189_vm8, 0.0, %v1526_v59  ;;  %v1586_v16 = vperm.slane %v1582_v46, %v4195_v21  ;;  %1689 = vmatpush.msrb.mxu3 %v120_v12 }
 0x4f7   :  { %v1598_v14 = vrot.slane %v1527_v51, 4  ;;  %v1588_v41 = vsel %vm189_vm8, %v1587_v34, %v1521_v61  ;;  %v1593_v20 = vsel %vm189_vm8, %v1526_v59, %v1515_v18 }
 0x4f8   :  { %v1525_v33 = vsel %vm189_vm8, 0.0, %v1524_v63  ;;  %v1592_v15 = vperm.slane %v1588_v41, %v4195_v21  ;;  %v1597_v23 = vperm.slane %v1593_v20, %v4195_v21  ;;  %v1606_v24 = vrot.slane %v1586_v16, 4  ;;  %1690 = vmatpush.msrb.mxu3 %v119_v36 }
 0x4f9   :  { %v1599_v11 = vsel %vm189_vm8, %v1598_v14, %v1525_v33 }
 0x4fa   :  { %v1603_v44 = vperm.slane %v1599_v11, %v4195_v21  ;;  %v1618_v62 = vrot.slane %v1597_v23, 4  ;;  %v1604_v45 = vrot.slane %v1592_v15, 4  ;;  %v1607_v50 = vsel %vm189_vm8, %v1592_v15, %v1606_v24  ;;  %v125_v15 = vld [vmem:[%s5462_s6 + $0x10] sm:$0xff]  ;;  %v123_v24 = vld [vmem:[%s5462_s6] sm:$0xff] }
 0x4fb   :  { %v1615_v39 = vperm.slane %v1607_v50, %v4201_v31 }
 0x4fc   :  { %v1619_v25 = vsel %vm189_vm8, %v1603_v44, %v1618_v62  ;;  %v1605_v1 = vsel %vm189_vm8, %v1604_v45, %v1586_v16  ;;  %v1616_v26 = vrot.slane %v1603_v44, 4 }
 0x4fd   :  { %v1627_v28 = vperm.slane %v1619_v25, %v4201_v31  ;;  %v1611_v35 = vperm.slane %v1605_v1, %v4201_v31  ;;  %v1634_v47 = vrot.slane %v1615_v39, 4 }
 0x4fe   :  { %v1617_v58 = vsel %vm189_vm8, %v1616_v26, %v1597_v23  ;;  %v124_v23 = vld [vmem:[%s5462_s6 + $0x8] sm:$0xff] }
 0x4ff   :  { %v1632_v17 = vrot.slane %v1627_v28, 4  ;;  %v1623_v29 = vperm.slane %v1617_v58, %v4201_v31  ;;  %v1630_v57 = vrot.slane %v1611_v35, 4  ;;  %v1635_v55 = vsel %vm189_vm8, %v1627_v28, %v1634_v47 }
 0x501   :  { %v1633_v30 = vsel %vm189_vm8, %v1632_v17, %v1615_v39  ;;  %v1628_v38 = vrot.slane %v1623_v29, 4  ;;  %v1631_v32 = vsel %vm189_vm8, %v1623_v29, %v1630_v57 }
 0x502   :  { %1648 = vrot.lane.b32.xlu1 %v1633_v30, %s4033_s24  ;;  %1640 = vrot.lane.b32.xlu0 %v1631_v32, %s4035_s25 }
 0x503   :  { %v1629_v8 = vsel %vm189_vm8, %v1628_v38, %v1611_v35 }
 0x50a   :  { %1656 = vrot.lane.b32.xlu0 %v1635_v55, %s4034_s3 }
 0x51f   :  { %v1655_v4 = vpop.permute.xlu2 %1654 }
 0x535   :  { %v1647_v2 = vpop.permute.xlu1 %1646 }
 0x539   :  { %v1639_v6 = vpop.permute.xlu0 %1638 }
 0x53a   :  { %v1660_v0 = vsel %vm935_vm9, %v4638_v19, %v1639_v6  ;;  %v4710_v19 = vld [vmem:[%s5459_s8] sm:$0xff] }
 0x53b   :  { %v1663_v5 = vsel %vm1662_vm10, %v1660_v0, %v1647_v2  ;;  %v1668_v10 = vperm.slane %v4710_v19, 1  ;;  %v1744_v35 = vperm.slane %v4710_v19, 4  ;;  %v1747_v17 = vperm.slane %v4710_v19, 5 }
 0x53c   :  { %v1666_v7 = vsel %vm1665_vm11, %v1663_v5, %v1655_v4  ;;  %v1750_v4 = vperm.slane %v4710_v19, 2 }
 0x53d   :  { %3795 = vmatmul.msk.f32.vlgmr.msrb.gmra.mxu3 %vm45_vm0, %v1666_v7 }
 0x574   :  { %v1641_v40 = vpop.permute.xlu0 %1640  ;;  %v1649_v42 = vpop.permute.xlu1 %1648 }
 0x575   :  { %v1661_v22 = vsel %vm935_vm9, %v1629_v8, %v1641_v40 }
 0x576   :  { %v1664_v9 = vsel %vm1662_vm10, %v1661_v22, %v1649_v42 }
 0x57c   :  { %v1657_v43 = vpop.permute.xlu0 %1656 }
 0x57d   :  { %v1667_v37 = vsel %vm1665_vm11, %v1664_v9, %v1657_v43 }
 0x57e   :  { %3796 = vmatmul.msk.f32.gmra.mxu3 %vm45_vm0, %v1667_v37 }
 0x5c0   :  { %v1692_v48 = vpop.f32.mrf.mxu3 }
 0x5c1   :  { %v1693_v49 = vadd.f32 %v1692_v48, %v1668_v10 }
 0x5c3   :  { %v1698_v52 = vadd.f32 %v1693_v49, %v4123_v54 }
 0x5c5   :  { %v1700_v18 = vsel %vm45_vm0, %v1698_v52, 0.0 }
 0x5c6   :  { %1701 = vadd.xlane.f32.xlu2 %v1700_v18 }
 0x601   :  { %v1695_v53 = vpop.f32.mrf.mxu3 }
 0x602   :  { %v1696_v56 = vadd.f32 %v1695_v53, %v1668_v10 }
 0x604   :  { %v1699_v59 = vadd.f32 %v1696_v56, %v4127_v60  ;;  %v126_v60 = vld [vmem:[%s5462_s6 + $0x18] sm:$0xff] }
 0x605   :  { %1769 = vmatpush.msrb.mxu0 %v126_v60  ;;  %v129_v60 = vld [vmem:[%s5463_s7 + $0x10] sm:$0xff] }
 0x606   :  { %v1703_v46 = vsel %vm45_vm0, %v1699_v59, 0.0 }
 0x607   :  { %1704 = vadd.xlane.f32.xlu1 %v1703_v46  ;;  %1770 = vmatpush.msrb.mxu0 %v125_v15  ;;  %v134_v46 = vld [vmem:[%s5463_s7 + $0x38] sm:$0xff]  ;;  %v128_v15 = vld [vmem:[%s5463_s7 + $0x8] sm:$0xff] }
 0x608   :  { %1884 = vmatpush.msrb.mxu1 %v134_v46 }
 0x609   :  { %1771 = vmatpush.msrb.mxu0 %v124_v23 }
 0x60b   :  { %1772 = vmatpush.msrb.mxu0 %v123_v24  ;;  %v127_v24 = vld [vmem:[%s5463_s7] sm:$0xff] }
 0x639   :  { %v1702_v34 = vpop.xlane.xlu2 %1701 }
 0x63a   :  { %v1706_v61 = vmul.f32 %v1702_v34, %v4100_v13  ;;  %v133_v34 = vld [vmem:[%s5463_s7 + $0x30] sm:$0xff] }
 0x63b   :  { %1885 = vmatpush.msrb.mxu1 %v133_v34 }
 0x63c   :  { %v1708_v63 = vsub.f32 %v1698_v52, %v1706_v61 }
 0x63e   :  { %v1710_v51 = vmul.f32 %v1708_v63, %v1708_v63 }
 0x640   :  { %v1712_v16 = vsel %vm45_vm0, %v1710_v51, 0.0 }
 0x641   :  { %1713 = vadd.xlane.f32.xlu0 %v1712_v16 }
 0x67a   :  { %v1705_v14 = vpop.xlane.xlu1 %1704 }
 0x67b   :  { %v1707_v54 = vmul.f32 %v1705_v14, %v4100_v13  ;;  %v131_v14 = vld [vmem:[%s5463_s7 + $0x20] sm:$0xff] }
 0x67d   :  { %v1709_v41 = vsub.f32 %v1699_v59, %v1707_v54 }
 0x67f   :  { %v1711_v20 = vmul.f32 %v1709_v41, %v1709_v41 }
 0x681   :  { %v1715_v33 = vsel %vm45_vm0, %v1711_v20, 0.0 }
 0x682   :  { %1716 = vadd.xlane.f32.xlu2 %v1715_v33 }
 0x6b4   :  { %v1714_v11 = vpop.xlane.xlu0 %1713 }
 0x6b5   :  { %v1718_v44 = vmul.f32 %v1714_v11, %v4100_v13 }
 0x6b7   :  { %v1720_v62 = vadd.f32 1e-05, %v1718_v44 }
 0x6b9   :  { %3958 = vrsqrt.f32 %v1720_v62  ;;  %vm1728_vm13 = vweird.f32 %v1720_v62 }
 0x6bf   :  { %v3959_v45 = vpop.eup %3958 }
 0x6c0   :  { %v1723_v50 = vmul.f32 %v3959_v45, %v1720_v62  ;;  %vm1729_vm12 = vweird.f32 %v3959_v45 }
 0x6c1   :  { %vm1730_vm14 = vmor %vm1728_vm13, %vm1729_vm12 }
 0x6c2   :  { %v1724_v25 = vmul.f32 %v3959_v45, %v1723_v50 }
 0x6c4   :  { %v1725_v1 = vmul.f32 0.5, %v1724_v25 }
 0x6c6   :  { %v1726_v26 = vsub.f32 1.5, %v1725_v1 }
 0x6c8   :  { %v1727_v28 = vmul.f32 %v3959_v45, %v1726_v26 }
 0x6ca   :  { %v1731_v58 = vsel %vm1730_vm14, %v3959_v45, %v1727_v28 }
 0x6cb   :  { %v1742_v39 = vmul.f32 %v1731_v58, %v1708_v63  ;;  %v132_v63 = vld [vmem:[%s5463_s7 + $0x28] sm:$0xff] }
 0x6cc   :  { %1886 = vmatpush.msrb.mxu1 %v132_v63 }
 0x6cd   :  { %v1745_v29 = vmul.f32 %v1744_v35, %v1742_v39 }
 0x6ce   :  { %1887 = vmatpush.msrb.mxu1 %v131_v14 }
 0x6cf   :  { %v4736_v57 = vadd.f32 %v1747_v17, %v1745_v29 }
 0x6d1   :  { %3797 = vmatmul.msk.f32.vlgmr.msrb.gmra.mxu0 %vm45_vm0, %v4736_v57 }
 0x6f5   :  { %v1717_v30 = vpop.xlane.xlu2 %1716 }
 0x6f6   :  { %v1719_v38 = vmul.f32 %v1717_v30, %v4100_v13 }
 0x6f8   :  { %v1721_v32 = vadd.f32 1e-05, %v1719_v38 }
 0x6fa   :  { %3960 = vrsqrt.f32 %v1721_v32  ;;  %vm1738_vm1 = vweird.f32 %v1721_v32 }
 0x700   :  { %v3961_v8 = vpop.eup %3960 }
 0x701   :  { %v1733_v47 = vmul.f32 %v3961_v8, %v1721_v32  ;;  %vm1739_vm15 = vweird.f32 %v3961_v8 }
 0x702   :  { %vm1740_vm2 = vmor %vm1738_vm1, %vm1739_vm15 }
 0x703   :  { %v1734_v55 = vmul.f32 %v3961_v8, %v1733_v47 }
 0x705   :  { %v1735_v27 = vmul.f32 0.5, %v1734_v55 }
 0x707   :  { %v1736_v3 = vsub.f32 1.5, %v1735_v27 }
 0x709   :  { %v1737_v12 = vmul.f32 %v3961_v8, %v1736_v3 }
 0x70b   :  { %v1741_v36 = vsel %vm1740_vm2, %v3961_v8, %v1737_v12 }
 0x70c   :  { %v1743_v6 = vmul.f32 %v1741_v36, %v1709_v41  ;;  %v130_v41 = vld [vmem:[%s5463_s7 + $0x18] sm:$0xff] }
 0x70d   :  { %1888 = vmatpush.msrb.mxu1 %v130_v41 }
 0x70e   :  { %v1746_v2 = vmul.f32 %v1744_v35, %v1743_v6 }
 0x70f   :  { %1889 = vmatpush.msrb.mxu1 %v129_v60 }
 0x710   :  { %v4741_v0 = vadd.f32 %v1747_v17, %v1746_v2 }
 0x711   :  { %1890 = vmatpush.msrb.mxu1 %v128_v15 }
 0x712   :  { %3798 = vmatmul.msk.f32.gmra.mxu0 %vm45_vm0, %v4741_v0 }
 0x713   :  { %1891 = vmatpush.msrb.mxu1 %v127_v24 }
 0x74e   :  { %v1774_v5 = vpop.f32.mrf.mxu0 }
 0x74f   :  { %v1775_v7 = vadd.f32 %v1774_v5, %v1750_v4 }
 0x751   :  { %v1782_v40 = vmul.f32 0.70710677, %v1775_v7  ;;  %v1780_v38 = vmul.f32 0.5, %v1775_v7 }
 0x753   :  { %v1784_v42 = vmul.f32 %v1782_v40, %v1782_v40 }
 0x755   :  { %v1785_v22 = vmin.f32 %v1784_v42, 16.0 }
 0x757   :  { %v1786_v43 = vmul.f32 2.1237322e-06, %v1785_v22  ;;  %v1797_v9 = vmul.f32 3.8918573e-05, %v1785_v22 }
 0x759   :  { %v1787_v37 = vadd.f32 0.00028619796, %v1786_v43  ;;  %v1798_v10 = vadd.f32 0.001143296, %v1797_v9 }
 0x75b   :  { %v1788_v48 = vmul.f32 %v1787_v37, %v1785_v22  ;;  %v1799_v49 = vmul.f32 %v1798_v10, %v1785_v22 }
 0x75d   :  { %v1800_v52 = vadd.f32 0.014752088, %v1799_v49  ;;  %v1789_v18 = vadd.f32 0.0036580483, %v1788_v48 }
 0x75f   :  { %v1801_v53 = vmul.f32 %v1800_v52, %v1785_v22  ;;  %v1790_v59 = vmul.f32 %v1789_v18, %v1785_v22 }
 0x761   :  { %v1802_v56 = vadd.f32 0.112945676, %v1801_v53  ;;  %v1791_v16 = vadd.f32 0.05243302, %v1790_v59 }
 0x763   :  { %v1803_v61 = vmul.f32 %v1802_v56, %v1785_v22  ;;  %v1792_v33 = vmul.f32 %v1791_v16, %v1785_v22 }
 0x765   :  { %v1804_v51 = vadd.f32 0.4994258, %v1803_v61  ;;  %v1793_v23 = vadd.f32 0.18741608, %v1792_v33 }
 0x767   :  { %v1805_v54 = vmul.f32 %v1804_v51, %v1785_v22  ;;  %v1794_v44 = vmul.f32 %v1793_v23, %v1785_v22 }
 0x769   :  { %v1806_v20 = vadd.f32 1.0, %v1805_v54  ;;  %v1795_v25 = vadd.f32 1.1283791, %v1794_v44  ;;  %v1868_v44 = vperm.slane %v4710_v19, 3 }
 0x76b   :  { %3962 = vrcp.f32 %v1806_v20  ;;  %v1818_v50 = vand.u32 2147483648, %v1806_v20  ;;  %v1816_v26 = vand.u32 2147483647, %v1806_v20  ;;  %vm1812_vm4 = vweird.f32 %v1806_v20 }
 0x76c   :  { %v1796_v58 = vmul.f32 %v1795_v25, %v1782_v40 }
 0x76d   :  { %v1819_v35 = vor.u32 1.1754944e-38, %v1818_v50  ;;  %vm1817_vm6 = vcmp.eq.f32.partialorder %v1816_v26, 8.507059e+37 }
 0x771   :  { %v3963_v11 = vpop.eup %3962 }
 0x772   :  { %v1808_v62 = vmul.f32 %v3963_v11, %v1806_v20  ;;  %vm1813_vm3 = vweird.f32 %v3963_v11 }
 0x773   :  { %vm1814_vm5 = vmor %vm1812_vm4, %vm1813_vm3 }
 0x774   :  { %v1809_v45 = vsub.f32 1.0, %v1808_v62 }
 0x776   :  { %v1810_v1 = vmul.f32 %v3963_v11, %v1809_v45 }
 0x778   :  { %v1811_v28 = vadd.f32 %v3963_v11, %v1810_v1 }
 0x77a   :  { %v1815_v39 = vsel %vm1814_vm5, %v3963_v11, %v1811_v28 }
 0x77b   :  { %v1820_v17 = vsel %vm1817_vm6, %v1819_v35, %v1815_v39 }
 0x77c   :  { %v1821_v29 = vmul.f32 %v1820_v17, %v1796_v58 }
 0x77e   :  { %v3799_v30 = vclamps-f32 %v1821_v29, 1.0 }
 0x780   :  { %v1864_v32 = vadd.f32 1.0, %v3799_v30 }
 0x782   :  { %v1866_v8 = vmul.f32 %v1864_v32, %v1780_v38 }
 0x784   :  { %3801 = vmatmul.msk.f32.vlgmr.msrb.gmra.mxu1 %vm1869_vm7, %v1866_v8 }
 0x78f   :  { %v1777_v47 = vpop.f32.mrf.mxu0 }
 0x790   :  { %v1778_v55 = vadd.f32 %v1777_v47, %v1750_v4 }
 0x792   :  { %v1783_v27 = vmul.f32 0.70710677, %v1778_v55  ;;  %v1781_v23 = vmul.f32 0.5, %v1778_v55  ;;  %v3805_v55 = vld [vmem:[%s5457_s4 + $0x30] sm:$0xff] }
 0x794   :  { %v1824_v3 = vmul.f32 %v1783_v27, %v1783_v27 }
 0x796   :  { %v1825_v12 = vmin.f32 %v1824_v3, 16.0  ;;  %v3803_v3 = vld [vmem:[%s5457_s4 + $0x20] sm:$0xff] }
 0x798   :  { %v1826_v36 = vmul.f32 2.1237322e-06, %v1825_v12  ;;  %v1837_v6 = vmul.f32 3.8918573e-05, %v1825_v12 }
 0x79a   :  { %v1827_v2 = vadd.f32 0.00028619796, %v1826_v36  ;;  %v1838_v5 = vadd.f32 0.001143296, %v1837_v6 }
 0x79c   :  { %v1828_v40 = vmul.f32 %v1827_v2, %v1825_v12  ;;  %v1839_v42 = vmul.f32 %v1838_v5, %v1825_v12 }
 0x79e   :  { %v1840_v22 = vadd.f32 0.014752088, %v1839_v42  ;;  %v1829_v7 = vadd.f32 0.0036580483, %v1828_v40 }
 0x7a0   :  { %v1841_v43 = vmul.f32 %v1840_v22, %v1825_v12  ;;  %v1830_v37 = vmul.f32 %v1829_v7, %v1825_v12 }
 0x7a2   :  { %v1842_v9 = vadd.f32 0.112945676, %v1841_v43  ;;  %v1831_v49 = vadd.f32 0.05243302, %v1830_v37  ;;  %v1945_v43 = vperm.slane %v4710_v19, 6 }
 0x7a4   :  { %v1843_v10 = vmul.f32 %v1842_v9, %v1825_v12  ;;  %v1832_v4 = vmul.f32 %v1831_v49, %v1825_v12 }
 0x7a6   :  { %v1844_v48 = vadd.f32 0.4994258, %v1843_v10  ;;  %v1833_v53 = vadd.f32 0.18741608, %v1832_v4  ;;  %v1948_v10 = vperm.slane %v4710_v19, 7 }
 0x7a8   :  { %v1845_v52 = vmul.f32 %v1844_v48, %v1825_v12  ;;  %v1834_v59 = vmul.f32 %v1833_v53, %v1825_v12 }
 0x7aa   :  { %v1846_v18 = vadd.f32 1.0, %v1845_v52  ;;  %v1835_v63 = vadd.f32 1.1283791, %v1834_v59 }
 0x7ac   :  { %3964 = vrcp.f32 %v1846_v18  ;;  %v1858_v61 = vand.u32 2147483648, %v1846_v18  ;;  %v1856_v16 = vand.u32 2147483647, %v1846_v18  ;;  %vm1852_vm13 = vweird.f32 %v1846_v18 }
 0x7ad   :  { %v1836_v41 = vmul.f32 %v1835_v63, %v1783_v27  ;;  %v3804_v27 = vld [vmem:[%s5457_s4 + $0x28] sm:$0xff] }
 0x7ae   :  { %v1859_v54 = vor.u32 1.1754944e-38, %v1858_v61  ;;  %vm1857_vm15 = vcmp.eq.f32.partialorder %v1856_v16, 8.507059e+37 }
 0x7b2   :  { %v3965_v56 = vpop.eup %3964 }
 0x7b3   :  { %v1848_v46 = vmul.f32 %v3965_v56, %v1846_v18  ;;  %vm1853_vm12 = vweird.f32 %v3965_v56 }
 0x7b4   :  { %vm1854_vm14 = vmor %vm1852_vm13, %vm1853_vm12 }
 0x7b5   :  { %v1849_v34 = vsub.f32 1.0, %v1848_v46 }
 0x7b7   :  { %v1850_v51 = vmul.f32 %v3965_v56, %v1849_v34 }
 0x7b9   :  { %v1851_v14 = vadd.f32 %v3965_v56, %v1850_v51 }
 0x7bb   :  { %v1855_v20 = vsel %vm1854_vm14, %v3965_v56, %v1851_v14  ;;  %v3823_v14 = vld [vmem:[%s5459_s8 + $0x8] sm:$0xff] }
 0x7bc   :  { %v1860_v33 = vsel %vm1857_vm15, %v1859_v54, %v1855_v20  ;;  %v1977_v54 = vperm.slane %v3823_v14, 0 }
 0x7bd   :  { %v1861_v60 = vmul.f32 %v1860_v33, %v1836_v41 }
 0x7bf   :  { %v3800_v15 = vclamps-f32 %v1861_v60, 1.0 }
 0x7c1   :  { %v1865_v24 = vadd.f32 1.0, %v3800_v15 }
 0x7c3   :  { %v1867_v11 = vmul.f32 %v1865_v24, %v1781_v23 }
 0x7c5   :  { %3802 = vmatmul.msk.f32.gmra.mxu1 %vm1869_vm7, %v1867_v11 }
 0x801   :  { %v1893_v62 = vpop.f32.mrf.mxu1 }
 0x802   :  { %v1894_v45 = vadd.f32 %v1893_v62, %v1868_v44 }
 0x804   :  { %v1899_v50 = vadd.f32 %v1894_v45, %v4736_v57 }
 0x806   :  { %v1901_v25 = vsel %vm45_vm0, %v1899_v50, 0.0 }
 0x807   :  { %1902 = vadd.xlane.f32.xlu1 %v1901_v25 }
 0x842   :  { %v1896_v1 = vpop.f32.mrf.mxu1 }
 0x843   :  { %v1897_v26 = vadd.f32 %v1896_v1, %v1868_v44 }
 0x845   :  { %v1900_v28 = vadd.f32 %v1897_v26, %v4741_v0  ;;  %v3806_v0 = vld [vmem:[%s5457_s4 + $0x38] sm:$0xff] }
 0x846   :  { %1996 = vmatpush.msra.mxu2 %v3806_v0 }
 0x847   :  { %v1904_v35 = vsel %vm45_vm0, %v1900_v28, 0.0 }
 0x848   :  { %1905 = vadd.xlane.f32.xlu0 %v1904_v35  ;;  %1997 = vmatpush.msra.mxu2 %v3805_v55 }
 0x84a   :  { %1998 = vmatpush.msra.mxu2 %v3804_v27 }
 0x84c   :  { %1999 = vmatpush.msra.mxu2 %v3803_v3 }
 0x87a   :  { %v1903_v58 = vpop.xlane.xlu1 %1902 }
 0x87b   :  { %v1907_v39 = vmul.f32 %v1903_v58, %v4100_v13 }
 0x87d   :  { %v1909_v17 = vsub.f32 %v1899_v50, %v1907_v39 }
 0x87f   :  { %v1911_v29 = vmul.f32 %v1909_v17, %v1909_v17 }
 0x881   :  { %v1913_v30 = vsel %vm45_vm0, %v1911_v29, 0.0 }
 0x882   :  { %1914 = vadd.xlane.f32.xlu2 %v1913_v30 }
 0x8bb   :  { %v1906_v38 = vpop.xlane.xlu0 %1905 }
 0x8bc   :  { %v1908_v57 = vmul.f32 %v1906_v38, %v4100_v13 }
 0x8be   :  { %v1910_v32 = vsub.f32 %v1900_v28, %v1908_v57 }
 0x8c0   :  { %v1912_v8 = vmul.f32 %v1910_v32, %v1910_v32 }
 0x8c2   :  { %v1916_v47 = vsel %vm45_vm0, %v1912_v8, 0.0 }
 0x8c3   :  { %1917 = vadd.xlane.f32.xlu1 %v1916_v47 }
 0x8f5   :  { %v1915_v12 = vpop.xlane.xlu2 %1914 }
 0x8f6   :  { %v1919_v36 = vmul.f32 %v1915_v12, %v4100_v13 }
 0x8f8   :  { %v1921_v6 = vadd.f32 1e-05, %v1919_v36 }
 0x8fa   :  { %3966 = vrsqrt.f32 %v1921_v6  ;;  %vm1929_vm2 = vweird.f32 %v1921_v6 }
 0x900   :  { %v3967_v2 = vpop.eup %3966 }
 0x901   :  { %v1924_v5 = vmul.f32 %v3967_v2, %v1921_v6  ;;  %vm1930_vm1 = vweird.f32 %v3967_v2 }
 0x902   :  { %vm1931_vm3 = vmor %vm1929_vm2, %vm1930_vm1 }
 0x903   :  { %v1925_v40 = vmul.f32 %v3967_v2, %v1924_v5 }
 0x905   :  { %v1926_v42 = vmul.f32 0.5, %v1925_v40 }
 0x907   :  { %v1927_v22 = vsub.f32 1.5, %v1926_v42 }
 0x909   :  { %v1928_v7 = vmul.f32 %v3967_v2, %v1927_v22 }
 0x90b   :  { %v1932_v9 = vsel %vm1931_vm3, %v3967_v2, %v1928_v7 }
 0x90c   :  { %v1943_v37 = vmul.f32 %v1932_v9, %v1909_v17 }
 0x90e   :  { %v1946_v48 = vmul.f32 %v1945_v43, %v1943_v37 }
 0x910   :  { %v4800_v49 = vadd.f32 %v1948_v10, %v1946_v48 }
 0x912   :  { %3824 = vmatmul.msk.f32.vlgmr.msra.gmra.mxu2 %vm45_vm0, %v4800_v49 }
 0x936   :  { %v1918_v52 = vpop.xlane.xlu1 %1917 }
 0x937   :  { %v1920_v18 = vmul.f32 %v1918_v52, %v4100_v13 }
 0x939   :  { %v1922_v4 = vadd.f32 1e-05, %v1920_v18 }
 0x93b   :  { %3968 = vrsqrt.f32 %v1922_v4  ;;  %vm1939_vm5 = vweird.f32 %v1922_v4 }
 0x941   :  { %v3969_v53 = vpop.eup %3968 }
 0x942   :  { %v1934_v56 = vmul.f32 %v3969_v53, %v1922_v4  ;;  %vm1940_vm4 = vweird.f32 %v3969_v53 }
 0x943   :  { %vm1941_vm6 = vmor %vm1939_vm5, %vm1940_vm4 }
 0x944   :  { %v1935_v59 = vmul.f32 %v3969_v53, %v1934_v56 }
 0x946   :  { %v1936_v46 = vmul.f32 0.5, %v1935_v59 }
 0x948   :  { %v1937_v34 = vsub.f32 1.5, %v1936_v46 }
 0x94a   :  { %v1938_v61 = vmul.f32 %v3969_v53, %v1937_v34 }
 0x94c   :  { %v1942_v19 = vsel %vm1941_vm6, %v3969_v53, %v1938_v61 }
 0x94d   :  { %v1944_v63 = vmul.f32 %v1942_v19, %v1910_v32 }
 0x94f   :  { %v1947_v51 = vmul.f32 %v1945_v43, %v1944_v63 }
 0x951   :  { %v4805_v16 = vadd.f32 %v1948_v10, %v1947_v51 }
 0x953   :  { %3825 = vmatmul.msk.f32.gmra.mxu2 %vm45_vm0, %v4805_v16 }
 0x995   :  { %v2001_v41 = vpop.f32.mrf.mxu2 }
 0x996   :  { %v4812_v20 = vadd.f32 %v2001_v41, %v1977_v54 }
 0x998   :  { %2259 = vrot.lane.b32.xlu1 %v4812_v20, %s4028_s28  ;;  %2255 = vrot.lane.b32.xlu2 %v4812_v20, %s4027_s27  ;;  %v2007_v15 = vmul.f32 0.35355338, %v4812_v20 }
 0x999   :  { %2251 = vrot.lane.b32.xlu0 %v4812_v20, %s4026_s26 }
 0x99a   :  { %v2031_v8 = vrot.slane %v2007_v15, 4 }
 0x9a0   :  { %2263 = vrot.lane.b32.xlu1 %v4812_v20, %s4029_s29 }
 0x9d6   :  { %v2004_v33 = vpop.f32.mrf.mxu2 }
 0x9d7   :  { %v4822_v60 = vadd.f32 %v2004_v33, %v1977_v54 }
 0x9d9   :  { %2257 = vrot.lane.b32.xlu2 %v4822_v60, %s4027_s27  ;;  %2253 = vrot.lane.b32.xlu0 %v4822_v60, %s4026_s26  ;;  %v4855_v45 = vmul.f32 0.35355338, %v4822_v60 }
 0x9e1   :  { %2011 = vrot.lane.b32.xlu2 %v2007_v15, %s4026_s26  ;;  %2261 = vrot.lane.b32.xlu0 %v4822_v60, %s4028_s28 }
 0x9f2   :  { %v4832_v23 = vpop.permute.xlu2 %2255 }
 0x9f3   :  { %2271 = vrot.lane.b32.xlu0 %v4832_v23, %s4029_s29 }
 0x9fb   :  { %2017 = vrot.lane.b32.xlu0 %v2007_v15, %s4027_s27 }
 0xa0a   :  { %v4837_v24 = vpop.permute.xlu1 %2259 }
 0xa0b   :  { %v4839_v11 = vpop.permute.xlu0 %2251  ;;  %v3896_v44 = vpack.i.bf16 %v4837_v24, %v4832_v23  ;;  %2275 = vrot.lane.b32.xlu1 %v4837_v24, %s4029_s29 }
 0xa0c   :  { %2267 = vrot.lane.b32.xlu2 %v4839_v11, %s4029_s29 }
 0xa12   :  { %v2264_v35 = vpop.permute.xlu1 %2263 }
 0xa13   :  { %2023 = vrot.lane.b32.xlu1 %v2007_v15, %s4028_s28  ;;  %v2289_v39 = vrot.slane %v2264_v35, 4 }
 0xa14   :  { %2265 = vrot.lane.b32.xlu2 %v4822_v60, %s4029_s29 }
 0xa33   :  { %v4850_v62 = vpop.permute.xlu2 %2257 }
 0xa34   :  { %2273 = vrot.lane.b32.xlu1 %v4850_v62, %s4029_s29 }
 0xa3b   :  { %v2012_v28 = vpop.permute.xlu2 %2011 }
 0xa3c   :  { %2019 = vrot.lane.b32.xlu1 %v4855_v45, %s4027_s27  ;;  %v2043_v56 = vrot.slane %v2012_v28, 4 }
 0xa4b   :  { %v4859_v50 = vpop.permute.xlu0 %2253 }
 0xa4c   :  { %2269 = vrot.lane.b32.xlu0 %v4859_v50, %s4029_s29 }
 0xa53   :  { %v4863_v25 = vpop.permute.xlu0 %2261 }
 0xa54   :  { %v3906_v1 = vpack.i.bf16 %v4863_v25, %v4850_v62  ;;  %2277 = vrot.lane.b32.xlu2 %v4863_v25, %s4029_s29  ;;  %2013 = vrot.lane.b32.xlu0 %v4855_v45, %s4026_s26 }
 0xa5c   :  { %2025 = vrot.lane.b32.xlu2 %v4855_v45, %s4028_s28 }
 0xa65   :  { %v2272_v26 = vpop.permute.xlu0 %2271 }
 0xa66   :  { %v2287_v58 = vrot.slane %v2272_v26, 4  ;;  %v2290_v29 = vsel %vm189_vm8, %v2272_v26, %v2289_v39  ;;  %v2268_v30 = vpop.permute.xlu2 %2267 }
 0xa67   :  { %v2298_v32 = vperm.slane %v2290_v29, %v4195_v21  ;;  %v2301_v47 = vrot.slane %v2268_v30, 4 }
 0xa68   :  { %v2288_v38 = vsel %vm189_vm8, %v2287_v58, %v2264_v35 }
 0xa69   :  { %v2294_v0 = vperm.slane %v2288_v38, %v4195_v21  ;;  %v2325_v6 = vrot.slane %v2298_v32, 4 }
 0xa6b   :  { %v2313_v5 = vrot.slane %v2294_v0, 4 }
 0xa6d   :  { %v2018_v17 = vpop.permute.xlu0 %2017 }
 0xa6e   :  { %v2029_v57 = vrot.slane %v2018_v17, 4  ;;  %v2032_v55 = vsel %vm189_vm8, %v2018_v17, %v2031_v8 }
 0xa6f   :  { %v2040_v40 = vperm.slane %v2032_v55, %v4195_v21 }
 0xa70   :  { %v2030_v3 = vsel %vm189_vm8, %v2029_v57, %v2007_v15 }
 0xa71   :  { %v2036_v22 = vperm.slane %v2030_v3, %v4195_v21  ;;  %v2067_v46 = vrot.slane %v2040_v40, 4 }
 0xa73   :  { %v2055_v59 = vrot.slane %v2036_v22, 4 }
 0xa7d   :  { %v2276_v27 = vpop.permute.xlu1 %2275 }
 0xa7e   :  { %v2299_v12 = vrot.slane %v2276_v27, 4  ;;  %v2302_v36 = vsel %vm189_vm8, %v2276_v27, %v2301_v47 }
 0xa7f   :  { %v2310_v2 = vperm.slane %v2302_v36, %v4195_v21 }
 0xa80   :  { %v2300_v42 = vsel %vm189_vm8, %v2299_v12, %v2268_v30 }
 0xa81   :  { %v2306_v7 = vperm.slane %v2300_v42, %v4195_v21  ;;  %v2323_v43 = vrot.slane %v2310_v2, 4  ;;  %v2326_v9 = vsel %vm189_vm8, %v2310_v2, %v2325_v6 }
 0xa82   :  { %v2334_v37 = vperm.slane %v2326_v9, %v4201_v31 }
 0xa83   :  { %v2311_v10 = vrot.slane %v2306_v7, 4  ;;  %v2314_v48 = vsel %vm189_vm8, %v2306_v7, %v2313_v5  ;;  %v2324_v52 = vsel %vm189_vm8, %v2323_v43, %v2298_v32 }
 0xa84   :  { %v2322_v18 = vperm.slane %v2314_v48, %v4201_v31  ;;  %v2330_v4 = vperm.slane %v2324_v52, %v4201_v31  ;;  %v2341_v53 = vrot.slane %v2334_v37, 4 }
 0xa85   :  { %v2312_v34 = vsel %vm189_vm8, %v2311_v10, %v2294_v0  ;;  %v2024_v61 = vpop.permute.xlu1 %2023 }
 0xa86   :  { %v2318_v19 = vperm.slane %v2312_v34, %v4201_v31  ;;  %v2337_v63 = vrot.slane %v2322_v18, 4  ;;  %v2339_v51 = vrot.slane %v2330_v4, 4  ;;  %v2342_v14 = vsel %vm189_vm8, 0.0, %v2341_v53 }
 0xa87   :  { %v2410_v54 = vsel %vm189_vm8, %v2341_v53, %v2330_v4  ;;  %v2415_v41 = vrot.slane %v2342_v14, 4  ;;  %v2041_v33 = vrot.slane %v2024_v61, 4  ;;  %v2044_v15 = vsel %vm189_vm8, %v2024_v61, %v2043_v56 }
 0xa88   :  { %v2335_v26 = vrot.slane %v2318_v19, 4  ;;  %v2338_v35 = vsel %vm189_vm8, 0.0, %v2337_v63  ;;  %v2340_v58 = vsel %vm189_vm8, 0.0, %v2339_v51  ;;  %v2399_v39 = vsel %vm189_vm8, %v2337_v63, %v2318_v19 }
 0xa89   :  { %v2404_v17 = vrot.slane %v2338_v35, 4  ;;  %v2414_v29 = vperm.slane %v2410_v54, %v4195_v21  ;;  %v2416_v30 = vsel %vm189_vm8, %v2415_v41, %v2340_v58  ;;  %v2042_v38 = vsel %vm189_vm8, %v2041_v33, %v2012_v28 }
 0xa8a   :  { %v2336_v57 = vsel %vm189_vm8, 0.0, %v2335_v26  ;;  %v2420_v32 = vperm.slane %v2416_v30, %v4195_v21  ;;  %v2048_v8 = vperm.slane %v2042_v38, %v4195_v21  ;;  %v2052_v47 = vperm.slane %v2044_v15, %v4195_v21 }
 0xa8b   :  { %v2435_v0 = vrot.slane %v2414_v29, 4  ;;  %v2403_v55 = vperm.slane %v2399_v39, %v4195_v21  ;;  %v2405_v27 = vsel %vm189_vm8, %v2404_v17, %v2336_v57 }
 0xa8c   :  { %v2053_v3 = vrot.slane %v2048_v8, 4  ;;  %v2056_v12 = vsel %vm189_vm8, %v2048_v8, %v2055_v59  ;;  %v2065_v36 = vrot.slane %v2052_v47, 4  ;;  %v2068_v6 = vsel %vm189_vm8, %v2052_v47, %v2067_v46 }
 0xa8d   :  { %v2064_v28 = vperm.slane %v2056_v12, %v4201_v31  ;;  %v2076_v2 = vperm.slane %v2068_v6, %v4201_v31  ;;  %v2409_v5 = vperm.slane %v2405_v27, %v4195_v21  ;;  %v2423_v42 = vrot.slane %v2403_v55, 4 }
 0xa8e   :  { %v2054_v7 = vsel %vm189_vm8, %v2053_v3, %v2036_v22  ;;  %v2066_v43 = vsel %vm189_vm8, %v2065_v36, %v2040_v40  ;;  %v2436_v9 = vsel %vm189_vm8, %v2420_v32, %v2435_v0  ;;  %v2433_v37 = vrot.slane %v2420_v32, 4 }
 0xa8f   :  { %v2060_v10 = vperm.slane %v2054_v7, %v4201_v31  ;;  %v2072_v48 = vperm.slane %v2066_v43, %v4201_v31  ;;  %v2079_v52 = vrot.slane %v2064_v28, 4  ;;  %v2083_v18 = vrot.slane %v2076_v2, 4 }
 0xa90   :  { %v2424_v4 = vsel %vm189_vm8, %v2409_v5, %v2423_v42  ;;  %v2444_v53 = vperm.slane %v2436_v9, %v4201_v31  ;;  %v2421_v56 = vrot.slane %v2409_v5, 4  ;;  %v2434_v59 = vsel %vm189_vm8, %v2433_v37, %v2414_v29 }
 0xa91   :  { %v2077_v46 = vrot.slane %v2060_v10, 4  ;;  %v2080_v22 = vsel %vm189_vm8, 0.0, %v2079_v52  ;;  %v2081_v40 = vrot.slane %v2072_v48, 4  ;;  %v2084_v34 = vsel %vm189_vm8, 0.0, %v2083_v18 }
 0xa92   :  { %v2141_v61 = vsel %vm189_vm8, %v2079_v52, %v2060_v10  ;;  %v2146_v19 = vrot.slane %v2080_v22, 4  ;;  %v2152_v63 = vsel %vm189_vm8, %v2083_v18, %v2072_v48  ;;  %v2157_v51 = vrot.slane %v2084_v34, 4  ;;  %v2266_v22 = vpop.permute.xlu2 %2265 }
 0xa93   :  { %v2078_v14 = vsel %vm189_vm8, 0.0, %v2077_v46  ;;  %v2082_v54 = vsel %vm189_vm8, 0.0, %v2081_v40  ;;  %v2156_v41 = vperm.slane %v2152_v63, %v4195_v21  ;;  %v2432_v33 = vperm.slane %v2424_v4, %v4201_v31 }
 0xa94   :  { %v2158_v15 = vsel %vm189_vm8, %v2157_v51, %v2082_v54  ;;  %v2449_v26 = vrot.slane %v2444_v53, 4  ;;  %v2422_v35 = vsel %vm189_vm8, %v2421_v56, %v2403_v55  ;;  %v2440_v58 = vperm.slane %v2434_v59, %v4201_v31 }
 0xa95   :  { %v2162_v39 = vperm.slane %v2158_v15, %v4195_v21  ;;  %v2177_v17 = vrot.slane %v2156_v41, 4  ;;  %v2428_v29 = vperm.slane %v2422_v35, %v4201_v31  ;;  %v2451_v30 = vrot.slane %v2432_v33, 4 }
 0xa96   :  { %v2450_v38 = vsel %vm189_vm8, %v2449_v26, %v2432_v33  ;;  %v2445_v57 = vrot.slane %v2440_v58, 4  ;;  %v2145_v32 = vperm.slane %v2141_v61, %v4195_v21  ;;  %v2147_v8 = vsel %vm189_vm8, %v2146_v19, %v2078_v14 }
 0xa97   :  { %3830 = vmatpush.xpose.msk.msrb.mxu2 %vm935_vm9, %v2450_v38  ;;  %v2452_v47 = vsel %vm189_vm8, %v2444_v53, %v2451_v30  ;;  %v2447_v0 = vrot.slane %v2428_v29, 4  ;;  %v2151_v55 = vperm.slane %v2147_v8, %v4195_v21  ;;  %v2178_v27 = vsel %vm189_vm8, %v2162_v39, %v2177_v17 }
 0xa98   :  { %v2446_v3 = vsel %vm189_vm8, %v2445_v57, %v2428_v29  ;;  %v2165_v12 = vrot.slane %v2145_v32, 4  ;;  %v2186_v36 = vperm.slane %v2178_v27, %v4201_v31  ;;  %v2175_v6 = vrot.slane %v2162_v39, 4 }
 0xa99   :  { %3826 = vmatpush.xpose.msk.msra.mxu3 %vm935_vm9, %v2446_v3  ;;  %v2448_v28 = vsel %vm189_vm8, %v2440_v58, %v2447_v0  ;;  %v2163_v2 = vrot.slane %v2151_v55, 4  ;;  %v2345_v34 = vrot.slane %v2266_v22, 4  ;;  %v2087_v30 = vrot.slane %v4855_v45, 4 }
 0xa9a   :  { %3828 = vmatpush.xpose.msk.msra.mxu0 %vm935_vm9, %v2448_v28  ;;  %v2166_v5 = vsel %vm189_vm8, %v2151_v55, %v2165_v12  ;;  %v2191_v42 = vrot.slane %v2186_v36, 4  ;;  %v2176_v7 = vsel %vm189_vm8, %v2175_v6, %v2156_v41 }
 0xa9b   :  { %v2174_v43 = vperm.slane %v2166_v5, %v4201_v31  ;;  %v2164_v9 = vsel %vm189_vm8, %v2163_v2, %v2145_v32  ;;  %v2182_v37 = vperm.slane %v2176_v7, %v4201_v31 }
 0xa9c   :  { %v2170_v10 = vperm.slane %v2164_v9, %v4201_v31 }
 0xa9d   :  { %3832 = vmatpush.xpose.msk.msrb.mxu3 %vm935_vm9, %v2452_v47  ;;  %v2192_v48 = vsel %vm189_vm8, %v2191_v42, %v2174_v43  ;;  %v2187_v52 = vrot.slane %v2182_v37, 4  ;;  %v2193_v56 = vrot.slane %v2174_v43, 4 }
 0xa9e   :  { %3831 = vmatmul.msk.f32.vlgmr.msrb.gmra.mxu2 %vm935_vm9, %v2192_v48  ;;  %v2189_v18 = vrot.slane %v2170_v10, 4 }
 0xa9f   :  { %v2188_v4 = vsel %vm189_vm8, %v2187_v52, %v2170_v10  ;;  %v2194_v59 = vsel %vm189_vm8, %v2186_v36, %v2193_v56 }
 0xaa0   :  { %3827 = vmatmul.msk.f32.vlgmr.msra.gmra.mxu3 %vm935_vm9, %v2188_v4  ;;  %v2190_v53 = vsel %vm189_vm8, %v2182_v37, %v2189_v18 }
 0xaa1   :  { %3829 = vmatmul.msk.f32.vlgmr.msra.gmra.mxu0 %vm935_vm9, %v2190_v53 }
 0xaa6   :  { %v2274_v46 = vpop.permute.xlu1 %2273 }
 0xaa7   :  { %v2343_v40 = vrot.slane %v2274_v46, 4  ;;  %v2346_v51 = vsel %vm189_vm8, %v2274_v46, %v2345_v34 }
 0xaa8   :  { %3833 = vmatmul.msk.f32.vlgmr.msrb.gmra.mxu3 %vm935_vm9, %v2194_v59  ;;  %v2354_v41 = vperm.slane %v2346_v51, %v4195_v21 }
 0xaa9   :  { %v2344_v19 = vsel %vm189_vm8, %v2343_v40, %v2266_v22 }
 0xaaa   :  { %v2350_v54 = vperm.slane %v2344_v19, %v4195_v21  ;;  %v2381_v29 = vrot.slane %v2354_v41, 4 }
 0xaac   :  { %v2369_v39 = vrot.slane %v2350_v54, 4 }
 0xaae   :  { %v2020_v61 = vpop.permute.xlu1 %2019  ;;  %v2278_v63 = vpop.permute.xlu2 %2277 }
 0xaaf   :  { %v2085_v14 = vrot.slane %v2020_v61, 4  ;;  %v2355_v33 = vrot.slane %v2278_v63, 4  ;;  %v2088_v0 = vsel %vm189_vm8, %v2020_v61, %v2087_v30 }
 0xab0   :  { %v2096_v2 = vperm.slane %v2088_v0, %v4195_v21 }
 0xab1   :  { %v2086_v26 = vsel %vm189_vm8, %v2085_v14, %v4855_v45 }
 0xab2   :  { %v2092_v57 = vperm.slane %v2086_v26, %v4195_v21 }
 0xab4   :  { %v2111_v5 = vrot.slane %v2092_v57, 4 }
 0xab6   :  { %v2026_v55 = vpop.permute.xlu2 %2025 }
 0xab7   :  { %v2097_v42 = vrot.slane %v2026_v55, 4 }
 0xabe   :  { %v2270_v15 = vpop.permute.xlu0 %2269 }
 0xabf   :  { %v2356_v35 = vsel %vm189_vm8, %v2355_v33, %v2270_v15  ;;  %v2357_v58 = vrot.slane %v2270_v15, 4 }
 0xac0   :  { %v2362_v17 = vperm.slane %v2356_v35, %v4195_v21 }
 0xac1   :  { %v2358_v38 = vsel %vm189_vm8, %v2278_v63, %v2357_v58 }
 0xac2   :  { %v2366_v32 = vperm.slane %v2358_v38, %v4195_v21  ;;  %v2367_v8 = vrot.slane %v2362_v17, 4  ;;  %v2370_v47 = vsel %vm189_vm8, %v2362_v17, %v2369_v39 }
 0xac3   :  { %v2378_v27 = vperm.slane %v2370_v47, %v4201_v31 }
 0xac4   :  { %v2368_v3 = vsel %vm189_vm8, %v2367_v8, %v2350_v54  ;;  %v2379_v12 = vrot.slane %v2366_v32, 4  ;;  %v2382_v36 = vsel %vm189_vm8, %v2366_v32, %v2381_v29 }
 0xac5   :  { %v2374_v45 = vperm.slane %v2368_v3, %v4201_v31  ;;  %v2390_v6 = vperm.slane %v2382_v36, %v4201_v31  ;;  %v2393_v28 = vrot.slane %v2378_v27, 4 }
 0xac6   :  { %v2380_v7 = vsel %vm189_vm8, %v2379_v12, %v2354_v41  ;;  %v2014_v43 = vpop.permute.xlu0 %2013  ;;  %v2123_v41 = vrot.slane %v2096_v2, 4 }
 0xac7   :  { %v2386_v9 = vperm.slane %v2380_v7, %v4201_v31  ;;  %v2391_v37 = vrot.slane %v2374_v45, 4  ;;  %v2394_v10 = vsel %vm189_vm8, 0.0, %v2393_v28  ;;  %v2397_v48 = vrot.slane %v2390_v6, 4 }
 0xac8   :  { %v2453_v52 = vsel %vm189_vm8, %v2393_v28, %v2374_v45  ;;  %v2458_v18 = vrot.slane %v2394_v10, 4  ;;  %v2098_v4 = vsel %vm189_vm8, %v2097_v42, %v2014_v43  ;;  %v2099_v53 = vrot.slane %v2014_v43, 4 }
 0xac9   :  { %v2392_v56 = vsel %vm189_vm8, 0.0, %v2391_v37  ;;  %v2395_v59 = vrot.slane %v2386_v9, 4  ;;  %v2398_v46 = vsel %vm189_vm8, 0.0, %v2397_v48  ;;  %v2457_v22 = vperm.slane %v2453_v52, %v4195_v21 }
 0xaca   :  { %v2459_v40 = vsel %vm189_vm8, %v2458_v18, %v2392_v56  ;;  %v2464_v34 = vsel %vm189_vm8, %v2397_v48, %v2386_v9  ;;  %v2469_v61 = vrot.slane %v2398_v46, 4  ;;  %v2100_v19 = vsel %vm189_vm8, %v2026_v55, %v2099_v53 }
 0xacb   :  { %v2396_v63 = vsel %vm189_vm8, 0.0, %v2395_v59  ;;  %v2463_v51 = vperm.slane %v2459_v40, %v4195_v21  ;;  %v2477_v14 = vrot.slane %v2457_v22, 4  ;;  %v2104_v54 = vperm.slane %v2098_v4, %v4195_v21 }
 0xacc   :  { %v2108_v33 = vperm.slane %v2100_v19, %v4195_v21  ;;  %v2468_v15 = vperm.slane %v2464_v34, %v4195_v21  ;;  %v2470_v26 = vsel %vm189_vm8, %v2469_v61, %v2396_v63 }
 0xacd   :  { %v2109_v35 = vrot.slane %v2104_v54, 4  ;;  %v2112_v58 = vsel %vm189_vm8, %v2104_v54, %v2111_v5  ;;  %v2474_v39 = vperm.slane %v2470_v26, %v4195_v21  ;;  %v2478_v17 = vsel %vm189_vm8, %v2463_v51, %v2477_v14 }
 0xace   :  { %v2120_v29 = vperm.slane %v2112_v58, %v4201_v31  ;;  %v2121_v30 = vrot.slane %v2108_v33, 4  ;;  %v2124_v38 = vsel %vm189_vm8, %v2108_v33, %v2123_v41  ;;  %v2486_v32 = vperm.slane %v2478_v17, %v4201_v31 }
 0xacf   :  { %v2110_v8 = vsel %vm189_vm8, %v2109_v35, %v2092_v57  ;;  %v2132_v47 = vperm.slane %v2124_v38, %v4201_v31  ;;  %v2489_v0 = vrot.slane %v2468_v15, 4  ;;  %v2475_v55 = vrot.slane %v2463_v51, 4 }
 0xad0   :  { %v2116_v27 = vperm.slane %v2110_v8, %v4201_v31  ;;  %v2122_v3 = vsel %vm189_vm8, %v2121_v30, %v2096_v2  ;;  %v2135_v12 = vrot.slane %v2120_v29, 4  ;;  %v2505_v36 = vrot.slane %v2486_v32, 4 }
 0xad1   :  { %v2128_v45 = vperm.slane %v2122_v3, %v4201_v31  ;;  %v2139_v6 = vrot.slane %v2132_v47, 4  ;;  %v2490_v28 = vsel %vm189_vm8, %v2474_v39, %v2489_v0  ;;  %v2476_v5 = vsel %vm189_vm8, %v2475_v55, %v2457_v22 }
 0xad2   :  { %v2133_v42 = vrot.slane %v2116_v27, 4  ;;  %v2136_v57 = vsel %vm189_vm8, 0.0, %v2135_v12  ;;  %v2195_v7 = vsel %vm189_vm8, %v2135_v12, %v2116_v27  ;;  %v2498_v43 = vperm.slane %v2490_v28, %v4201_v31 }
 0xad3   :  { %v2137_v9 = vrot.slane %v2128_v45, 4  ;;  %v2140_v37 = vsel %vm189_vm8, 0.0, %v2139_v6  ;;  %v2199_v2 = vperm.slane %v2195_v7, %v4195_v21  ;;  %v2200_v10 = vrot.slane %v2136_v57, 4 }
 0xad4   :  { %v2134_v48 = vsel %vm189_vm8, 0.0, %v2133_v42  ;;  %v2206_v52 = vsel %vm189_vm8, %v2139_v6, %v2128_v45  ;;  %v2211_v18 = vrot.slane %v2140_v37, 4  ;;  %v2506_v4 = vsel %vm189_vm8, %v2498_v43, %v2505_v36  ;;  %v4015_v42 = vld [vmem:[%s5460_s2 + $0x1] ss:$0 sm:$0xff] }
 0xad5   :  { %v2138_v53 = vsel %vm189_vm8, 0.0, %v2137_v9  ;;  %v2201_v56 = vsel %vm189_vm8, %v2200_v10, %v2134_v48  ;;  %v2219_v59 = vrot.slane %v2199_v2, 4  ;;  %3840 = vmatpush.xpose.msk.msra.mxu3 %vm935_vm9, %v2506_v4  ;;  %v2482_v46 = vperm.slane %v2476_v5, %v4201_v31  ;;  %v4016_v9 = vld [vmem:[%s5460_s2 + $0x2] ss:$0 sm:$0xff]  ;;  %v4017_v10 = vld [vmem:[%s5460_s2] ss:$0 sm:$0xff] }
 0xad6   :  { %v2205_v22 = vperm.slane %v2201_v56, %v4195_v21  ;;  %v2487_v40 = vrot.slane %v2474_v39, 4  ;;  %v2503_v34 = vrot.slane %v2498_v43, 4  ;;  %v2210_v61 = vperm.slane %v2206_v52, %v4195_v21 }
 0xad7   :  { %v2501_v19 = vrot.slane %v2482_v46, 4  ;;  %v2212_v63 = vsel %vm189_vm8, %v2211_v18, %v2138_v53 }
 0xad8   :  { %v2488_v51 = vsel %vm189_vm8, %v2487_v40, %v2468_v15  ;;  %v2504_v14 = vsel %vm189_vm8, %v2503_v34, %v2486_v32  ;;  %v2216_v54 = vperm.slane %v2212_v63, %v4195_v21  ;;  %v2220_v41 = vsel %vm189_vm8, %v2205_v22, %v2219_v59  ;;  %v4018_v59 = vld [vmem:[%s5460_s2 + $0x5] ss:$0 sm:$0xff]  ;;  %v4020_v63 = vld [vmem:[%s5460_s2 + $0x7] ss:$0 sm:$0xff] }
 0xad9   :  { %v2494_v33 = vperm.slane %v2488_v51, %v4201_v31  ;;  %3838 = vmatpush.xpose.msk.msra.mxu2 %vm935_vm9, %v2504_v14  ;;  %v2228_v26 = vperm.slane %v2220_v41, %v4201_v31  ;;  %v2231_v35 = vrot.slane %v2210_v61, 4  ;;  %v2217_v58 = vrot.slane %v2205_v22, 4  ;;  %v4019_v22 = vld [vmem:[%s5460_s2 + $0x4] ss:$0 sm:$0xff]  ;;  %v4021_v41 = vld [vmem:[%s5460_s2 + $0x3] ss:$0 sm:$0xff] }
 0xada   :  { %v2229_v39 = vrot.slane %v2216_v54, 4 }
 0xadb   :  { %v2502_v17 = vsel %vm189_vm8, %v2494_v33, %v2501_v19  ;;  %v2499_v29 = vrot.slane %v2494_v33, 4  ;;  %v2232_v15 = vsel %vm189_vm8, %v2216_v54, %v2231_v35  ;;  %v2247_v30 = vrot.slane %v2228_v26, 4 }
 0xadc   :  { %3836 = vmatpush.xpose.msk.msra.mxu1 %vm935_vm9, %v2502_v17  ;;  %v2240_v38 = vperm.slane %v2232_v15, %v4201_v31  ;;  %v2218_v32 = vsel %vm189_vm8, %v2217_v58, %v2199_v2  ;;  %v2230_v8 = vsel %vm189_vm8, %v2229_v39, %v2210_v61  ;;  %v3891_v17 = vpack.i.bf16 %v4839_v11, %v4812_v20 }
 0xadd   :  { %v2500_v47 = vsel %vm189_vm8, %v2499_v29, %v2482_v46  ;;  %v2224_v0 = vperm.slane %v2218_v32, %v4201_v31  ;;  %v2236_v55 = vperm.slane %v2230_v8, %v4201_v31  ;;  %v3901_v29 = vpack.i.bf16 %v4859_v50, %v4822_v60 }
 0xade   :  { %3834 = vmatpush.xpose.msk.msrb.mxu0 %vm935_vm9, %v2500_v47  ;;  %v2248_v27 = vsel %vm189_vm8, %v2240_v38, %v2247_v30  ;;  %v2245_v3 = vrot.slane %v2240_v38, 4 }
 0xadf   :  { %3841 = vmatmul.msk.f32.vlgmr.msra.gmra.mxu3 %vm935_vm9, %v2248_v27  ;;  %v2243_v12 = vrot.slane %v2224_v0, 4  ;;  %v2241_v36 = vrot.slane %v2236_v55, 4 }
 0xae0   :  { %v2246_v45 = vsel %vm189_vm8, %v2245_v3, %v2228_v26  ;;  %v4022_v26 = vld [vmem:[%s5460_s2 + $0x6] ss:$0 sm:$0xff] }
 0xae1   :  { %v2244_v6 = vsel %vm189_vm8, %v2236_v55, %v2243_v12  ;;  %3839 = vmatmul.msk.f32.vlgmr.msra.gmra.mxu2 %vm935_vm9, %v2246_v45  ;;  %v2242_v28 = vsel %vm189_vm8, %v2241_v36, %v2224_v0 }
 0xae2   :  { %3837 = vmatmul.msk.f32.vlgmr.msra.gmra.mxu1 %vm935_vm9, %v2244_v6  ;;  %3835 = vmatmul.msk.f32.vlgmr.msrb.gmra.mxu0 %vm935_vm9, %v2242_v28 }
 0xb1e   :  { %v2800_v5 = vpop.f32.mrf.mxu0 }
 0xb1f   :  { %v5054_v57 = vadd.f32 %v4015_v42, %v2800_v5 }
 0xb21   :  { %v2826_v7 = vpop.f32.mrf.mxu2  ;;  %v2962_v43 = vsel %vm935_vm9, %v5054_v57, -inf }
 0xb22   :  { %v2827_v37 = vadd.f32 %v4016_v9, %v2826_v7  ;;  %2963 = vmax.xlane.f32.xlu1 %v2962_v43 }
 0xb23   :  { %v2774_v2 = vpop.f32.mrf.mxu3 }
 0xb24   :  { %v2775_v48 = vadd.f32 %v4017_v10, %v2774_v2  ;;  %v2965_v52 = vsel %vm935_vm9, %v2827_v37, -inf }
 0xb25   :  { %2966 = vmax.xlane.f32.xlu0 %v2965_v52 }
 0xb26   :  { %v2959_v18 = vsel %vm935_vm9, %v2775_v48, -inf }
 0xb27   :  { %2960 = vmax.xlane.f32.xlu2 %v2959_v18 }
 0xb2b   :  { %v2852_v4 = vpop.f32.mrf.mxu3 }
 0xb2c   :  { %v2853_v33 = vadd.f32 %v4021_v41, %v2852_v4 }
 0xb2e   :  { %v2968_v58 = vsel %vm935_vm9, %v2853_v33, -inf }
 0xb5f   :  { %v2904_v53 = vpop.f32.mrf.mxu1  ;;  %v2878_v56 = vpop.f32.mrf.mxu0 }
 0xb60   :  { %v5069_v46 = vadd.f32 %v4018_v59, %v2904_v53  ;;  %v2879_v40 = vadd.f32 %v4019_v22, %v2878_v56 }
 0xb62   :  { %v2956_v34 = vpop.f32.mrf.mxu3  ;;  %v2974_v61 = vsel %vm935_vm9, %v5069_v46, -inf  ;;  %v2971_v19 = vsel %vm935_vm9, %v2879_v40, -inf }
 0xb63   :  { %v2957_v51 = vadd.f32 %v4020_v63, %v2956_v34  ;;  %2975 = vmax.xlane.f32.xlu1 %v2974_v61  ;;  %2972 = vmax.xlane.f32.xlu0 %v2971_v19 }
 0xb64   :  { %v2930_v14 = vpop.f32.mrf.mxu2 }
 0xb65   :  { %v2980_v54 = vsel %vm935_vm9, %v2957_v51, -inf  ;;  %v2931_v35 = vadd.f32 %v4022_v26, %v2930_v14 }
 0xb66   :  { %2981 = vmax.xlane.f32.xlu2 %v2980_v54 }
 0xb67   :  { %v2977_v39 = vsel %vm935_vm9, %v2931_v35, -inf }
 0xb6b   :  { %2969 = vmax.xlane.f32.xlu1 %v2968_v58  ;;  %2978 = vmax.xlane.f32.xlu0 %v2977_v39 }
 0xb7e   :  { %3892 = vrot.lane.b32.xlu2 %v3891_v17, %s4032_s21 }
 0xb7f   :  { %3897 = vrot.lane.b32.xlu0 %v3896_v44, %s4032_s21 }
 0xb84   :  { %3902 = vrot.lane.b32.xlu1 %v3901_v29, %s4032_s21 }
 0xb87   :  { %3907 = vrot.lane.b32.xlu0 %v3906_v1, %s4032_s21 }
 0xb95   :  { %v2964_v44 = vpop.xlane.xlu1 %2963 }
 0xb96   :  { %v2984_v28 = vsub.f32 %v5054_v57, %v2964_v44 }
 0xb98   :  { %v2967_v15 = vpop.xlane.xlu0 %2966  ;;  %v2993_v7 = vmul.f32 1.442695, %v2984_v28 }
 0xb99   :  { %v2985_v30 = vsub.f32 %v2827_v37, %v2967_v15 }
 0xb9a   :  { %v2961_v20 = vpop.xlane.xlu2 %2960 }
 0xb9b   :  { %v2995_v11 = vmul.f32 1.442695, %v2985_v30  ;;  %v2983_v38 = vsub.f32 %v2775_v48, %v2961_v20 }
 0xb9d   :  { %3970 = vpow2.f32 %v2995_v11  ;;  %v2991_v32 = vmul.f32 1.442695, %v2983_v38 }
 0xb9f   :  { %3972 = vpow2.f32 %v2991_v32 }
 0xba3   :  { %v5103_v8 = vpop.eup %3970 }
 0xba4   :  { %v3013_v60 = vsel %vm935_vm9, %v5103_v8, 0.0 }
 0xba5   :  { %v5107_v23 = vpop.eup %3972 }
 0xba6   :  { %v3007_v24 = vsel %vm935_vm9, %v5107_v23, 0.0 }
 0xba7   :  { %3014 = vadd.xlane.f32.xlu2 %v3013_v60 }
 0xbae   :  { %3008 = vadd.xlane.f32.xlu1 %v3007_v24 }
 0xbd6   :  { %v2976_v62 = vpop.xlane.xlu1 %2975  ;;  %v2973_v50 = vpop.xlane.xlu0 %2972 }
 0xbd7   :  { %v2987_v25 = vsub.f32 %v2879_v40, %v2973_v50  ;;  %v2988_v43 = vsub.f32 %v5069_v46, %v2976_v62 }
 0xbd9   :  { %v2999_v1 = vmul.f32 1.442695, %v2987_v25  ;;  %v2982_v47 = vpop.xlane.xlu2 %2981  ;;  %v3001_v10 = vmul.f32 1.442695, %v2988_v43 }
 0xbda   :  { %v2990_v12 = vsub.f32 %v2957_v51, %v2982_v47 }
 0xbdb   :  { %3974 = vpow2.f32 %v2999_v1 }
 0xbdc   :  { %v3005_v42 = vmul.f32 1.442695, %v2990_v12 }
 0xbde   :  { %v2970_v0 = vpop.xlane.xlu1 %2969  ;;  %v2979_v55 = vpop.xlane.xlu0 %2978 }
 0xbdf   :  { %v2986_v27 = vsub.f32 %v2853_v33, %v2970_v0  ;;  %v2989_v3 = vsub.f32 %v2931_v35, %v2979_v55 }
 0xbe1   :  { %v2997_v36 = vmul.f32 1.442695, %v2986_v27  ;;  %v3003_v45 = vmul.f32 1.442695, %v2989_v3  ;;  %v5111_v6 = vpop.eup %3974  ;;  %v3893_v2 = vpop.permute.xlu2 %3892 }
 0xbe2   :  { %v3019_v5 = vsel %vm935_vm9, %v5111_v6, 0.0  ;;  %v3895_v52 = vunpack.i.h.bf16 %v3893_v2  ;;  %v3894_v18 = vunpack.i.l.bf16 %v3893_v2 }
 0xbe3   :  { %3976 = vpow2.f32 %v2997_v36  ;;  %3020 = vadd.xlane.f32.xlu1 %v3019_v5 }
 0xbe4   :  { %3978 = vpow2.f32 %v3003_v45  ;;  %v2545_v56 = vrot.slane %v3895_v52, 4  ;;  %v2533_v46 = vrot.slane %v3894_v18, 4 }
 0xbe5   :  { %3980 = vpow2.f32 %v3005_v42 }
 0xbe6   :  { %3982 = vpow2.f32 %v2993_v7 }
 0xbe7   :  { %3984 = vpow2.f32 %v3001_v10 }
 0xbe9   :  { %v5117_v9 = vpop.eup %3976 }
 0xbea   :  { %v5119_v37 = vpop.eup %3978  ;;  %v3016_v57 = vsel %vm935_vm9, %v5117_v9, 0.0 }
 0xbeb   :  { %3017 = vadd.xlane.f32.xlu0 %v3016_v57  ;;  %v3025_v48 = vsel %vm935_vm9, %v5119_v37, 0.0  ;;  %v5125_v4 = vpop.eup %3980 }
 0xbec   :  { %3026 = vadd.xlane.f32.xlu2 %v3025_v48  ;;  %v5127_v53 = vpop.eup %3982  ;;  %v3028_v34 = vsel %vm935_vm9, %v5125_v4, 0.0 }
 0xbed   :  { %v3010_v61 = vsel %vm935_vm9, %v5127_v53, 0.0  ;;  %v5135_v54 = vpop.eup %3984 }
 0xbee   :  { %v3022_v11 = vsel %vm935_vm9, %v5135_v54, 0.0 }
 0xbf1   :  { %v3898_v59 = vpop.permute.xlu0 %3897 }
 0xbf2   :  { %v3900_v22 = vunpack.i.h.bf16 %v3898_v59  ;;  %v3899_v40 = vunpack.i.l.bf16 %v3898_v59 }
 0xbf3   :  { %3029 = vadd.xlane.f32.xlu0 %v3028_v34 }
 0xbf4   :  { %v2543_v19 = vrot.slane %v3900_v22, 4  ;;  %v2546_v63 = vsel %vm189_vm8, %v3900_v22, %v2545_v56  ;;  %v2531_v51 = vrot.slane %v3899_v40, 4  ;;  %v2534_v14 = vsel %vm189_vm8, %v3899_v40, %v2533_v46  ;;  %3011 = vadd.xlane.f32.xlu2 %v3010_v61 }
 0xbf5   :  { %v2554_v41 = vperm.slane %v2546_v63, %v4195_v21  ;;  %v2542_v33 = vperm.slane %v2534_v14, %v4195_v21 }
 0xbf6   :  { %v2544_v26 = vsel %vm189_vm8, %v2543_v19, %v3895_v52  ;;  %v2532_v35 = vsel %vm189_vm8, %v2531_v51, %v3894_v18  ;;  %v3903_v58 = vpop.permute.xlu1 %3902 }
 0xbf7   :  { %v2550_v39 = vperm.slane %v2544_v26, %v4195_v21  ;;  %v2567_v17 = vrot.slane %v2554_v41, 4  ;;  %v2538_v29 = vperm.slane %v2532_v35, %v4195_v21  ;;  %v2569_v15 = vrot.slane %v2542_v33, 4 }
 0xbf8   :  { %v3905_v30 = vunpack.i.h.bf16 %v3903_v58  ;;  %v3904_v20 = vunpack.i.l.bf16 %v3903_v58 }
 0xbf9   :  { %v2555_v38 = vrot.slane %v2550_v39, 4  ;;  %v2557_v32 = vrot.slane %v2538_v29, 4  ;;  %v2568_v60 = vsel %vm189_vm8, %v2567_v17, %v2542_v33  ;;  %v2570_v24 = vsel %vm189_vm8, %v2554_v41, %v2569_v15  ;;  %v3908_v44 = vpop.permute.xlu0 %3907 }
 0xbfa   :  { %v2574_v62 = vperm.slane %v2568_v60, %v4201_v31  ;;  %v2578_v50 = vperm.slane %v2570_v24, %v4201_v31  ;;  %v2601_v25 = vrot.slane %v3905_v30, 4  ;;  %v2589_v1 = vrot.slane %v3904_v20, 4 }
 0xbfb   :  { %v2556_v47 = vsel %vm189_vm8, %v2555_v38, %v2538_v29  ;;  %v2558_v0 = vsel %vm189_vm8, %v2550_v39, %v2557_v32  ;;  %v3910_v55 = vunpack.i.h.bf16 %v3908_v44  ;;  %v3909_v27 = vunpack.i.l.bf16 %v3908_v44 }
 0xbfc   :  { %v2562_v3 = vperm.slane %v2556_v47, %v4201_v31  ;;  %v2566_v12 = vperm.slane %v2558_v0, %v4201_v31  ;;  %v2583_v36 = vrot.slane %v2574_v62, 4  ;;  %v2585_v45 = vrot.slane %v2578_v50, 4  ;;  %3023 = vadd.xlane.f32.xlu2 %v3022_v11 }
 0xbfd   :  { %v2599_v28 = vrot.slane %v3910_v55, 4  ;;  %v2587_v5 = vrot.slane %v3909_v27, 4  ;;  %v2590_v42 = vsel %vm189_vm8, %v3909_v27, %v2589_v1  ;;  %v2602_v7 = vsel %vm189_vm8, %v3910_v55, %v2601_v25 }
 0xbfe   :  { %v2579_v43 = vrot.slane %v2562_v3, 4  ;;  %v2581_v2 = vrot.slane %v2566_v12, 4  ;;  %v2584_v57 = vsel %vm189_vm8, 0.0, %v2583_v36  ;;  %v2586_v10 = vsel %vm189_vm8, 0.0, %v2585_v45 }
 0xbff   :  { %v2654_v48 = vsel %vm189_vm8, %v2585_v45, %v2574_v62  ;;  %v2659_v52 = vrot.slane %v2586_v10, 4  ;;  %v2588_v18 = vsel %vm189_vm8, %v2587_v5, %v3904_v20  ;;  %v2598_v56 = vperm.slane %v2590_v42, %v4195_v21 }
 0xc00   :  { %v2582_v59 = vsel %vm189_vm8, 0.0, %v2581_v2  ;;  %v2594_v46 = vperm.slane %v2588_v18, %v4195_v21  ;;  %v2600_v22 = vsel %vm189_vm8, %v2599_v28, %v3905_v30  ;;  %v2610_v40 = vperm.slane %v2602_v7, %v4195_v21 }
 0xc01   :  { %v2648_v34 = vrot.slane %v2582_v59, 4  ;;  %v2606_v61 = vperm.slane %v2600_v22, %v4195_v21  ;;  %v2625_v19 = vrot.slane %v2598_v56, 4  ;;  %v2580_v63 = vsel %vm189_vm8, 0.0, %v2579_v43 }
 0xc02   :  { %v2613_v51 = vrot.slane %v2594_v46, 4  ;;  %v2623_v14 = vrot.slane %v2610_v40, 4  ;;  %v2643_v41 = vsel %vm189_vm8, %v2581_v2, %v2562_v3  ;;  %v2658_v33 = vperm.slane %v2654_v48, %v4195_v21 }
 0xc03   :  { %v2611_v26 = vrot.slane %v2606_v61, 4  ;;  %v2626_v35 = vsel %vm189_vm8, %v2610_v40, %v2625_v19  ;;  %v2647_v58 = vperm.slane %v2643_v41, %v4195_v21  ;;  %v2649_v39 = vsel %vm189_vm8, %v2648_v34, %v2580_v63 }
 0xc04   :  { %v2614_v17 = vsel %vm189_vm8, %v2606_v61, %v2613_v51  ;;  %v2624_v29 = vsel %vm189_vm8, %v2623_v14, %v2598_v56  ;;  %v2634_v15 = vperm.slane %v2626_v35, %v4201_v31  ;;  %v2653_v30 = vperm.slane %v2649_v39, %v4195_v21 }
 0xc05   :  { %v2612_v20 = vsel %vm189_vm8, %v2611_v26, %v2594_v46  ;;  %v2622_v11 = vperm.slane %v2614_v17, %v4201_v31  ;;  %v2630_v38 = vperm.slane %v2624_v29, %v4201_v31  ;;  %v2660_v32 = vsel %vm189_vm8, %v2659_v52, %v2584_v57 }
 0xc06   :  { %v2618_v60 = vperm.slane %v2612_v20, %v4201_v31  ;;  %v2641_v24 = vrot.slane %v2634_v15, 4  ;;  %v2664_v44 = vperm.slane %v2660_v32, %v4195_v21  ;;  %v2667_v62 = vrot.slane %v2647_v58, 4 }
 0xc07   :  { %v2637_v50 = vrot.slane %v2622_v11, 4  ;;  %v2639_v25 = vrot.slane %v2630_v38, 4  ;;  %v2679_v1 = vrot.slane %v2658_v33, 4  ;;  %v2665_v47 = vrot.slane %v2653_v30, 4 }
 0xc08   :  { %v2635_v0 = vrot.slane %v2618_v60, 4  ;;  %v2642_v55 = vsel %vm189_vm8, 0.0, %v2641_v24  ;;  %v2708_v27 = vsel %vm189_vm8, %v2641_v24, %v2630_v38  ;;  %v2668_v3 = vsel %vm189_vm8, %v2653_v30, %v2667_v62 }
 0xc09   :  { %v2638_v12 = vsel %vm189_vm8, 0.0, %v2637_v50  ;;  %v2640_v36 = vsel %vm189_vm8, 0.0, %v2639_v25  ;;  %v2713_v45 = vrot.slane %v2642_v55, 4  ;;  %v2676_v28 = vperm.slane %v2668_v3, %v4201_v31 }
 0xc0a   :  { %v2702_v5 = vrot.slane %v2638_v12, 4  ;;  %v2680_v42 = vsel %vm189_vm8, %v2664_v44, %v2679_v1  ;;  %v2666_v7 = vsel %vm189_vm8, %v2665_v47, %v2647_v58  ;;  %v2677_v43 = vrot.slane %v2664_v44, 4 }
 0xc0b   :  { %v2688_v2 = vperm.slane %v2680_v42, %v4201_v31  ;;  %v2672_v57 = vperm.slane %v2666_v7, %v4201_v31  ;;  %v2695_v10 = vrot.slane %v2676_v28, 4  ;;  %v2636_v48 = vsel %vm189_vm8, 0.0, %v2635_v0 }
 0xc0c   :  { %v2678_v52 = vsel %vm189_vm8, %v2677_v43, %v2658_v33  ;;  %v2697_v18 = vsel %vm189_vm8, %v2637_v50, %v2618_v60  ;;  %v2703_v56 = vsel %vm189_vm8, %v2702_v5, %v2636_v48  ;;  %v2712_v59 = vperm.slane %v2708_v27, %v4195_v21 }
 0xc0d   :  { %v2693_v46 = vrot.slane %v2688_v2, 4  ;;  %v2684_v22 = vperm.slane %v2678_v52, %v4201_v31  ;;  %v2696_v40 = vsel %vm189_vm8, %v2688_v2, %v2695_v10  ;;  %v2691_v34 = vrot.slane %v2672_v57, 4 }
 0xc0e   :  { %3134 = vmatpush.msrb.mxu3 %v2696_v40  ;;  %v2701_v61 = vperm.slane %v2697_v18, %v4195_v21  ;;  %v2707_v19 = vperm.slane %v2703_v56, %v4195_v21  ;;  %v2714_v63 = vsel %vm189_vm8, %v2713_v45, %v2640_v36  ;;  %v2733_v51 = vrot.slane %v2712_v59, 4 }
 0xc0f   :  { %v2694_v14 = vsel %vm189_vm8, %v2693_v46, %v2676_v28  ;;  %v2689_v41 = vrot.slane %v2684_v22, 4  ;;  %v2692_v33 = vsel %vm189_vm8, %v2684_v22, %v2691_v34  ;;  %v2718_v26 = vperm.slane %v2714_v63, %v4195_v21 }
 0xc10   :  { %3111 = vmatpush.msrb.mxu2 %v2694_v14  ;;  %3088 = vmatpush.msrb.mxu1 %v2692_v33  ;;  %v2721_v35 = vrot.slane %v2701_v61, 4  ;;  %v2719_v58 = vrot.slane %v2707_v19, 4 }
 0xc11   :  { %v2690_v39 = vsel %vm189_vm8, %v2689_v41, %v2672_v57  ;;  %v2734_v17 = vsel %vm189_vm8, %v2718_v26, %v2733_v51  ;;  %v2731_v29 = vrot.slane %v2718_v26, 4 }
 0xc12   :  { %3065 = vmatpush.msra.mxu0 %v2690_v39  ;;  %v2722_v15 = vsel %vm189_vm8, %v2707_v19, %v2721_v35  ;;  %v2742_v30 = vperm.slane %v2734_v17, %v4201_v31  ;;  %v2720_v20 = vsel %vm189_vm8, %v2719_v58, %v2701_v61 }
 0xc13   :  { %v2730_v11 = vperm.slane %v2722_v15, %v4201_v31  ;;  %v2726_v38 = vperm.slane %v2720_v20, %v4201_v31  ;;  %v2732_v32 = vsel %vm189_vm8, %v2731_v29, %v2712_v59 }
 0xc14   :  { %v2747_v60 = vrot.slane %v2742_v30, 4  ;;  %v2738_v24 = vperm.slane %v2732_v32, %v4201_v31 }
 0xc15   :  { %v2749_v44 = vrot.slane %v2730_v11, 4  ;;  %v2745_v62 = vrot.slane %v2726_v38, 4 }
 0xc16   :  { %v2748_v50 = vsel %vm189_vm8, %v2747_v60, %v2730_v11  ;;  %v2743_v25 = vrot.slane %v2738_v24, 4 }
 0xc17   :  { %3203 = vmatpush.msra.mxu2 %v2748_v50  ;;  %v2750_v1 = vsel %vm189_vm8, %v2742_v30, %v2749_v44  ;;  %v2746_v47 = vsel %vm189_vm8, %v2738_v24, %v2745_v62 }
 0xc18   :  { %v2744_v0 = vsel %vm189_vm8, %v2743_v25, %v2726_v38  ;;  %3226 = vmatpush.msra.mxu3 %v2750_v1  ;;  %3180 = vmatpush.msra.mxu1 %v2746_v47 }
 0xc19   :  { %3157 = vmatpush.msrb.mxu0 %v2744_v0 }
 0xc1a   :  { %v3015_v55 = vpop.xlane.xlu2 %3014 }
 0xc1b   :  { %3986 = vrcp.f32 %v3015_v55 }
 0xc21   :  { %v3987_v27 = vpop.eup %3986  ;;  %v3009_v3 = vpop.xlane.xlu1 %3008 }
 0xc22   :  { %v3041_v12 = vmul.f32 %v3987_v27, %v5103_v8  ;;  %3988 = vrcp.f32 %v3009_v3 }
 0xc24   :  { %3844 = vmatmul.msk.f32.vlgmr.msrb.gmra.mxu2 %vm935_vm9, %v3041_v12 }
 0xc28   :  { %v3989_v36 = vpop.eup %3988 }
 0xc29   :  { %v3039_v45 = vmul.f32 %v3989_v36, %v5107_v23 }
 0xc2b   :  { %3842 = vmatmul.msk.f32.vlgmr.msra.gmra.mxu0 %vm935_vm9, %v3039_v45 }
 0xc56   :  { %v3021_v28 = vpop.xlane.xlu1 %3020 }
 0xc57   :  { %3990 = vrcp.f32 %v3021_v28 }
 0xc5d   :  { %v3991_v5 = vpop.eup %3990 }
 0xc5e   :  { %v3018_v42 = vpop.xlane.xlu0 %3017  ;;  %v3043_v7 = vmul.f32 %v3991_v5, %v5111_v6 }
 0xc5f   :  { %3992 = vrcp.f32 %v3018_v42  ;;  %v3027_v43 = vpop.xlane.xlu2 %3026 }
 0xc60   :  { %3994 = vrcp.f32 %v3027_v43  ;;  %3846 = vmatmul.msk.f32.vlgmr.msrb.gmra.mxu0 %vm935_vm9, %v3043_v7 }
 0xc65   :  { %v3993_v8 = vpop.eup %3992 }
 0xc66   :  { %v3995_v2 = vpop.eup %3994  ;;  %v3042_v57 = vmul.f32 %v3993_v8, %v5117_v9  ;;  %v3030_v10 = vpop.xlane.xlu0 %3029 }
 0xc67   :  { %v3045_v23 = vmul.f32 %v3995_v2, %v5119_v37  ;;  %3996 = vrcp.f32 %v3030_v10  ;;  %v3012_v48 = vpop.xlane.xlu2 %3011 }
 0xc68   :  { %3998 = vrcp.f32 %v3012_v48  ;;  %3845 = vmatmul.msk.f32.vlgmr.msrb.gmra.mxu3 %vm935_vm9, %v3042_v57 }
 0xc69   :  { %3848 = vmatmul.msk.f32.vlgmr.msra.gmra.mxu2 %vm935_vm9, %v3045_v23 }
 0xc6d   :  { %v3997_v6 = vpop.eup %3996 }
 0xc6e   :  { %v3999_v52 = vpop.eup %3998  ;;  %v3046_v18 = vmul.f32 %v3997_v6, %v5125_v4 }
 0xc6f   :  { %v3040_v56 = vmul.f32 %v3999_v52, %v5127_v53  ;;  %v3024_v59 = vpop.xlane.xlu2 %3023 }
 0xc70   :  { %4000 = vrcp.f32 %v3024_v59  ;;  %3849 = vmatmul.msk.f32.vlgmr.msra.gmra.mxu3 %vm935_vm9, %v3046_v18 }
 0xc71   :  { %3843 = vmatmul.msk.f32.vlgmr.msrb.gmra.mxu1 %vm935_vm9, %v3040_v56 }
 0xc76   :  { %v4001_v9 = vpop.eup %4000 }
 0xc77   :  { %v3044_v37 = vmul.f32 %v4001_v9, %v5135_v54 }
 0xc79   :  { %3847 = vmatmul.msk.f32.vlgmr.msra.gmra.mxu1 %vm935_vm9, %v3044_v37 }
 0xca7   :  { %v3113_v22 = vpop.f32.mrf.mxu2 }
 0xca8   :  { %v3067_v46 = vpop.f32.mrf.mxu0  ;;  %v3231_v40 = vrot.slane %v3113_v22, 4 }
 0xca9   :  { %v3233_v34 = vrot.slane %v3067_v46, 4 }
 0xcaa   :  { %v3232_v61 = vsel %vm189_vm8, %v3231_v40, %v3067_v46 }
 0xcab   :  { %v3234_v53 = vsel %vm189_vm8, %v3113_v22, %v3233_v34  ;;  %v3238_v63 = vperm.slane %v3232_v61, %v4195_v21 }
 0xcac   :  { %v3242_v41 = vperm.slane %v3234_v53, %v4195_v21 }
 0xcad   :  { %v3257_v29 = vrot.slane %v3238_v63, 4 }
 0xcae   :  { %v3269_v30 = vrot.slane %v3242_v41, 4 }
 0xcdd   :  { %v3159_v4 = vpop.f32.mrf.mxu0 }
 0xcde   :  { %v3289_v51 = vrot.slane %v3159_v4, 4 }
 0xceb   :  { %v3136_v19 = vpop.f32.mrf.mxu3 }
 0xcec   :  { %v3205_v14 = vpop.f32.mrf.mxu2  ;;  %v3243_v33 = vrot.slane %v3136_v19, 4 }
 0xced   :  { %v3287_v54 = vrot.slane %v3205_v14, 4  ;;  %v3290_v26 = vsel %vm189_vm8, %v3205_v14, %v3289_v51 }
 0xcee   :  { %v3090_v35 = vpop.f32.mrf.mxu1  ;;  %v3298_v20 = vperm.slane %v3290_v26, %v4195_v21 }
 0xcef   :  { %v3288_v58 = vsel %vm189_vm8, %v3287_v54, %v3159_v4  ;;  %v3244_v39 = vsel %vm189_vm8, %v3243_v33, %v3090_v35  ;;  %v3245_v17 = vrot.slane %v3090_v35, 4 }
 0xcf0   :  { %v3250_v15 = vperm.slane %v3244_v39, %v4195_v21  ;;  %v3294_v38 = vperm.slane %v3288_v58, %v4195_v21  ;;  %v3325_v3 = vrot.slane %v3298_v20, 4 }
 0xcf1   :  { %v3246_v11 = vsel %vm189_vm8, %v3136_v19, %v3245_v17 }
 0xcf2   :  { %v3254_v32 = vperm.slane %v3246_v11, %v4195_v21  ;;  %v3255_v60 = vrot.slane %v3250_v15, 4  ;;  %v3258_v24 = vsel %vm189_vm8, %v3250_v15, %v3257_v29  ;;  %v3313_v27 = vrot.slane %v3294_v38, 4 }
 0xcf3   :  { %v3266_v44 = vperm.slane %v3258_v24, %v4201_v31  ;;  %v3228_v62 = vpop.f32.mrf.mxu3 }
 0xcf4   :  { %v3256_v50 = vsel %vm189_vm8, %v3255_v60, %v3238_v63  ;;  %v3267_v25 = vrot.slane %v3254_v32, 4  ;;  %v3270_v1 = vsel %vm189_vm8, %v3254_v32, %v3269_v30  ;;  %v3299_v36 = vrot.slane %v3228_v62, 4 }
 0xcf5   :  { %v3262_v47 = vperm.slane %v3256_v50, %v4201_v31  ;;  %v3278_v0 = vperm.slane %v3270_v1, %v4201_v31  ;;  %v3281_v55 = vrot.slane %v3266_v44, 4 }
 0xcf6   :  { %v3268_v12 = vsel %vm189_vm8, %v3267_v25, %v3242_v41  ;;  %v3182_v45 = vpop.f32.mrf.mxu1 }
 0xcf7   :  { %v3274_v28 = vperm.slane %v3268_v12, %v4201_v31  ;;  %v3279_v5 = vrot.slane %v3262_v47, 4  ;;  %v3282_v42 = vsel %vm189_vm8, 0.0, %v3281_v55  ;;  %v3285_v7 = vrot.slane %v3278_v0, 4 }
 0xcf8   :  { %v3343_v43 = vsel %vm189_vm8, %v3281_v55, %v3262_v47  ;;  %v3348_v8 = vrot.slane %v3282_v42, 4  ;;  %v3300_v2 = vsel %vm189_vm8, %v3299_v36, %v3182_v45  ;;  %v3301_v57 = vrot.slane %v3182_v45, 4 }
 0xcf9   :  { %v3280_v10 = vsel %vm189_vm8, 0.0, %v3279_v5  ;;  %v3283_v23 = vrot.slane %v3274_v28, 4  ;;  %v3286_v48 = vsel %vm189_vm8, 0.0, %v3285_v7  ;;  %v3347_v6 = vperm.slane %v3343_v43, %v4195_v21 }
 0xcfa   :  { %v3359_v52 = vrot.slane %v3286_v48, 4  ;;  %v3302_v18 = vsel %vm189_vm8, %v3228_v62, %v3301_v57  ;;  %v3306_v56 = vperm.slane %v3300_v2, %v4195_v21  ;;  %v3349_v59 = vsel %vm189_vm8, %v3348_v8, %v3280_v10 }
 0xcfb   :  { %v3310_v9 = vperm.slane %v3302_v18, %v4195_v21  ;;  %v3284_v37 = vsel %vm189_vm8, 0.0, %v3283_v23  ;;  %v3353_v46 = vperm.slane %v3349_v59, %v4195_v21  ;;  %v3354_v22 = vsel %vm189_vm8, %v3285_v7, %v3274_v28 }
 0xcfc   :  { %v3311_v40 = vrot.slane %v3306_v56, 4  ;;  %v3314_v34 = vsel %vm189_vm8, %v3306_v56, %v3313_v27  ;;  %v3358_v61 = vperm.slane %v3354_v22, %v4195_v21  ;;  %v3360_v4 = vsel %vm189_vm8, %v3359_v52, %v3284_v37 }
 0xcfd   :  { %v3322_v53 = vperm.slane %v3314_v34, %v4201_v31  ;;  %v3323_v19 = vrot.slane %v3310_v9, 4  ;;  %v3326_v63 = vsel %vm189_vm8, %v3310_v9, %v3325_v3  ;;  %v3364_v51 = vperm.slane %v3360_v4, %v4195_v21 }
 0xcfe   :  { %v3312_v14 = vsel %vm189_vm8, %v3311_v40, %v3294_v38  ;;  %v3334_v41 = vperm.slane %v3326_v63, %v4201_v31  ;;  %v3367_v33 = vrot.slane %v3347_v6, 4  ;;  %v3379_v54 = vrot.slane %v3358_v61, 4 }
 0xcff   :  { %v3318_v26 = vperm.slane %v3312_v14, %v4201_v31  ;;  %v3324_v35 = vsel %vm189_vm8, %v3323_v19, %v3298_v20  ;;  %v3337_v58 = vrot.slane %v3322_v53, 4  ;;  %v3365_v39 = vrot.slane %v3353_v46, 4 }
 0xd00   :  { %v3330_v17 = vperm.slane %v3324_v35, %v4201_v31  ;;  %v3341_v29 = vrot.slane %v3334_v41, 4  ;;  %v3368_v15 = vsel %vm189_vm8, %v3353_v46, %v3367_v33  ;;  %v3380_v30 = vsel %vm189_vm8, %v3364_v51, %v3379_v54  ;;  %v3809_v54 = vld [vmem:[%s5461_s5 + $0x30] sm:$0xff]  ;;  %v3807_v35 = vld [vmem:[%s5461_s5 + $0x20] sm:$0xff] }
 0xd01   :  { %v3335_v11 = vrot.slane %v3318_v26, 4  ;;  %v3338_v38 = vsel %vm189_vm8, 0.0, %v3337_v58  ;;  %v3397_v32 = vsel %vm189_vm8, %v3337_v58, %v3318_v26  ;;  %v3376_v60 = vperm.slane %v3368_v15, %v4201_v31  ;;  %v3808_v26 = vld [vmem:[%s5461_s5 + $0x28] sm:$0xff] }
 0xd02   :  { %v3339_v24 = vrot.slane %v3330_v17, 4  ;;  %v3342_v44 = vsel %vm189_vm8, 0.0, %v3341_v29  ;;  %v3402_v20 = vrot.slane %v3338_v38, 4  ;;  %v3388_v62 = vperm.slane %v3380_v30, %v4201_v31 }
 0xd03   :  { %v3336_v50 = vsel %vm189_vm8, 0.0, %v3335_v11  ;;  %v3413_v25 = vrot.slane %v3342_v44, 4  ;;  %v3395_v1 = vrot.slane %v3376_v60, 4  ;;  %v3366_v47 = vsel %vm189_vm8, %v3365_v39, %v3347_v6 }
 0xd04   :  { %v3393_v0 = vrot.slane %v3388_v62, 4  ;;  %v3372_v55 = vperm.slane %v3366_v47, %v4201_v31  ;;  %v3377_v27 = vrot.slane %v3364_v51, 4  ;;  %v3340_v3 = vsel %vm189_vm8, 0.0, %v3339_v24 }
 0xd05   :  { %v3396_v12 = vsel %vm189_vm8, %v3388_v62, %v3395_v1  ;;  %v3401_v36 = vperm.slane %v3397_v32, %v4195_v21  ;;  %v3403_v45 = vsel %vm189_vm8, %v3402_v20, %v3336_v50  ;;  %v3408_v28 = vsel %vm189_vm8, %v3341_v29, %v3330_v17  ;;  %v5342_v20 = vld [vmem:[%s5459_s8 + $0x8] sm:$0xff] }
 0xd06   :  { %3469 = vrot.lane.b32.xlu2 %v3396_v12, %s4034_s3  ;;  %v3394_v5 = vsel %vm189_vm8, %v3393_v0, %v3376_v60  ;;  %v3378_v42 = vsel %vm189_vm8, %v3377_v27, %v3358_v61  ;;  %v3391_v7 = vrot.slane %v3372_v55, 4  ;;  %v3407_v43 = vperm.slane %v3403_v45, %v4195_v21 }
 0xd07   :  { %3461 = vrot.lane.b32.xlu1 %v3394_v5, %s4033_s24  ;;  %v3384_v8 = vperm.slane %v3378_v42, %v4201_v31  ;;  %v3412_v2 = vperm.slane %v3408_v28, %v4195_v21  ;;  %v3414_v57 = vsel %vm189_vm8, %v3413_v25, %v3340_v3  ;;  %v3421_v10 = vrot.slane %v3401_v36, 4 }
 0xd08   :  { %v3418_v23 = vperm.slane %v3414_v57, %v4195_v21  ;;  %v3419_v48 = vrot.slane %v3407_v43, 4  ;;  %v3481_v62 = vperm.slane %v5342_v20, 1  ;;  %v3814_v57 = vld [vmem:[%s5462_s6 + $0x38] sm:$0xff] }
 0xd09   :  { %v3389_v6 = vrot.slane %v3384_v8, 4  ;;  %v3392_v52 = vsel %vm189_vm8, %v3384_v8, %v3391_v7  ;;  %v3433_v18 = vrot.slane %v3412_v2, 4  ;;  %v3422_v9 = vsel %vm189_vm8, %v3407_v43, %v3421_v10  ;;  %3582 = vmatpush.msrb.mxu1 %v3814_v57  ;;  %v3819_v57 = vld [vmem:[%s5463_s7 + $0x60] sm:$0xff] }
 0xd0a   :  { %3453 = vrot.lane.b32.xlu0 %v3392_v52, %s4035_s25  ;;  %v3420_v56 = vsel %vm189_vm8, %v3419_v48, %v3401_v36  ;;  %v3431_v59 = vrot.slane %v3418_v23, 4  ;;  %v3430_v4 = vperm.slane %v3422_v9, %v4201_v31  ;;  %v3812_v48 = vld [vmem:[%s5462_s6 + $0x28] sm:$0xff] }
 0xd0b   :  { %v3434_v37 = vsel %vm189_vm8, %v3418_v23, %v3433_v18  ;;  %v3426_v46 = vperm.slane %v3420_v56, %v4201_v31  ;;  %v3390_v22 = vsel %vm189_vm8, %v3389_v6, %v3372_v55  ;;  %v3813_v23 = vld [vmem:[%s5462_s6 + $0x30] sm:$0xff]  ;;  %v3811_v6 = vld [vmem:[%s5462_s6 + $0x20] sm:$0xff] }
 0xd0c   :  { %v3442_v21 = vperm.slane %v3434_v37, %v4201_v31  ;;  %v3432_v40 = vsel %vm189_vm8, %v3431_v59, %v3412_v2  ;;  %v3449_v41 = vrot.slane %v3430_v4, 4  ;;  %3583 = vmatpush.msrb.mxu1 %v3813_v23 }
 0xd0d   :  { %v3438_v34 = vperm.slane %v3432_v40, %v4201_v31  ;;  %v3445_v61 = vrot.slane %v3426_v46, 4  ;;  %v3810_v31 = vld [vmem:[%s5461_s5 + $0x38] sm:$0xff]  ;;  %v3557_v40 = vperm.slane %v5342_v20, 4 }
 0xd0e   :  { %v3447_v53 = vrot.slane %v3442_v21, 4  ;;  %v3450_v33 = vsel %vm189_vm8, %v3442_v21, %v3449_v41  ;;  %3500 = vmatpush.msra.mxu0 %v3810_v31  ;;  %3584 = vmatpush.msrb.mxu1 %v3812_v48 }
 0xd0f   :  { %v3443_v19 = vrot.slane %v3438_v34, 4  ;;  %v3446_v63 = vsel %vm189_vm8, %v3438_v34, %v3445_v61 }
 0xd10   :  { %v3448_v51 = vsel %vm189_vm8, %v3447_v53, %v3430_v4  ;;  %3501 = vmatpush.msra.mxu0 %v3809_v54  ;;  %3585 = vmatpush.msrb.mxu1 %v3811_v6  ;;  %v3560_v4 = vperm.slane %v5342_v20, 5 }
 0xd11   :  { %3463 = vrot.lane.b32.xlu1 %v3448_v51, %s4033_s24  ;;  %v3444_v14 = vsel %vm189_vm8, %v3443_v19, %v3426_v46 }
 0xd12   :  { %3455 = vrot.lane.b32.xlu0 %v3446_v63, %s4035_s25  ;;  %3502 = vmatpush.msra.mxu0 %v3808_v26 }
 0xd14   :  { %3503 = vmatpush.msra.mxu0 %v3807_v35 }
 0xd1a   :  { %3471 = vrot.lane.b32.xlu0 %v3450_v33, %s4034_s3 }
 0xd60   :  { %v3470_v29 = vpop.permute.xlu2 %3469 }
 0xd79   :  { %v3462_v58 = vpop.permute.xlu1 %3461 }
 0xd7c   :  { %v3454_v39 = vpop.permute.xlu0 %3453 }
 0xd7d   :  { %v3475_v17 = vsel %vm935_vm9, %v3390_v22, %v3454_v39  ;;  %v3563_v39 = vperm.slane %v5342_v20, 2 }
 0xd7e   :  { %v3477_v15 = vsel %vm1662_vm10, %v3475_v17, %v3462_v58 }
 0xd7f   :  { %v3479_v30 = vsel %vm1665_vm11, %v3477_v15, %v3470_v29 }
 0xd80   :  { %3850 = vmatmul.msk.f32.vlgmr.msra.gmra.mxu0 %vm45_vm0, %v3479_v30 }
 0xd83   :  { %v3464_v38 = vpop.permute.xlu1 %3463 }
 0xd84   :  { %v3456_v11 = vpop.permute.xlu0 %3455 }
 0xd85   :  { %v3476_v32 = vsel %vm935_vm9, %v3444_v14, %v3456_v11 }
 0xd86   :  { %v3478_v24 = vsel %vm1662_vm10, %v3476_v32, %v3464_v38 }
 0xd8c   :  { %v3472_v60 = vpop.permute.xlu0 %3471 }
 0xd8d   :  { %v3480_v44 = vsel %vm1665_vm11, %v3478_v24, %v3472_v60 }
 0xd8e   :  { %3851 = vmatmul.msk.f32.gmra.mxu0 %vm45_vm0, %v3480_v44 }
 0xdfd   :  { %v3505_v50 = vpop.f32.mrf.mxu0 }
 0xdfe   :  { %v3506_v25 = vadd.f32 %v3505_v50, %v3481_v62 }
 0xe00   :  { %v3511_v1 = vadd.f32 %v3506_v25, %v4800_v49 }
 0xe02   :  { %v3513_v47 = vsel %vm45_vm0, %v3511_v1, 0.0 }
 0xe03   :  { %3514 = vadd.xlane.f32.xlu2 %v3513_v47 }
 0xe0b   :  { %v3508_v0 = vpop.f32.mrf.mxu0 }
 0xe0c   :  { %v3509_v55 = vadd.f32 %v3508_v0, %v3481_v62 }
 0xe0e   :  { %v3512_v27 = vadd.f32 %v3509_v55, %v4805_v16 }
 0xe10   :  { %v3516_v3 = vsel %vm45_vm0, %v3512_v27, 0.0 }
 0xe11   :  { %3517 = vadd.xlane.f32.xlu1 %v3516_v3 }
 0xe76   :  { %v3515_v12 = vpop.xlane.xlu2 %3514 }
 0xe77   :  { %v3519_v36 = vmul.f32 %v3515_v12, %v4100_v13 }
 0xe79   :  { %v3521_v45 = vsub.f32 %v3511_v1, %v3519_v36  ;;  %v3822_v36 = vld [vmem:[%s5463_s7 + $0x78] sm:$0xff] }
 0xe7a   :  { %3696 = vmatpush.msrb.mxu2 %v3822_v36 }
 0xe7b   :  { %v3523_v28 = vmul.f32 %v3521_v45, %v3521_v45 }
 0xe7d   :  { %v3525_v5 = vsel %vm45_vm0, %v3523_v28, 0.0 }
 0xe7e   :  { %3526 = vadd.xlane.f32.xlu0 %v3525_v5  ;;  %v3821_v5 = vld [vmem:[%s5463_s7 + $0x70] sm:$0xff] }
 0xe7f   :  { %3697 = vmatpush.msrb.mxu2 %v3821_v5 }
 0xe84   :  { %v3518_v42 = vpop.xlane.xlu1 %3517 }
 0xe85   :  { %v3520_v49 = vmul.f32 %v3518_v42, %v4100_v13 }
 0xe87   :  { %v3522_v7 = vsub.f32 %v3512_v27, %v3520_v49 }
 0xe89   :  { %v3524_v43 = vmul.f32 %v3522_v7, %v3522_v7 }
 0xe8b   :  { %v3528_v8 = vsel %vm45_vm0, %v3524_v43, 0.0 }
 0xe8c   :  { %3529 = vadd.xlane.f32.xlu2 %v3528_v8  ;;  %v3820_v8 = vld [vmem:[%s5463_s7 + $0x68] sm:$0xff] }
 0xe8d   :  { %3698 = vmatpush.msrb.mxu2 %v3820_v8 }
 0xe8f   :  { %3699 = vmatpush.msrb.mxu2 %v3819_v57 }
 0xef1   :  { %v3527_v16 = vpop.xlane.xlu0 %3526 }
 0xef2   :  { %v3531_v2 = vmul.f32 %v3527_v16, %v4100_v13 }
 0xef4   :  { %v3533_v10 = vadd.f32 1e-05, %v3531_v2 }
 0xef6   :  { %4002 = vrsqrt.f32 %v3533_v10  ;;  %vm3541_vm9 = vweird.f32 %v3533_v10 }
 0xefc   :  { %v4003_v52 = vpop.eup %4002 }
 0xefd   :  { %v3536_v18 = vmul.f32 %v4003_v52, %v3533_v10  ;;  %vm3542_vm8 = vweird.f32 %v4003_v52 }
 0xefe   :  { %vm3543_vm10 = vmor %vm3541_vm9, %vm3542_vm8 }
 0xeff   :  { %v3537_v56 = vmul.f32 %v4003_v52, %v3536_v18  ;;  %v3530_v59 = vpop.xlane.xlu2 %3529 }
 0xf00   :  { %v3532_v9 = vmul.f32 %v3530_v59, %v4100_v13 }
 0xf01   :  { %v3538_v37 = vmul.f32 0.5, %v3537_v56  ;;  %v3817_v56 = vld [vmem:[%s5463_s7 + $0x50] sm:$0xff] }
 0xf02   :  { %v3534_v46 = vadd.f32 1e-05, %v3532_v9  ;;  %v3816_v9 = vld [vmem:[%s5463_s7 + $0x48] sm:$0xff] }
 0xf03   :  { %v3539_v22 = vsub.f32 1.5, %v3538_v37 }
 0xf04   :  { %4004 = vrsqrt.f32 %v3534_v46  ;;  %vm3551_vm12 = vweird.f32 %v3534_v46 }
 0xf05   :  { %v3540_v21 = vmul.f32 %v4003_v52, %v3539_v22 }
 0xf07   :  { %v3544_v34 = vsel %vm3543_vm10, %v4003_v52, %v3540_v21  ;;  %v3818_v52 = vld [vmem:[%s5463_s7 + $0x58] sm:$0xff]  ;;  %v3815_v21 = vld [vmem:[%s5463_s7 + $0x40] sm:$0xff] }
 0xf08   :  { %v3555_v61 = vmul.f32 %v3544_v34, %v3521_v45  ;;  %3700 = vmatpush.msrb.mxu2 %v3818_v52 }
 0xf0a   :  { %v4005_v53 = vpop.eup %4004  ;;  %v3558_v19 = vmul.f32 %v3557_v40, %v3555_v61  ;;  %3701 = vmatpush.msrb.mxu2 %v3817_v56 }
 0xf0b   :  { %v3546_v63 = vmul.f32 %v4005_v53, %v3534_v46  ;;  %vm3552_vm11 = vweird.f32 %v4005_v53 }
 0xf0c   :  { %v5369_v51 = vadd.f32 %v3560_v4, %v3558_v19  ;;  %vm3553_vm13 = vmor %vm3551_vm12, %vm3552_vm11  ;;  %3702 = vmatpush.msrb.mxu2 %v3816_v9 }
 0xf0d   :  { %v3547_v14 = vmul.f32 %v4005_v53, %v3546_v63 }
 0xf0e   :  { %3852 = vmatmul.msk.f32.vlgmr.msrb.gmra.mxu1 %vm45_vm0, %v5369_v51  ;;  %3703 = vmatpush.msrb.mxu2 %v3815_v21 }
 0xf0f   :  { %v3548_v41 = vmul.f32 0.5, %v3547_v14 }
 0xf11   :  { %v3549_v33 = vsub.f32 1.5, %v3548_v41 }
 0xf13   :  { %v3550_v31 = vmul.f32 %v4005_v53, %v3549_v33 }
 0xf15   :  { %v3554_v54 = vsel %vm3553_vm13, %v4005_v53, %v3550_v31 }
 0xf16   :  { %v3556_v26 = vmul.f32 %v3554_v54, %v3522_v7 }
 0xf18   :  { %v3559_v35 = vmul.f32 %v3557_v40, %v3556_v26 }
 0xf1a   :  { %v5373_v58 = vadd.f32 %v3560_v4, %v3559_v35 }
 0xf1c   :  { %3853 = vmatmul.msk.f32.gmra.mxu1 %vm45_vm0, %v5373_v58 }
 0xf8b   :  { %v3587_v17 = vpop.f32.mrf.mxu1 }
 0xf8c   :  { %v5378_v29 = vadd.f32 %v3587_v17, %v3563_v39 }
 0xf8e   :  { %v5381_v15 = vmul.f32 0.70710677, %v5378_v29 }
 0xf90   :  { %v3597_v30 = vmul.f32 %v5381_v15, %v5381_v15 }
 0xf92   :  { %v3598_v11 = vmin.f32 %v3597_v30, 16.0 }
 0xf94   :  { %v3599_v38 = vmul.f32 2.1237322e-06, %v3598_v11  ;;  %v3610_v32 = vmul.f32 3.8918573e-05, %v3598_v11 }
 0xf96   :  { %v3600_v60 = vadd.f32 0.00028619796, %v3599_v38  ;;  %v3611_v24 = vadd.f32 0.001143296, %v3610_v32 }
 0xf98   :  { %v3601_v44 = vmul.f32 %v3600_v60, %v3598_v11  ;;  %v3612_v62 = vmul.f32 %v3611_v24, %v3598_v11 }
 0xf99   :  { %v3590_v50 = vpop.f32.mrf.mxu1 }
 0xf9a   :  { %v3602_v25 = vadd.f32 0.0036580483, %v3601_v44  ;;  %v3613_v1 = vadd.f32 0.014752088, %v3612_v62  ;;  %v5385_v47 = vadd.f32 %v3590_v50, %v3563_v39 }
 0xf9c   :  { %v3614_v0 = vmul.f32 %v3613_v1, %v3598_v11  ;;  %v5388_v55 = vmul.f32 0.70710677, %v5385_v47  ;;  %v3603_v27 = vmul.f32 %v3602_v25, %v3598_v11  ;;  %v3593_v25 = vmul.f32 0.5, %v5378_v29 }
 0xf9e   :  { %v3615_v3 = vadd.f32 0.112945676, %v3614_v0  ;;  %v3637_v12 = vmul.f32 %v5388_v55, %v5388_v55  ;;  %v3604_v42 = vadd.f32 0.05243302, %v3603_v27 }
 0xfa0   :  { %v3616_v45 = vmul.f32 %v3615_v3, %v3598_v11  ;;  %v5395_v28 = vmin.f32 %v3637_v12, 16.0  ;;  %v3605_v23 = vmul.f32 %v3604_v42, %v3598_v11 }
 0xfa2   :  { %v3617_v49 = vadd.f32 0.4994258, %v3616_v45  ;;  %v3639_v7 = vmul.f32 2.1237322e-06, %v5395_v28  ;;  %v3650_v43 = vmul.f32 3.8918573e-05, %v5395_v28 }
 0xfa3   :  { %v3606_v37 = vadd.f32 0.18741608, %v3605_v23 }
 0xfa4   :  { %v3618_v16 = vmul.f32 %v3617_v49, %v3598_v11  ;;  %v3640_v2 = vadd.f32 0.00028619796, %v3639_v7  ;;  %v3651_v10 = vadd.f32 0.001143296, %v3650_v43 }
 0xfa5   :  { %v3607_v61 = vmul.f32 %v3606_v37, %v3598_v11 }
 0xfa6   :  { %v3619_v48 = vadd.f32 1.0, %v3618_v16  ;;  %v3641_v6 = vmul.f32 %v3640_v2, %v5395_v28  ;;  %v3652_v18 = vmul.f32 %v3651_v10, %v5395_v28  ;;  %v3594_v16 = vmul.f32 0.5, %v5385_v47 }
 0xfa7   :  { %v3608_v41 = vadd.f32 1.1283791, %v3607_v61  ;;  %v3681_v10 = vperm.slane %v5342_v20, 3 }
 0xfa8   :  { %4006 = vrcp.f32 %v3619_v48  ;;  %v3653_v59 = vadd.f32 0.014752088, %v3652_v18  ;;  %v3642_v46 = vadd.f32 0.0036580483, %v3641_v6  ;;  %v3631_v33 = vand.u32 2147483648, %v3619_v48 }
 0xfa9   :  { %v3629_v26 = vand.u32 2147483647, %v3619_v48  ;;  %vm3625_vm15 = vweird.f32 %v3619_v48  ;;  %v3609_v38 = vmul.f32 %v3608_v41, %v5381_v15 }
 0xfaa   :  { %v3654_v22 = vmul.f32 %v3653_v59, %v5395_v28  ;;  %v3643_v4 = vmul.f32 %v3642_v46, %v5395_v28  ;;  %v3632_v30 = vor.u32 1.1754944e-38, %v3631_v33 }
 0xfab   :  { %vm3630_vm2 = vcmp.eq.f32.partialorder %v3629_v26, 8.507059e+37 }
 0xfac   :  { %v3655_v40 = vadd.f32 0.112945676, %v3654_v22  ;;  %v3644_v31 = vadd.f32 0.05243302, %v3643_v4 }
 0xfae   :  { %v4007_v34 = vpop.eup %4006  ;;  %v3656_v19 = vmul.f32 %v3655_v40, %v5395_v28  ;;  %v3645_v11 = vmul.f32 %v3644_v31, %v5395_v28 }
 0xfaf   :  { %v3621_v53 = vmul.f32 %v4007_v34, %v3619_v48  ;;  %vm3626_vm14 = vweird.f32 %v4007_v34 }
 0xfb0   :  { %v3657_v14 = vadd.f32 0.4994258, %v3656_v19  ;;  %vm3627_vm1 = vmor %vm3625_vm15, %vm3626_vm14  ;;  %v3646_v44 = vadd.f32 0.18741608, %v3645_v11 }
 0xfb1   :  { %v3622_v63 = vsub.f32 1.0, %v3621_v53 }
 0xfb2   :  { %v3658_v35 = vmul.f32 %v3657_v14, %v5395_v28  ;;  %v3647_v0 = vmul.f32 %v3646_v44, %v5395_v28 }
 0xfb3   :  { %v3623_v54 = vmul.f32 %v4007_v34, %v3622_v63 }
 0xfb4   :  { %v3659_v17 = vadd.f32 1.0, %v3658_v35  ;;  %v3648_v15 = vadd.f32 1.1283791, %v3647_v0 }
 0xfb5   :  { %v3624_v39 = vadd.f32 %v4007_v34, %v3623_v54 }
 0xfb6   :  { %4008 = vrcp.f32 %v3659_v17  ;;  %v3671_v36 = vand.u32 2147483648, %v3659_v17  ;;  %v3669_v5 = vand.u32 2147483647, %v3659_v17  ;;  %vm3665_vm4 = vweird.f32 %v3659_v17 }
 0xfb7   :  { %v3628_v32 = vsel %vm3627_vm1, %v4007_v34, %v3624_v39  ;;  %v3649_v7 = vmul.f32 %v3648_v15, %v5388_v55  ;;  %v3757_v39 = vperm.slane %v5342_v20, 6 }
 0xfb8   :  { %v3633_v60 = vsel %vm3630_vm2, %v3632_v30, %v3628_v32  ;;  %v3672_v49 = vor.u32 1.1754944e-38, %v3671_v36  ;;  %vm3670_vm6 = vcmp.eq.f32.partialorder %v3669_v5, 8.507059e+37  ;;  %v3760_v30 = vperm.slane %v5342_v20, 7 }
 0xfb9   :  { %v3634_v24 = vmul.f32 %v3633_v60, %v3609_v38 }
 0xfbb   :  { %v3854_v62 = vclamps-f32 %v3634_v24, 1.0 }
 0xfbc   :  { %v4009_v50 = vpop.eup %4008 }
 0xfbd   :  { %v3677_v1 = vadd.f32 1.0, %v3854_v62  ;;  %v3661_v27 = vmul.f32 %v4009_v50, %v3659_v17  ;;  %vm3666_vm3 = vweird.f32 %v4009_v50 }
 0xfbe   :  { %vm3667_vm5 = vmor %vm3665_vm4, %vm3666_vm3 }
 0xfbf   :  { %v3679_v3 = vmul.f32 %v3677_v1, %v3593_v25  ;;  %v3662_v12 = vsub.f32 1.0, %v3661_v27 }
 0xfc1   :  { %3856 = vmatmul.msk.f32.vlgmr.msrb.gmra.mxu2 %vm1869_vm7, %v3679_v3  ;;  %v3663_v45 = vmul.f32 %v4009_v50, %v3662_v12 }
 0xfc3   :  { %v3664_v42 = vadd.f32 %v4009_v50, %v3663_v45 }
 0xfc5   :  { %v3668_v29 = vsel %vm3667_vm5, %v4009_v50, %v3664_v42 }
 0xfc6   :  { %v3673_v43 = vsel %vm3670_vm6, %v3672_v49, %v3668_v29 }
 0xfc7   :  { %v3674_v28 = vmul.f32 %v3673_v43, %v3649_v7 }
 0xfc9   :  { %v3855_v8 = vclamps-f32 %v3674_v28, 1.0 }
 0xfcb   :  { %v3678_v2 = vadd.f32 1.0, %v3855_v8 }
 0xfcd   :  { %v3680_v57 = vmul.f32 %v3678_v2, %v3594_v16 }
 0xfcf   :  { %3857 = vmatmul.msk.f32.gmra.mxu2 %vm1869_vm7, %v3680_v57 }
0x1044   :  { %v3705_v23 = vpop.f32.mrf.mxu2 }
0x1045   :  { %v3706_v48 = vadd.f32 %v3705_v23, %v3681_v10 }
0x1047   :  { %v3711_v6 = vadd.f32 %v3706_v48, %v5369_v51 }
0x1049   :  { %v3713_v52 = vsel %vm45_vm0, %v3711_v6, 0.0 }
0x104a   :  { %3714 = vadd.xlane.f32.xlu1 %v3713_v52 }
0x1052   :  { %v3708_v55 = vpop.f32.mrf.mxu2 }
0x1053   :  { %v3709_v18 = vadd.f32 %v3708_v55, %v3681_v10 }
0x1055   :  { %v3712_v56 = vadd.f32 %v3709_v18, %v5373_v58 }
0x1057   :  { %v3716_v59 = vsel %vm45_vm0, %v3712_v56, 0.0 }
0x1058   :  { %3717 = vadd.xlane.f32.xlu0 %v3716_v59 }
0x10bd   :  { %v3715_v47 = vpop.xlane.xlu1 %3714 }
0x10be   :  { %v3719_v9 = vmul.f32 %v3715_v47, %v4100_v13 }
0x10c0   :  { %v3721_v37 = vsub.f32 %v3711_v6, %v3719_v9 }
0x10c2   :  { %v3723_v46 = vmul.f32 %v3721_v37, %v3721_v37 }
0x10c4   :  { %v3725_v22 = vsel %vm45_vm0, %v3723_v46, 0.0 }
0x10c5   :  { %3726 = vadd.xlane.f32.xlu2 %v3725_v22 }
0x10cb   :  { %v3718_v21 = vpop.xlane.xlu0 %3717 }
0x10cc   :  { %v3720_v51 = vmul.f32 %v3718_v21, %v4100_v13 }
0x10ce   :  { %v3722_v40 = vsub.f32 %v3712_v56, %v3720_v51 }
0x10d0   :  { %v3724_v34 = vmul.f32 %v3722_v40, %v3722_v40 }
0x10d2   :  { %v3728_v61 = vsel %vm45_vm0, %v3724_v34, 0.0 }
0x10d3   :  { %3729 = vadd.xlane.f32.xlu1 %v3728_v61 }
0x1138   :  { %v3727_v58 = vpop.xlane.xlu2 %3726 }
0x1139   :  { %v3731_v4 = vmul.f32 %v3727_v58, %v4100_v13 }
0x113b   :  { %v3733_v53 = vadd.f32 1e-05, %v3731_v4 }
0x113d   :  { %4010 = vrsqrt.f32 %v3733_v53  ;;  %vm3741_vm8 = vweird.f32 %v3733_v53 }
0x1143   :  { %v4011_v19 = vpop.eup %4010 }
0x1144   :  { %v3736_v63 = vmul.f32 %v4011_v19, %v3733_v53  ;;  %vm3742_vm7 = vweird.f32 %v4011_v19 }
0x1145   :  { %vm3743_vm9 = vmor %vm3741_vm8, %vm3742_vm7 }
0x1146   :  { %v3737_v14 = vmul.f32 %v4011_v19, %v3736_v63  ;;  %v3730_v41 = vpop.xlane.xlu1 %3729 }
0x1147   :  { %v3732_v31 = vmul.f32 %v3730_v41, %v4100_v13 }
0x1148   :  { %v3738_v33 = vmul.f32 0.5, %v3737_v14 }
0x1149   :  { %v3734_v26 = vadd.f32 1e-05, %v3732_v31 }
0x114a   :  { %v3739_v54 = vsub.f32 1.5, %v3738_v33 }
0x114b   :  { %4012 = vrsqrt.f32 %v3734_v26  ;;  %vm3751_vm11 = vweird.f32 %v3734_v26 }
0x114c   :  { %v3740_v35 = vmul.f32 %v4011_v19, %v3739_v54 }
0x114e   :  { %v3744_v17 = vsel %vm3743_vm9, %v4011_v19, %v3740_v35 }
0x114f   :  { %v3755_v11 = vmul.f32 %v3744_v17, %v3721_v37 }
0x1151   :  { %v3758_v38 = vmul.f32 %v3757_v39, %v3755_v11  ;;  %v4013_v32 = vpop.eup %4012 }
0x1152   :  { %v3746_v24 = vmul.f32 %v4013_v32, %v3734_v26  ;;  %vm3752_vm10 = vweird.f32 %v4013_v32 }
0x1153   :  { %v3761_v60 = vadd.f32 %v3760_v30, %v3758_v38  ;;  %vm3753_vm12 = vmor %vm3751_vm11, %vm3752_vm10 }
0x1154   :  { %v3747_v13 = vmul.f32 %v4013_v32, %v3746_v24 }
0x1155   :  { %3763 = vst.msk [vmem:[%s5464_s9] sm:$0xff] %vm45_vm0, %v3761_v60 }
0x1156   :  { %v3748_v44 = vmul.f32 0.5, %v3747_v13 }
0x1158   :  { %v3749_v62 = vsub.f32 1.5, %v3748_v44 }
0x115a   :  { %v3750_v50 = vmul.f32 %v4013_v32, %v3749_v62 }
0x115c   :  { %v3754_v25 = vsel %vm3753_vm12, %v4013_v32, %v3750_v50 }
0x115d   :  { %v3756_v1 = vmul.f32 %v3754_v25, %v3722_v40 }
0x115f   :  { %v3759_v20 = vmul.f32 %v3757_v39, %v3756_v1 }
0x1161   :  { %v3762_v0 = vadd.f32 %v3760_v30, %v3759_v20 }
0x1163   :  { %3764 = vst.msk [vmem:[%s5464_s9 + $0x8] sm:$0xff] %vm45_vm0, %v3762_v0 }

</bundles_post_ra>
